<compile_context>
chip_gen: v5e
topology: v5e:2x2
jax: 0.10.0
libtpu: 0.0.40
codegen_flags: <defaults>
</compile_context>

<pallas_src>
import functools

import jax
import jax.numpy as jnp
from jax import lax
from jax.experimental import pallas as pl
from jax.experimental.pallas import tpu as pltpu


# ---------------------------------------------------------------------------
# Fused kernel: all LSTM layers (bidirectional, batch-stacked) + BN-folded FC head
# ---------------------------------------------------------------------------
def fused_bilstm_head_kernel(*refs, T, B_pad, H, num_layers):
    # refs = [x, (wih, whh, b) * num_layers, wfc, bfc, out, gx_scratch, hs_scratch]
    x_ref = refs[0]
    layer_refs = refs[1:1 + 3 * num_layers]
    wfc_ref = refs[1 + 3 * num_layers]
    bfc_ref = refs[2 + 3 * num_layers]
    out_ref = refs[3 + 3 * num_layers]
    gx_ref = refs[4 + 3 * num_layers]        # VMEM (T*2*B_pad, 4H) f32: per-step gate-x tiles
    hs_ref = refs[5 + 3 * num_layers]        # VMEM (T*B_pad, 2H)  bf16: per-layer outputs

    GH = 4 * H                               # gates per direction (PyTorch order i,f,g,o)
    S2 = 2 * B_pad                           # rows of the stacked (fwd;bwd) state
    row = lax.broadcasted_iota(jnp.int32, (S2, 1), 0)
    is_fwd = row < B_pad                     # rows 0:B_pad = forward, B_pad:2*B_pad = backward

    x_in = x_ref[...]                        # (T*B_pad, I0) bf16, time-major flattened

    last_f = None
    last_b = None
    for l in range(num_layers):
        wih = layer_refs[3 * l][...]         # (I_l, 8H) bf16, [fwd | bwd]
        whh = layer_refs[3 * l + 1][...]     # (H,   8H) bf16, [fwd | bwd]
        b = layer_refs[3 * l + 2][...]       # (1,   8H) f32,  (b_ih + b_hh) per dir

        # Hoisted input projection for the whole sequence, both directions at once (off the
        # serial chain): one (T*B_pad, I) @ (I, 8H) matmul per layer.
        gx = jnp.dot(x_in, wih, preferred_element_type=jnp.float32) + b   # (T*B_pad, 8H) f32

        # Pre-arrange per-step gate-x tiles once per layer:
        #   gx_ref[step s] = [ fwd gate-x @ time s ; bwd gate-x @ time T-1-s ]   (contiguous)
        for s in range(T):
            gx_ref[s * S2:s * S2 + B_pad, :] = gx[s * B_pad:(s + 1) * B_pad, 0:GH]
            gx_ref[s * S2 + B_pad:(s + 1) * S2, :] = \
                gx[(T - 1 - s) * B_pad:(T - s) * B_pad, GH:2 * GH]

        h = jnp.zeros((S2, H), jnp.bfloat16)     # recurrent state stays bf16 (MXU input dtype)
        c = jnp.zeros((S2, H), jnp.float32)      # cell state stays f32
        for s in range(T):
            gx_t = gx_ref[s * S2:(s + 1) * S2, :]                # (2B_pad, 4H), one aligned tile

            # Single recurrent matmul for both directions (serial critical path).
            gh_full = jnp.dot(h, whh, preferred_element_type=jnp.float32)          # (2B_pad, 8H)
            gh = jnp.where(is_fwd, gh_full[:, 0:GH], gh_full[:, GH:2 * GH])        # (2B_pad, 4H)

            gates = gx_t + gh                    # f32 gate math (v5e-safe)
            sig = jax.nn.sigmoid(gates)          # i, f, o come from here
            i_g = sig[:, 0:H]
            f_g = sig[:, H:2 * H]
            o_g = sig[:, 3 * H:4 * H]
            g_g = jnp.tanh(gates[:, 2 * H:3 * H])   # tanh only on the cell-candidate slice
            c = f_g * c + i_g * g_g
            h_f32 = o_g * jnp.tanh(c)
            h = h_f32.astype(jnp.bfloat16)       # single bf16 state feeds next step's MXU push

            if l + 1 < num_layers:
                # Time-aligned next-layer input: [h_fwd@t | h_bwd@t], time-major rows.
                hs_ref[s * B_pad:(s + 1) * B_pad, 0:H] = h[0:B_pad]
                hs_ref[(T - 1 - s) * B_pad:(T - s) * B_pad, H:2 * H] = h[B_pad:2 * B_pad]
            else:
                # out[:, -1, :] = [h_fwd@(T-1) | h_bwd@(T-1)]; keep f32 for the head.
                if s == T - 1:
                    last_f = h_f32[0:B_pad, :]
                if s == 0:
                    last_b = h_f32[B_pad:2 * B_pad, :]

        if l + 1 < num_layers:
            x_in = hs_ref[...]                   # (T*B_pad, 2H) bf16, one contiguous read

    last = jnp.concatenate([last_f, last_b], axis=1)             # (B_pad, 2H) f32
    # Eval-mode BatchNorm + identity Dropout already folded into (wfc, bfc); lane-padded head.
    out_ref[...] = (jnp.dot(last, wfc_ref[...], preferred_element_type=jnp.float32)
                    + bfc_ref[...])


def model5_forward(x_btf, packed):
    # x_btf: (B, T, input_size), batch_first like PyTorch
    B, T, I = x_btf.shape
    layers = packed["layers"]
    num_layers = len(layers)
    H = layers[0][1].shape[0]
    wfc, bfc = packed["head"]                 # already lane-padded to C_pad columns
    C_pad = wfc.shape[1]
    num_classes = packed["num_classes"]

    # Pad the batch so each per-direction block is a whole 8-sublane tile.
    B_pad = ((B + 7) // 8) * 8
    x_p = jnp.zeros((B_pad, T, I), x_btf.dtype).at[:B].set(x_btf)
    # batch-first -> time-major flat; bf16 feed for the hoisted MXU projection.
    x_flat = jnp.transpose(x_p, (1, 0, 2)).reshape(T * B_pad, I).astype(jnp.bfloat16)

    args = [x_flat]
    for wih, whh, b in layers:
        args.extend((wih, whh, b))
    args.extend((wfc, bfc))

    kernel = functools.partial(fused_bilstm_head_kernel,
                               T=T, B_pad=B_pad, H=H, num_layers=num_layers)
    out = pl.pallas_call(
        kernel,
        out_shape=jax.ShapeDtypeStruct((B_pad, C_pad), jnp.float32),
        scratch_shapes=[
            pltpu.VMEM((T * 2 * B_pad, 4 * H), jnp.float32),   # pre-arranged per-step gate-x
            pltpu.VMEM((T * B_pad, 2 * H), jnp.bfloat16),      # per-layer [h_fwd|h_bwd] outputs
        ],
    )(*args)
    return out[:B, :num_classes]


# ---------------------------------------------------------------------------
# Parameters: raw PyTorch-like init + packing (weight concat, bf16, BN folding)
# ---------------------------------------------------------------------------
def init_params(key, input_size, hidden_size, num_layers, num_classes):
    k = 1.0 / jnp.sqrt(jnp.float32(hidden_size))
    lstm = []
    for layer in range(num_layers):
        in_sz = input_size if layer == 0 else 2 * hidden_size
        dirs = []
        for _ in range(2):  # fwd, bwd
            key, k1, k2, k3, k4 = jax.random.split(key, 5)
            w_ih = jax.random.uniform(k1, (4 * hidden_size, in_sz), jnp.float32, -k, k)
            w_hh = jax.random.uniform(k2, (4 * hidden_size, hidden_size), jnp.float32, -k, k)
            b_ih = jax.random.uniform(k3, (4 * hidden_size,), jnp.float32, -k, k)
            b_hh = jax.random.uniform(k4, (4 * hidden_size,), jnp.float32, -k, k)
            dirs.append((w_ih, w_hh, b_ih, b_hh))
        lstm.append(tuple(dirs))

    # BatchNorm1d(2H) default init: gamma=1, beta=0, running_mean=0, running_var=1
    F = 2 * hidden_size
    bn = (jnp.ones((F,), jnp.float32), jnp.zeros((F,), jnp.float32),
          jnp.zeros((F,), jnp.float32), jnp.ones((F,), jnp.float32))

    key, k1, k2 = jax.random.split(key, 3)
    fk = 1.0 / jnp.sqrt(jnp.float32(F))
    w_fc = jax.random.uniform(k1, (num_classes, F), jnp.float32, -fk, fk)
    b_fc = jax.random.uniform(k2, (num_classes,), jnp.float32, -fk, fk)
    return {"lstm": lstm, "bn": bn, "fc": (w_fc, b_fc)}


def pack_params(raw, eps=1e-5):
    layers = []
    for (wif, whf, bif, bhf), (wib, whb, bib, bhb) in raw["lstm"]:
        H = whf.shape[1]
        # Gate-boundary lane slices stay vreg-aligned only if 4H is a multiple of 128.
        assert (4 * H) % 128 == 0, "this kernel requires 4*hidden_size to be a multiple of 128"
        wih = jnp.concatenate([wif.T, wib.T], axis=1).astype(jnp.bfloat16)        # (I_l, 8H)
        whh = jnp.concatenate([whf.T, whb.T], axis=1).astype(jnp.bfloat16)        # (H,   8H)
        b = jnp.concatenate([bif + bhf, bib + bhb])[None, :].astype(jnp.float32)  # (1,   8H)
        layers.append((wih, whh, b))

    # Fold eval-mode BatchNorm into the FC weights: y = x*scale + shift, then Linear.
    gamma, beta, mean, var = raw["bn"]
    w_fc, b_fc = raw["fc"]                                                        # (C, 2H), (C,)
    C = w_fc.shape[0]
    scale = gamma * lax.rsqrt(var + eps)                                          # (2H,)
    wfc = (w_fc * scale[None, :]).T.astype(jnp.float32)                           # (2H, C)
    bfc = (b_fc + (beta - mean * scale) @ w_fc.T)[None, :].astype(jnp.float32)    # (1, C)
    # Lane-pad the head output to a dense 128-wide store.
    C_pad = ((C + 127) // 128) * 128
    wfc = jnp.pad(wfc, ((0, 0), (0, C_pad - C)))
    bfc = jnp.pad(bfc, ((0, 0), (0, C_pad - C)))
    return {"layers": layers, "head": (wfc, bfc), "num_classes": C}


# ---------------------------------------------------------------------------
# Pure-JAX reference (unfolded BN + FC; LSTM matmuls mirror the kernel's bf16 inputs)
# ---------------------------------------------------------------------------
def _lstm_dir_ref(x_tbi, w_ih, w_hh, b_ih, b_hh, reverse):
    T, Bb, _ = x_tbi.shape
    H = w_hh.shape[1]
    wih_t = w_ih.T.astype(jnp.bfloat16)
    whh_t = w_hh.T.astype(jnp.bfloat16)
    b = (b_ih + b_hh)[None, :]
    xs = x_tbi[::-1] if reverse else x_tbi

    def step(carry, x_t):
        h, c = carry
        gates = (jnp.dot(x_t.astype(jnp.bfloat16), wih_t, preferred_element_type=jnp.float32)
                 + jnp.dot(h.astype(jnp.bfloat16), whh_t, preferred_element_type=jnp.float32)
                 + b)
        i_g = jax.nn.sigmoid(gates[:, :H])
        f_g = jax.nn.sigmoid(gates[:, H:2 * H])
        g_g = jnp.tanh(gates[:, 2 * H:3 * H])
        o_g = jax.nn.sigmoid(gates[:, 3 * H:])
        c = f_g * c + i_g * g_g
        h = o_g * jnp.tanh(c)
        return (h, c), h

    init = (jnp.zeros((Bb, H), jnp.float32), jnp.zeros((Bb, H), jnp.float32))
    _, ys = lax.scan(step, init, xs)
    return ys[::-1] if reverse else ys


def model5_forward_ref(x_btf, raw, eps=1e-5):
    h = jnp.transpose(x_btf, (1, 0, 2))
    for fwd_p, bwd_p in raw["lstm"]:
        f = _lstm_dir_ref(h, *fwd_p, reverse=False)
        bw = _lstm_dir_ref(h, *bwd_p, reverse=True)
        h = jnp.concatenate([f, bw], axis=-1)
    last = h[-1]
    gamma, beta, mean, var = raw["bn"]
    w_fc, b_fc = raw["fc"]
    xn = (last - mean) * lax.rsqrt(var + eps) * gamma + beta   # eval-mode BN
    return xn @ w_fc.T + b_fc                                  # Dropout(0.2) = identity (eval)


# ---------------------------------------------------------------------------
if __name__ == "__main__":
    B, T = 2, 8
    input_size, hidden_size, num_layers, num_classes = 16, 32, 2, 8

    key = jax.random.PRNGKey(0)
    key, kx, kp = jax.random.split(key, 3)
    x = jax.random.normal(kx, (B, T, input_size), jnp.float32)

    raw = init_params(kp, input_size, hidden_size, num_layers, num_classes)
    packed = pack_params(raw)

    out = jax.block_until_ready(model5_forward(x, packed))
    ref = jax.block_until_ready(model5_forward_ref(x, raw))

    assert out.shape == (B, num_classes)
    assert jnp.allclose(out, ref, atol=2e-3, rtol=2e-3), (out, ref)
    print("KERNEL_OK")
</pallas_src>

<mosaic_0001>
module attributes {stable_mosaic.version = 11 : i64} {
  func.func @fused_bilstm_head_kernel(%arg0: memref<64x16xbf16, #tpu.memory_space<vmem>>, %arg1: memref<16x256xbf16, #tpu.memory_space<vmem>>, %arg2: memref<32x256xbf16, #tpu.memory_space<vmem>>, %arg3: memref<1x256xf32, #tpu.memory_space<vmem>>, %arg4: memref<64x256xbf16, #tpu.memory_space<vmem>>, %arg5: memref<32x256xbf16, #tpu.memory_space<vmem>>, %arg6: memref<1x256xf32, #tpu.memory_space<vmem>>, %arg7: memref<64x128xf32, #tpu.memory_space<vmem>>, %arg8: memref<1x128xf32, #tpu.memory_space<vmem>>, %arg9: memref<8x128xf32, #tpu.memory_space<vmem>>, %arg10: memref<128x128xf32, #tpu.memory_space<vmem>>, %arg11: memref<64x64xbf16, #tpu.memory_space<vmem>>) attributes {dimension_semantics = [], scalar_prefetch = 0 : i64, scratch_operands = 2 : i64, tpu.core_type = #tpu.core_type<tc>} {
    %0 = tpu.iota {dimensions = array<i32: 0>} : vector<16x1xi32>
    %c8_i32 = arith.constant 8 : i32
    %1 = vector.broadcast %c8_i32 : i32 to vector<16x1xi32>
    %2 = arith.cmpi slt, %0, %1 : vector<16x1xi32>
    %c0 = arith.constant 0 : index
    %c0_0 = arith.constant 0 : index
    %3 = vector.load %arg0[%c0, %c0_0] : memref<64x16xbf16, #tpu.memory_space<vmem>>, vector<64x16xbf16>
    %c0_1 = arith.constant 0 : index
    %c0_2 = arith.constant 0 : index
    %4 = vector.load %arg1[%c0_1, %c0_2] : memref<16x256xbf16, #tpu.memory_space<vmem>>, vector<16x256xbf16>
    %c0_3 = arith.constant 0 : index
    %c0_4 = arith.constant 0 : index
    %5 = vector.load %arg2[%c0_3, %c0_4] : memref<32x256xbf16, #tpu.memory_space<vmem>>, vector<32x256xbf16>
    %c0_5 = arith.constant 0 : index
    %c0_6 = arith.constant 0 : index
    %6 = vector.load %arg3[%c0_5, %c0_6] : memref<1x256xf32, #tpu.memory_space<vmem>>, vector<1x256xf32>
    %cst = arith.constant dense<0.000000e+00> : vector<64x256xf32>
    %7 = tpu.matmul %3, %4, %cst {dimension_numbers = #tpu.dot_dimension_numbers<[1], [0], [0], [1], [0, 0, 1, 1], [], []>} : vector<64x16xbf16>, vector<16x256xbf16>, vector<64x256xf32> -> vector<64x256xf32>
    %8 = vector.broadcast %6 : vector<1x256xf32> to vector<64x256xf32>
    %9 = arith.addf %7, %8 : vector<64x256xf32>
    %10 = vector.extract_strided_slice %9 {offsets = [0, 0], sizes = [8, 128], strides = [1, 1]} : vector<64x256xf32> to vector<8x128xf32>
    %c0_7 = arith.constant 0 : index
    %c0_8 = arith.constant 0 : index
    %11 = vector.load %arg10[%c0_7, %c0_8] : memref<128x128xf32, #tpu.memory_space<vmem>>, vector<8x128xf32>
    tpu.vector_store %arg10[%c0_7, %c0_8], %10 {strides = array<i32>} : memref<128x128xf32, #tpu.memory_space<vmem>>, vector<8x128xf32>,
    %12 = vector.extract_strided_slice %9 {offsets = [56, 128], sizes = [8, 128], strides = [1, 1]} : vector<64x256xf32> to vector<8x128xf32>
    %c8 = arith.constant 8 : index
    %c0_9 = arith.constant 0 : index
    %13 = vector.load %arg10[%c8, %c0_9] : memref<128x128xf32, #tpu.memory_space<vmem>>, vector<8x128xf32>
    tpu.vector_store %arg10[%c8, %c0_9], %12 {strides = array<i32>} : memref<128x128xf32, #tpu.memory_space<vmem>>, vector<8x128xf32>,
    %14 = vector.extract_strided_slice %9 {offsets = [8, 0], sizes = [8, 128], strides = [1, 1]} : vector<64x256xf32> to vector<8x128xf32>
    %c16 = arith.constant 16 : index
    %c0_10 = arith.constant 0 : index
    %15 = vector.load %arg10[%c16, %c0_10] : memref<128x128xf32, #tpu.memory_space<vmem>>, vector<8x128xf32>
    tpu.vector_store %arg10[%c16, %c0_10], %14 {strides = array<i32>} : memref<128x128xf32, #tpu.memory_space<vmem>>, vector<8x128xf32>,
    %16 = vector.extract_strided_slice %9 {offsets = [48, 128], sizes = [8, 128], strides = [1, 1]} : vector<64x256xf32> to vector<8x128xf32>
    %c24 = arith.constant 24 : index
    %c0_11 = arith.constant 0 : index
    %17 = vector.load %arg10[%c24, %c0_11] : memref<128x128xf32, #tpu.memory_space<vmem>>, vector<8x128xf32>
    tpu.vector_store %arg10[%c24, %c0_11], %16 {strides = array<i32>} : memref<128x128xf32, #tpu.memory_space<vmem>>, vector<8x128xf32>,
    %18 = vector.extract_strided_slice %9 {offsets = [16, 0], sizes = [8, 128], strides = [1, 1]} : vector<64x256xf32> to vector<8x128xf32>
    %c32 = arith.constant 32 : index
    %c0_12 = arith.constant 0 : index
    %19 = vector.load %arg10[%c32, %c0_12] : memref<128x128xf32, #tpu.memory_space<vmem>>, vector<8x128xf32>
    tpu.vector_store %arg10[%c32, %c0_12], %18 {strides = array<i32>} : memref<128x128xf32, #tpu.memory_space<vmem>>, vector<8x128xf32>,
    %20 = vector.extract_strided_slice %9 {offsets = [40, 128], sizes = [8, 128], strides = [1, 1]} : vector<64x256xf32> to vector<8x128xf32>
    %c40 = arith.constant 40 : index
    %c0_13 = arith.constant 0 : index
    %21 = vector.load %arg10[%c40, %c0_13] : memref<128x128xf32, #tpu.memory_space<vmem>>, vector<8x128xf32>
    tpu.vector_store %arg10[%c40, %c0_13], %20 {strides = array<i32>} : memref<128x128xf32, #tpu.memory_space<vmem>>, vector<8x128xf32>,
    %22 = vector.extract_strided_slice %9 {offsets = [24, 0], sizes = [8, 128], strides = [1, 1]} : vector<64x256xf32> to vector<8x128xf32>
    %c48 = arith.constant 48 : index
    %c0_14 = arith.constant 0 : index
    %23 = vector.load %arg10[%c48, %c0_14] : memref<128x128xf32, #tpu.memory_space<vmem>>, vector<8x128xf32>
    tpu.vector_store %arg10[%c48, %c0_14], %22 {strides = array<i32>} : memref<128x128xf32, #tpu.memory_space<vmem>>, vector<8x128xf32>,
    %24 = vector.extract_strided_slice %9 {offsets = [32, 128], sizes = [8, 128], strides = [1, 1]} : vector<64x256xf32> to vector<8x128xf32>
    %c56 = arith.constant 56 : index
    %c0_15 = arith.constant 0 : index
    %25 = vector.load %arg10[%c56, %c0_15] : memref<128x128xf32, #tpu.memory_space<vmem>>, vector<8x128xf32>
    tpu.vector_store %arg10[%c56, %c0_15], %24 {strides = array<i32>} : memref<128x128xf32, #tpu.memory_space<vmem>>, vector<8x128xf32>,
    %26 = vector.extract_strided_slice %9 {offsets = [32, 0], sizes = [8, 128], strides = [1, 1]} : vector<64x256xf32> to vector<8x128xf32>
    %c64 = arith.constant 64 : index
    %c0_16 = arith.constant 0 : index
    %27 = vector.load %arg10[%c64, %c0_16] : memref<128x128xf32, #tpu.memory_space<vmem>>, vector<8x128xf32>
    tpu.vector_store %arg10[%c64, %c0_16], %26 {strides = array<i32>} : memref<128x128xf32, #tpu.memory_space<vmem>>, vector<8x128xf32>,
    %28 = vector.extract_strided_slice %9 {offsets = [24, 128], sizes = [8, 128], strides = [1, 1]} : vector<64x256xf32> to vector<8x128xf32>
    %c72 = arith.constant 72 : index
    %c0_17 = arith.constant 0 : index
    %29 = vector.load %arg10[%c72, %c0_17] : memref<128x128xf32, #tpu.memory_space<vmem>>, vector<8x128xf32>
    tpu.vector_store %arg10[%c72, %c0_17], %28 {strides = array<i32>} : memref<128x128xf32, #tpu.memory_space<vmem>>, vector<8x128xf32>,
    %30 = vector.extract_strided_slice %9 {offsets = [40, 0], sizes = [8, 128], strides = [1, 1]} : vector<64x256xf32> to vector<8x128xf32>
    %c80 = arith.constant 80 : index
    %c0_18 = arith.constant 0 : index
    %31 = vector.load %arg10[%c80, %c0_18] : memref<128x128xf32, #tpu.memory_space<vmem>>, vector<8x128xf32>
    tpu.vector_store %arg10[%c80, %c0_18], %30 {strides = array<i32>} : memref<128x128xf32, #tpu.memory_space<vmem>>, vector<8x128xf32>,
    %32 = vector.extract_strided_slice %9 {offsets = [16, 128], sizes = [8, 128], strides = [1, 1]} : vector<64x256xf32> to vector<8x128xf32>
    %c88 = arith.constant 88 : index
    %c0_19 = arith.constant 0 : index
    %33 = vector.load %arg10[%c88, %c0_19] : memref<128x128xf32, #tpu.memory_space<vmem>>, vector<8x128xf32>
    tpu.vector_store %arg10[%c88, %c0_19], %32 {strides = array<i32>} : memref<128x128xf32, #tpu.memory_space<vmem>>, vector<8x128xf32>,
    %34 = vector.extract_strided_slice %9 {offsets = [48, 0], sizes = [8, 128], strides = [1, 1]} : vector<64x256xf32> to vector<8x128xf32>
    %c96 = arith.constant 96 : index
    %c0_20 = arith.constant 0 : index
    %35 = vector.load %arg10[%c96, %c0_20] : memref<128x128xf32, #tpu.memory_space<vmem>>, vector<8x128xf32>
    tpu.vector_store %arg10[%c96, %c0_20], %34 {strides = array<i32>} : memref<128x128xf32, #tpu.memory_space<vmem>>, vector<8x128xf32>,
    %36 = vector.extract_strided_slice %9 {offsets = [8, 128], sizes = [8, 128], strides = [1, 1]} : vector<64x256xf32> to vector<8x128xf32>
    %c104 = arith.constant 104 : index
    %c0_21 = arith.constant 0 : index
    %37 = vector.load %arg10[%c104, %c0_21] : memref<128x128xf32, #tpu.memory_space<vmem>>, vector<8x128xf32>
    tpu.vector_store %arg10[%c104, %c0_21], %36 {strides = array<i32>} : memref<128x128xf32, #tpu.memory_space<vmem>>, vector<8x128xf32>,
    %38 = vector.extract_strided_slice %9 {offsets = [56, 0], sizes = [8, 128], strides = [1, 1]} : vector<64x256xf32> to vector<8x128xf32>
    %c112 = arith.constant 112 : index
    %c0_22 = arith.constant 0 : index
    %39 = vector.load %arg10[%c112, %c0_22] : memref<128x128xf32, #tpu.memory_space<vmem>>, vector<8x128xf32>
    tpu.vector_store %arg10[%c112, %c0_22], %38 {strides = array<i32>} : memref<128x128xf32, #tpu.memory_space<vmem>>, vector<8x128xf32>,
    %40 = vector.extract_strided_slice %9 {offsets = [0, 128], sizes = [8, 128], strides = [1, 1]} : vector<64x256xf32> to vector<8x128xf32>
    %c120 = arith.constant 120 : index
    %c0_23 = arith.constant 0 : index
    %41 = vector.load %arg10[%c120, %c0_23] : memref<128x128xf32, #tpu.memory_space<vmem>>, vector<8x128xf32>
    tpu.vector_store %arg10[%c120, %c0_23], %40 {strides = array<i32>} : memref<128x128xf32, #tpu.memory_space<vmem>>, vector<8x128xf32>,
    %cst_24 = arith.constant 0.000000e+00 : bf16
    %42 = vector.broadcast %cst_24 : bf16 to vector<16x32xbf16>
    %cst_25 = arith.constant 0.000000e+00 : f32
    %43 = vector.broadcast %cst_25 : f32 to vector<16x32xf32>
    %c0_26 = arith.constant 0 : index
    %c0_27 = arith.constant 0 : index
    %44 = vector.load %arg10[%c0_26, %c0_27] : memref<128x128xf32, #tpu.memory_space<vmem>>, vector<16x128xf32>
    %cst_28 = arith.constant dense<0.000000e+00> : vector<16x256xf32>
    %45 = tpu.matmul %42, %5, %cst_28 {dimension_numbers = #tpu.dot_dimension_numbers<[1], [0], [0], [1], [0, 0, 1, 1], [], []>} : vector<16x32xbf16>, vector<32x256xbf16>, vector<16x256xf32> -> vector<16x256xf32>
    %46 = vector.extract_strided_slice %45 {offsets = [0, 0], sizes = [16, 128], strides = [1, 1]} : vector<16x256xf32> to vector<16x128xf32>
    %47 = vector.extract_strided_slice %45 {offsets = [0, 128], sizes = [16, 128], strides = [1, 1]} : vector<16x256xf32> to vector<16x128xf32>
    %48 = vector.shape_cast %2 : vector<16x1xi1> to vector<16x1xi1>
    %49 = vector.broadcast %48 : vector<16x1xi1> to vector<16x128xi1>
    %50 = arith.select %49, %46, %47 : vector<16x128xi1>, vector<16x128xf32>
    %51 = arith.addf %44, %50 : vector<16x128xf32>
    %52 = arith.negf %51 : vector<16x128xf32>
    %53 = math.exp %52 : vector<16x128xf32>
    %cst_29 = arith.constant 1.000000e+00 : f32
    %54 = vector.broadcast %cst_29 : f32 to vector<16x128xf32>
    %55 = arith.addf %54, %53 : vector<16x128xf32>
    %56 = arith.divf %54, %55 : vector<16x128xf32>
    %57 = vector.extract_strided_slice %56 {offsets = [0, 0], sizes = [16, 32], strides = [1, 1]} : vector<16x128xf32> to vector<16x32xf32>
    %58 = vector.extract_strided_slice %56 {offsets = [0, 32], sizes = [16, 32], strides = [1, 1]} : vector<16x128xf32> to vector<16x32xf32>
    %59 = vector.extract_strided_slice %56 {offsets = [0, 96], sizes = [16, 32], strides = [1, 1]} : vector<16x128xf32> to vector<16x32xf32>
    %60 = vector.extract_strided_slice %51 {offsets = [0, 64], sizes = [16, 32], strides = [1, 1]} : vector<16x128xf32> to vector<16x32xf32>
    %61 = math.tanh %60 : vector<16x32xf32>
    %62 = arith.mulf %58, %43 : vector<16x32xf32>
    %63 = arith.mulf %57, %61 : vector<16x32xf32>
    %64 = arith.addf %62, %63 : vector<16x32xf32>
    %65 = math.tanh %64 : vector<16x32xf32>
    %66 = arith.mulf %59, %65 : vector<16x32xf32>
    %67 = arith.truncf %66 : vector<16x32xf32> to vector<16x32xbf16>
    %68 = vector.extract_strided_slice %67 {offsets = [0, 0], sizes = [8, 32], strides = [1, 1]} : vector<16x32xbf16> to vector<8x32xbf16>
    %c0_30 = arith.constant 0 : index
    %c0_31 = arith.constant 0 : index
    %69 = vector.load %arg11[%c0_30, %c0_31] : memref<64x64xbf16, #tpu.memory_space<vmem>>, vector<8x32xbf16>
    tpu.vector_store %arg11[%c0_30, %c0_31], %68 {strides = array<i32>} : memref<64x64xbf16, #tpu.memory_space<vmem>>, vector<8x32xbf16>,
    %70 = vector.extract_strided_slice %67 {offsets = [8, 0], sizes = [8, 32], strides = [1, 1]} : vector<16x32xbf16> to vector<8x32xbf16>
    %c56_32 = arith.constant 56 : index
    %c32_33 = arith.constant 32 : index
    %71 = vector.load %arg11[%c56_32, %c32_33] : memref<64x64xbf16, #tpu.memory_space<vmem>>, vector<8x32xbf16>
    tpu.vector_store %arg11[%c56_32, %c32_33], %70 {strides = array<i32>} : memref<64x64xbf16, #tpu.memory_space<vmem>>, vector<8x32xbf16>,
    %c16_34 = arith.constant 16 : index
    %c0_35 = arith.constant 0 : index
    %72 = vector.load %arg10[%c16_34, %c0_35] : memref<128x128xf32, #tpu.memory_space<vmem>>, vector<16x128xf32>
    %cst_36 = arith.constant dense<0.000000e+00> : vector<16x256xf32>
    %73 = tpu.matmul %67, %5, %cst_36 {dimension_numbers = #tpu.dot_dimension_numbers<[1], [0], [0], [1], [0, 0, 1, 1], [], []>} : vector<16x32xbf16>, vector<32x256xbf16>, vector<16x256xf32> -> vector<16x256xf32>
    %74 = vector.extract_strided_slice %73 {offsets = [0, 0], sizes = [16, 128], strides = [1, 1]} : vector<16x256xf32> to vector<16x128xf32>
    %75 = vector.extract_strided_slice %73 {offsets = [0, 128], sizes = [16, 128], strides = [1, 1]} : vector<16x256xf32> to vector<16x128xf32>
    %76 = vector.shape_cast %2 : vector<16x1xi1> to vector<16x1xi1>
    %77 = vector.broadcast %76 : vector<16x1xi1> to vector<16x128xi1>
    %78 = arith.select %77, %74, %75 : vector<16x128xi1>, vector<16x128xf32>
    %79 = arith.addf %72, %78 : vector<16x128xf32>
    %80 = arith.negf %79 : vector<16x128xf32>
    %81 = math.exp %80 : vector<16x128xf32>
    %cst_37 = arith.constant 1.000000e+00 : f32
    %82 = vector.broadcast %cst_37 : f32 to vector<16x128xf32>
    %83 = arith.addf %82, %81 : vector<16x128xf32>
    %84 = arith.divf %82, %83 : vector<16x128xf32>
    %85 = vector.extract_strided_slice %84 {offsets = [0, 0], sizes = [16, 32], strides = [1, 1]} : vector<16x128xf32> to vector<16x32xf32>
    %86 = vector.extract_strided_slice %84 {offsets = [0, 32], sizes = [16, 32], strides = [1, 1]} : vector<16x128xf32> to vector<16x32xf32>
    %87 = vector.extract_strided_slice %84 {offsets = [0, 96], sizes = [16, 32], strides = [1, 1]} : vector<16x128xf32> to vector<16x32xf32>
    %88 = vector.extract_strided_slice %79 {offsets = [0, 64], sizes = [16, 32], strides = [1, 1]} : vector<16x128xf32> to vector<16x32xf32>
    %89 = math.tanh %88 : vector<16x32xf32>
    %90 = arith.mulf %86, %64 : vector<16x32xf32>
    %91 = arith.mulf %85, %89 : vector<16x32xf32>
    %92 = arith.addf %90, %91 : vector<16x32xf32>
    %93 = math.tanh %92 : vector<16x32xf32>
    %94 = arith.mulf %87, %93 : vector<16x32xf32>
    %95 = arith.truncf %94 : vector<16x32xf32> to vector<16x32xbf16>
    %96 = vector.extract_strided_slice %95 {offsets = [0, 0], sizes = [8, 32], strides = [1, 1]} : vector<16x32xbf16> to vector<8x32xbf16>
    %c8_38 = arith.constant 8 : index
    %c0_39 = arith.constant 0 : index
    %97 = vector.load %arg11[%c8_38, %c0_39] : memref<64x64xbf16, #tpu.memory_space<vmem>>, vector<8x32xbf16>
    tpu.vector_store %arg11[%c8_38, %c0_39], %96 {strides = array<i32>} : memref<64x64xbf16, #tpu.memory_space<vmem>>, vector<8x32xbf16>,
    %98 = vector.extract_strided_slice %95 {offsets = [8, 0], sizes = [8, 32], strides = [1, 1]} : vector<16x32xbf16> to vector<8x32xbf16>
    %c48_40 = arith.constant 48 : index
    %c32_41 = arith.constant 32 : index
    %99 = vector.load %arg11[%c48_40, %c32_41] : memref<64x64xbf16, #tpu.memory_space<vmem>>, vector<8x32xbf16>
    tpu.vector_store %arg11[%c48_40, %c32_41], %98 {strides = array<i32>} : memref<64x64xbf16, #tpu.memory_space<vmem>>, vector<8x32xbf16>,
    %c32_42 = arith.constant 32 : index
    %c0_43 = arith.constant 0 : index
    %100 = vector.load %arg10[%c32_42, %c0_43] : memref<128x128xf32, #tpu.memory_space<vmem>>, vector<16x128xf32>
    %cst_44 = arith.constant dense<0.000000e+00> : vector<16x256xf32>
    %101 = tpu.matmul %95, %5, %cst_44 {dimension_numbers = #tpu.dot_dimension_numbers<[1], [0], [0], [1], [0, 0, 1, 1], [], []>} : vector<16x32xbf16>, vector<32x256xbf16>, vector<16x256xf32> -> vector<16x256xf32>
    %102 = vector.extract_strided_slice %101 {offsets = [0, 0], sizes = [16, 128], strides = [1, 1]} : vector<16x256xf32> to vector<16x128xf32>
    %103 = vector.extract_strided_slice %101 {offsets = [0, 128], sizes = [16, 128], strides = [1, 1]} : vector<16x256xf32> to vector<16x128xf32>
    %104 = vector.shape_cast %2 : vector<16x1xi1> to vector<16x1xi1>
    %105 = vector.broadcast %104 : vector<16x1xi1> to vector<16x128xi1>
    %106 = arith.select %105, %102, %103 : vector<16x128xi1>, vector<16x128xf32>
    %107 = arith.addf %100, %106 : vector<16x128xf32>
    %108 = arith.negf %107 : vector<16x128xf32>
    %109 = math.exp %108 : vector<16x128xf32>
    %cst_45 = arith.constant 1.000000e+00 : f32
    %110 = vector.broadcast %cst_45 : f32 to vector<16x128xf32>
    %111 = arith.addf %110, %109 : vector<16x128xf32>
    %112 = arith.divf %110, %111 : vector<16x128xf32>
    %113 = vector.extract_strided_slice %112 {offsets = [0, 0], sizes = [16, 32], strides = [1, 1]} : vector<16x128xf32> to vector<16x32xf32>
    %114 = vector.extract_strided_slice %112 {offsets = [0, 32], sizes = [16, 32], strides = [1, 1]} : vector<16x128xf32> to vector<16x32xf32>
    %115 = vector.extract_strided_slice %112 {offsets = [0, 96], sizes = [16, 32], strides = [1, 1]} : vector<16x128xf32> to vector<16x32xf32>
    %116 = vector.extract_strided_slice %107 {offsets = [0, 64], sizes = [16, 32], strides = [1, 1]} : vector<16x128xf32> to vector<16x32xf32>
    %117 = math.tanh %116 : vector<16x32xf32>
    %118 = arith.mulf %114, %92 : vector<16x32xf32>
    %119 = arith.mulf %113, %117 : vector<16x32xf32>
    %120 = arith.addf %118, %119 : vector<16x32xf32>
    %121 = math.tanh %120 : vector<16x32xf32>
    %122 = arith.mulf %115, %121 : vector<16x32xf32>
    %123 = arith.truncf %122 : vector<16x32xf32> to vector<16x32xbf16>
    %124 = vector.extract_strided_slice %123 {offsets = [0, 0], sizes = [8, 32], strides = [1, 1]} : vector<16x32xbf16> to vector<8x32xbf16>
    %c16_46 = arith.constant 16 : index
    %c0_47 = arith.constant 0 : index
    %125 = vector.load %arg11[%c16_46, %c0_47] : memref<64x64xbf16, #tpu.memory_space<vmem>>, vector<8x32xbf16>
    tpu.vector_store %arg11[%c16_46, %c0_47], %124 {strides = array<i32>} : memref<64x64xbf16, #tpu.memory_space<vmem>>, vector<8x32xbf16>,
    %126 = vector.extract_strided_slice %123 {offsets = [8, 0], sizes = [8, 32], strides = [1, 1]} : vector<16x32xbf16> to vector<8x32xbf16>
    %c40_48 = arith.constant 40 : index
    %c32_49 = arith.constant 32 : index
    %127 = vector.load %arg11[%c40_48, %c32_49] : memref<64x64xbf16, #tpu.memory_space<vmem>>, vector<8x32xbf16>
    tpu.vector_store %arg11[%c40_48, %c32_49], %126 {strides = array<i32>} : memref<64x64xbf16, #tpu.memory_space<vmem>>, vector<8x32xbf16>,
    %c48_50 = arith.constant 48 : index
    %c0_51 = arith.constant 0 : index
    %128 = vector.load %arg10[%c48_50, %c0_51] : memref<128x128xf32, #tpu.memory_space<vmem>>, vector<16x128xf32>
    %cst_52 = arith.constant dense<0.000000e+00> : vector<16x256xf32>
    %129 = tpu.matmul %123, %5, %cst_52 {dimension_numbers = #tpu.dot_dimension_numbers<[1], [0], [0], [1], [0, 0, 1, 1], [], []>} : vector<16x32xbf16>, vector<32x256xbf16>, vector<16x256xf32> -> vector<16x256xf32>
    %130 = vector.extract_strided_slice %129 {offsets = [0, 0], sizes = [16, 128], strides = [1, 1]} : vector<16x256xf32> to vector<16x128xf32>
    %131 = vector.extract_strided_slice %129 {offsets = [0, 128], sizes = [16, 128], strides = [1, 1]} : vector<16x256xf32> to vector<16x128xf32>
    %132 = vector.shape_cast %2 : vector<16x1xi1> to vector<16x1xi1>
    %133 = vector.broadcast %132 : vector<16x1xi1> to vector<16x128xi1>
    %134 = arith.select %133, %130, %131 : vector<16x128xi1>, vector<16x128xf32>
    %135 = arith.addf %128, %134 : vector<16x128xf32>
    %136 = arith.negf %135 : vector<16x128xf32>
    %137 = math.exp %136 : vector<16x128xf32>
    %cst_53 = arith.constant 1.000000e+00 : f32
    %138 = vector.broadcast %cst_53 : f32 to vector<16x128xf32>
    %139 = arith.addf %138, %137 : vector<16x128xf32>
    %140 = arith.divf %138, %139 : vector<16x128xf32>
    %141 = vector.extract_strided_slice %140 {offsets = [0, 0], sizes = [16, 32], strides = [1, 1]} : vector<16x128xf32> to vector<16x32xf32>
    %142 = vector.extract_strided_slice %140 {offsets = [0, 32], sizes = [16, 32], strides = [1, 1]} : vector<16x128xf32> to vector<16x32xf32>
    %143 = vector.extract_strided_slice %140 {offsets = [0, 96], sizes = [16, 32], strides = [1, 1]} : vector<16x128xf32> to vector<16x32xf32>
    %144 = vector.extract_strided_slice %135 {offsets = [0, 64], sizes = [16, 32], strides = [1, 1]} : vector<16x128xf32> to vector<16x32xf32>
    %145 = math.tanh %144 : vector<16x32xf32>
    %146 = arith.mulf %142, %120 : vector<16x32xf32>
    %147 = arith.mulf %141, %145 : vector<16x32xf32>
    %148 = arith.addf %146, %147 : vector<16x32xf32>
    %149 = math.tanh %148 : vector<16x32xf32>
    %150 = arith.mulf %143, %149 : vector<16x32xf32>
    %151 = arith.truncf %150 : vector<16x32xf32> to vector<16x32xbf16>
    %152 = vector.extract_strided_slice %151 {offsets = [0, 0], sizes = [8, 32], strides = [1, 1]} : vector<16x32xbf16> to vector<8x32xbf16>
    %c24_54 = arith.constant 24 : index
    %c0_55 = arith.constant 0 : index
    %153 = vector.load %arg11[%c24_54, %c0_55] : memref<64x64xbf16, #tpu.memory_space<vmem>>, vector<8x32xbf16>
    tpu.vector_store %arg11[%c24_54, %c0_55], %152 {strides = array<i32>} : memref<64x64xbf16, #tpu.memory_space<vmem>>, vector<8x32xbf16>,
    %154 = vector.extract_strided_slice %151 {offsets = [8, 0], sizes = [8, 32], strides = [1, 1]} : vector<16x32xbf16> to vector<8x32xbf16>
    %c32_56 = arith.constant 32 : index
    %c32_57 = arith.constant 32 : index
    %155 = vector.load %arg11[%c32_56, %c32_57] : memref<64x64xbf16, #tpu.memory_space<vmem>>, vector<8x32xbf16>
    tpu.vector_store %arg11[%c32_56, %c32_57], %154 {strides = array<i32>} : memref<64x64xbf16, #tpu.memory_space<vmem>>, vector<8x32xbf16>,
    %c64_58 = arith.constant 64 : index
    %c0_59 = arith.constant 0 : index
    %156 = vector.load %arg10[%c64_58, %c0_59] : memref<128x128xf32, #tpu.memory_space<vmem>>, vector<16x128xf32>
    %cst_60 = arith.constant dense<0.000000e+00> : vector<16x256xf32>
    %157 = tpu.matmul %151, %5, %cst_60 {dimension_numbers = #tpu.dot_dimension_numbers<[1], [0], [0], [1], [0, 0, 1, 1], [], []>} : vector<16x32xbf16>, vector<32x256xbf16>, vector<16x256xf32> -> vector<16x256xf32>
    %158 = vector.extract_strided_slice %157 {offsets = [0, 0], sizes = [16, 128], strides = [1, 1]} : vector<16x256xf32> to vector<16x128xf32>
    %159 = vector.extract_strided_slice %157 {offsets = [0, 128], sizes = [16, 128], strides = [1, 1]} : vector<16x256xf32> to vector<16x128xf32>
    %160 = vector.shape_cast %2 : vector<16x1xi1> to vector<16x1xi1>
    %161 = vector.broadcast %160 : vector<16x1xi1> to vector<16x128xi1>
    %162 = arith.select %161, %158, %159 : vector<16x128xi1>, vector<16x128xf32>
    %163 = arith.addf %156, %162 : vector<16x128xf32>
    %164 = arith.negf %163 : vector<16x128xf32>
    %165 = math.exp %164 : vector<16x128xf32>
    %cst_61 = arith.constant 1.000000e+00 : f32
    %166 = vector.broadcast %cst_61 : f32 to vector<16x128xf32>
    %167 = arith.addf %166, %165 : vector<16x128xf32>
    %168 = arith.divf %166, %167 : vector<16x128xf32>
    %169 = vector.extract_strided_slice %168 {offsets = [0, 0], sizes = [16, 32], strides = [1, 1]} : vector<16x128xf32> to vector<16x32xf32>
    %170 = vector.extract_strided_slice %168 {offsets = [0, 32], sizes = [16, 32], strides = [1, 1]} : vector<16x128xf32> to vector<16x32xf32>
    %171 = vector.extract_strided_slice %168 {offsets = [0, 96], sizes = [16, 32], strides = [1, 1]} : vector<16x128xf32> to vector<16x32xf32>
    %172 = vector.extract_strided_slice %163 {offsets = [0, 64], sizes = [16, 32], strides = [1, 1]} : vector<16x128xf32> to vector<16x32xf32>
    %173 = math.tanh %172 : vector<16x32xf32>
    %174 = arith.mulf %170, %148 : vector<16x32xf32>
    %175 = arith.mulf %169, %173 : vector<16x32xf32>
    %176 = arith.addf %174, %175 : vector<16x32xf32>
    %177 = math.tanh %176 : vector<16x32xf32>
    %178 = arith.mulf %171, %177 : vector<16x32xf32>
    %179 = arith.truncf %178 : vector<16x32xf32> to vector<16x32xbf16>
    %180 = vector.extract_strided_slice %179 {offsets = [0, 0], sizes = [8, 32], strides = [1, 1]} : vector<16x32xbf16> to vector<8x32xbf16>
    %c32_62 = arith.constant 32 : index
    %c0_63 = arith.constant 0 : index
    %181 = vector.load %arg11[%c32_62, %c0_63] : memref<64x64xbf16, #tpu.memory_space<vmem>>, vector<8x32xbf16>
    tpu.vector_store %arg11[%c32_62, %c0_63], %180 {strides = array<i32>} : memref<64x64xbf16, #tpu.memory_space<vmem>>, vector<8x32xbf16>,
    %182 = vector.extract_strided_slice %179 {offsets = [8, 0], sizes = [8, 32], strides = [1, 1]} : vector<16x32xbf16> to vector<8x32xbf16>
    %c24_64 = arith.constant 24 : index
    %c32_65 = arith.constant 32 : index
    %183 = vector.load %arg11[%c24_64, %c32_65] : memref<64x64xbf16, #tpu.memory_space<vmem>>, vector<8x32xbf16>
    tpu.vector_store %arg11[%c24_64, %c32_65], %182 {strides = array<i32>} : memref<64x64xbf16, #tpu.memory_space<vmem>>, vector<8x32xbf16>,
    %c80_66 = arith.constant 80 : index
    %c0_67 = arith.constant 0 : index
    %184 = vector.load %arg10[%c80_66, %c0_67] : memref<128x128xf32, #tpu.memory_space<vmem>>, vector<16x128xf32>
    %cst_68 = arith.constant dense<0.000000e+00> : vector<16x256xf32>
    %185 = tpu.matmul %179, %5, %cst_68 {dimension_numbers = #tpu.dot_dimension_numbers<[1], [0], [0], [1], [0, 0, 1, 1], [], []>} : vector<16x32xbf16>, vector<32x256xbf16>, vector<16x256xf32> -> vector<16x256xf32>
    %186 = vector.extract_strided_slice %185 {offsets = [0, 0], sizes = [16, 128], strides = [1, 1]} : vector<16x256xf32> to vector<16x128xf32>
    %187 = vector.extract_strided_slice %185 {offsets = [0, 128], sizes = [16, 128], strides = [1, 1]} : vector<16x256xf32> to vector<16x128xf32>
    %188 = vector.shape_cast %2 : vector<16x1xi1> to vector<16x1xi1>
    %189 = vector.broadcast %188 : vector<16x1xi1> to vector<16x128xi1>
    %190 = arith.select %189, %186, %187 : vector<16x128xi1>, vector<16x128xf32>
    %191 = arith.addf %184, %190 : vector<16x128xf32>
    %192 = arith.negf %191 : vector<16x128xf32>
    %193 = math.exp %192 : vector<16x128xf32>
    %cst_69 = arith.constant 1.000000e+00 : f32
    %194 = vector.broadcast %cst_69 : f32 to vector<16x128xf32>
    %195 = arith.addf %194, %193 : vector<16x128xf32>
    %196 = arith.divf %194, %195 : vector<16x128xf32>
    %197 = vector.extract_strided_slice %196 {offsets = [0, 0], sizes = [16, 32], strides = [1, 1]} : vector<16x128xf32> to vector<16x32xf32>
    %198 = vector.extract_strided_slice %196 {offsets = [0, 32], sizes = [16, 32], strides = [1, 1]} : vector<16x128xf32> to vector<16x32xf32>
    %199 = vector.extract_strided_slice %196 {offsets = [0, 96], sizes = [16, 32], strides = [1, 1]} : vector<16x128xf32> to vector<16x32xf32>
    %200 = vector.extract_strided_slice %191 {offsets = [0, 64], sizes = [16, 32], strides = [1, 1]} : vector<16x128xf32> to vector<16x32xf32>
    %201 = math.tanh %200 : vector<16x32xf32>
    %202 = arith.mulf %198, %176 : vector<16x32xf32>
    %203 = arith.mulf %197, %201 : vector<16x32xf32>
    %204 = arith.addf %202, %203 : vector<16x32xf32>
    %205 = math.tanh %204 : vector<16x32xf32>
    %206 = arith.mulf %199, %205 : vector<16x32xf32>
    %207 = arith.truncf %206 : vector<16x32xf32> to vector<16x32xbf16>
    %208 = vector.extract_strided_slice %207 {offsets = [0, 0], sizes = [8, 32], strides = [1, 1]} : vector<16x32xbf16> to vector<8x32xbf16>
    %c40_70 = arith.constant 40 : index
    %c0_71 = arith.constant 0 : index
    %209 = vector.load %arg11[%c40_70, %c0_71] : memref<64x64xbf16, #tpu.memory_space<vmem>>, vector<8x32xbf16>
    tpu.vector_store %arg11[%c40_70, %c0_71], %208 {strides = array<i32>} : memref<64x64xbf16, #tpu.memory_space<vmem>>, vector<8x32xbf16>,
    %210 = vector.extract_strided_slice %207 {offsets = [8, 0], sizes = [8, 32], strides = [1, 1]} : vector<16x32xbf16> to vector<8x32xbf16>
    %c16_72 = arith.constant 16 : index
    %c32_73 = arith.constant 32 : index
    %211 = vector.load %arg11[%c16_72, %c32_73] : memref<64x64xbf16, #tpu.memory_space<vmem>>, vector<8x32xbf16>
    tpu.vector_store %arg11[%c16_72, %c32_73], %210 {strides = array<i32>} : memref<64x64xbf16, #tpu.memory_space<vmem>>, vector<8x32xbf16>,
    %c96_74 = arith.constant 96 : index
    %c0_75 = arith.constant 0 : index
    %212 = vector.load %arg10[%c96_74, %c0_75] : memref<128x128xf32, #tpu.memory_space<vmem>>, vector<16x128xf32>
    %cst_76 = arith.constant dense<0.000000e+00> : vector<16x256xf32>
    %213 = tpu.matmul %207, %5, %cst_76 {dimension_numbers = #tpu.dot_dimension_numbers<[1], [0], [0], [1], [0, 0, 1, 1], [], []>} : vector<16x32xbf16>, vector<32x256xbf16>, vector<16x256xf32> -> vector<16x256xf32>
    %214 = vector.extract_strided_slice %213 {offsets = [0, 0], sizes = [16, 128], strides = [1, 1]} : vector<16x256xf32> to vector<16x128xf32>
    %215 = vector.extract_strided_slice %213 {offsets = [0, 128], sizes = [16, 128], strides = [1, 1]} : vector<16x256xf32> to vector<16x128xf32>
    %216 = vector.shape_cast %2 : vector<16x1xi1> to vector<16x1xi1>
    %217 = vector.broadcast %216 : vector<16x1xi1> to vector<16x128xi1>
    %218 = arith.select %217, %214, %215 : vector<16x128xi1>, vector<16x128xf32>
    %219 = arith.addf %212, %218 : vector<16x128xf32>
    %220 = arith.negf %219 : vector<16x128xf32>
    %221 = math.exp %220 : vector<16x128xf32>
    %cst_77 = arith.constant 1.000000e+00 : f32
    %222 = vector.broadcast %cst_77 : f32 to vector<16x128xf32>
    %223 = arith.addf %222, %221 : vector<16x128xf32>
    %224 = arith.divf %222, %223 : vector<16x128xf32>
    %225 = vector.extract_strided_slice %224 {offsets = [0, 0], sizes = [16, 32], strides = [1, 1]} : vector<16x128xf32> to vector<16x32xf32>
    %226 = vector.extract_strided_slice %224 {offsets = [0, 32], sizes = [16, 32], strides = [1, 1]} : vector<16x128xf32> to vector<16x32xf32>
    %227 = vector.extract_strided_slice %224 {offsets = [0, 96], sizes = [16, 32], strides = [1, 1]} : vector<16x128xf32> to vector<16x32xf32>
    %228 = vector.extract_strided_slice %219 {offsets = [0, 64], sizes = [16, 32], strides = [1, 1]} : vector<16x128xf32> to vector<16x32xf32>
    %229 = math.tanh %228 : vector<16x32xf32>
    %230 = arith.mulf %226, %204 : vector<16x32xf32>
    %231 = arith.mulf %225, %229 : vector<16x32xf32>
    %232 = arith.addf %230, %231 : vector<16x32xf32>
    %233 = math.tanh %232 : vector<16x32xf32>
    %234 = arith.mulf %227, %233 : vector<16x32xf32>
    %235 = arith.truncf %234 : vector<16x32xf32> to vector<16x32xbf16>
    %236 = vector.extract_strided_slice %235 {offsets = [0, 0], sizes = [8, 32], strides = [1, 1]} : vector<16x32xbf16> to vector<8x32xbf16>
    %c48_78 = arith.constant 48 : index
    %c0_79 = arith.constant 0 : index
    %237 = vector.load %arg11[%c48_78, %c0_79] : memref<64x64xbf16, #tpu.memory_space<vmem>>, vector<8x32xbf16>
    tpu.vector_store %arg11[%c48_78, %c0_79], %236 {strides = array<i32>} : memref<64x64xbf16, #tpu.memory_space<vmem>>, vector<8x32xbf16>,
    %238 = vector.extract_strided_slice %235 {offsets = [8, 0], sizes = [8, 32], strides = [1, 1]} : vector<16x32xbf16> to vector<8x32xbf16>
    %c8_80 = arith.constant 8 : index
    %c32_81 = arith.constant 32 : index
    %239 = vector.load %arg11[%c8_80, %c32_81] : memref<64x64xbf16, #tpu.memory_space<vmem>>, vector<8x32xbf16>
    tpu.vector_store %arg11[%c8_80, %c32_81], %238 {strides = array<i32>} : memref<64x64xbf16, #tpu.memory_space<vmem>>, vector<8x32xbf16>,
    %c112_82 = arith.constant 112 : index
    %c0_83 = arith.constant 0 : index
    %240 = vector.load %arg10[%c112_82, %c0_83] : memref<128x128xf32, #tpu.memory_space<vmem>>, vector<16x128xf32>
    %cst_84 = arith.constant dense<0.000000e+00> : vector<16x256xf32>
    %241 = tpu.matmul %235, %5, %cst_84 {dimension_numbers = #tpu.dot_dimension_numbers<[1], [0], [0], [1], [0, 0, 1, 1], [], []>} : vector<16x32xbf16>, vector<32x256xbf16>, vector<16x256xf32> -> vector<16x256xf32>
    %242 = vector.extract_strided_slice %241 {offsets = [0, 0], sizes = [16, 128], strides = [1, 1]} : vector<16x256xf32> to vector<16x128xf32>
    %243 = vector.extract_strided_slice %241 {offsets = [0, 128], sizes = [16, 128], strides = [1, 1]} : vector<16x256xf32> to vector<16x128xf32>
    %244 = vector.shape_cast %2 : vector<16x1xi1> to vector<16x1xi1>
    %245 = vector.broadcast %244 : vector<16x1xi1> to vector<16x128xi1>
    %246 = arith.select %245, %242, %243 : vector<16x128xi1>, vector<16x128xf32>
    %247 = arith.addf %240, %246 : vector<16x128xf32>
    %248 = arith.negf %247 : vector<16x128xf32>
    %249 = math.exp %248 : vector<16x128xf32>
    %cst_85 = arith.constant 1.000000e+00 : f32
    %250 = vector.broadcast %cst_85 : f32 to vector<16x128xf32>
    %251 = arith.addf %250, %249 : vector<16x128xf32>
    %252 = arith.divf %250, %251 : vector<16x128xf32>
    %253 = vector.extract_strided_slice %252 {offsets = [0, 0], sizes = [16, 32], strides = [1, 1]} : vector<16x128xf32> to vector<16x32xf32>
    %254 = vector.extract_strided_slice %252 {offsets = [0, 32], sizes = [16, 32], strides = [1, 1]} : vector<16x128xf32> to vector<16x32xf32>
    %255 = vector.extract_strided_slice %252 {offsets = [0, 96], sizes = [16, 32], strides = [1, 1]} : vector<16x128xf32> to vector<16x32xf32>
    %256 = vector.extract_strided_slice %247 {offsets = [0, 64], sizes = [16, 32], strides = [1, 1]} : vector<16x128xf32> to vector<16x32xf32>
    %257 = math.tanh %256 : vector<16x32xf32>
    %258 = arith.mulf %254, %232 : vector<16x32xf32>
    %259 = arith.mulf %253, %257 : vector<16x32xf32>
    %260 = arith.addf %258, %259 : vector<16x32xf32>
    %261 = math.tanh %260 : vector<16x32xf32>
    %262 = arith.mulf %255, %261 : vector<16x32xf32>
    %263 = arith.truncf %262 : vector<16x32xf32> to vector<16x32xbf16>
    %264 = vector.extract_strided_slice %263 {offsets = [0, 0], sizes = [8, 32], strides = [1, 1]} : vector<16x32xbf16> to vector<8x32xbf16>
    %c56_86 = arith.constant 56 : index
    %c0_87 = arith.constant 0 : index
    %265 = vector.load %arg11[%c56_86, %c0_87] : memref<64x64xbf16, #tpu.memory_space<vmem>>, vector<8x32xbf16>
    tpu.vector_store %arg11[%c56_86, %c0_87], %264 {strides = array<i32>} : memref<64x64xbf16, #tpu.memory_space<vmem>>, vector<8x32xbf16>,
    %266 = vector.extract_strided_slice %263 {offsets = [8, 0], sizes = [8, 32], strides = [1, 1]} : vector<16x32xbf16> to vector<8x32xbf16>
    %c0_88 = arith.constant 0 : index
    %c32_89 = arith.constant 32 : index
    %267 = vector.load %arg11[%c0_88, %c32_89] : memref<64x64xbf16, #tpu.memory_space<vmem>>, vector<8x32xbf16>
    tpu.vector_store %arg11[%c0_88, %c32_89], %266 {strides = array<i32>} : memref<64x64xbf16, #tpu.memory_space<vmem>>, vector<8x32xbf16>,
    %c0_90 = arith.constant 0 : index
    %c0_91 = arith.constant 0 : index
    %268 = vector.load %arg11[%c0_90, %c0_91] : memref<64x64xbf16, #tpu.memory_space<vmem>>, vector<64x64xbf16>
    %c0_92 = arith.constant 0 : index
    %c0_93 = arith.constant 0 : index
    %269 = vector.load %arg4[%c0_92, %c0_93] : memref<64x256xbf16, #tpu.memory_space<vmem>>, vector<64x256xbf16>
    %c0_94 = arith.constant 0 : index
    %c0_95 = arith.constant 0 : index
    %270 = vector.load %arg5[%c0_94, %c0_95] : memref<32x256xbf16, #tpu.memory_space<vmem>>, vector<32x256xbf16>
    %c0_96 = arith.constant 0 : index
    %c0_97 = arith.constant 0 : index
    %271 = vector.load %arg6[%c0_96, %c0_97] : memref<1x256xf32, #tpu.memory_space<vmem>>, vector<1x256xf32>
    %cst_98 = arith.constant dense<0.000000e+00> : vector<64x256xf32>
    %272 = tpu.matmul %268, %269, %cst_98 {dimension_numbers = #tpu.dot_dimension_numbers<[1], [0], [0], [1], [0, 0, 1, 1], [], []>} : vector<64x64xbf16>, vector<64x256xbf16>, vector<64x256xf32> -> vector<64x256xf32>
    %273 = vector.broadcast %271 : vector<1x256xf32> to vector<64x256xf32>
    %274 = arith.addf %272, %273 : vector<64x256xf32>
    %275 = vector.extract_strided_slice %274 {offsets = [0, 0], sizes = [8, 128], strides = [1, 1]} : vector<64x256xf32> to vector<8x128xf32>
    %c0_99 = arith.constant 0 : index
    %c0_100 = arith.constant 0 : index
    %276 = vector.load %arg10[%c0_99, %c0_100] : memref<128x128xf32, #tpu.memory_space<vmem>>, vector<8x128xf32>
    tpu.vector_store %arg10[%c0_99, %c0_100], %275 {strides = array<i32>} : memref<128x128xf32, #tpu.memory_space<vmem>>, vector<8x128xf32>,
    %277 = vector.extract_strided_slice %274 {offsets = [56, 128], sizes = [8, 128], strides = [1, 1]} : vector<64x256xf32> to vector<8x128xf32>
    %c8_101 = arith.constant 8 : index
    %c0_102 = arith.constant 0 : index
    %278 = vector.load %arg10[%c8_101, %c0_102] : memref<128x128xf32, #tpu.memory_space<vmem>>, vector<8x128xf32>
    tpu.vector_store %arg10[%c8_101, %c0_102], %277 {strides = array<i32>} : memref<128x128xf32, #tpu.memory_space<vmem>>, vector<8x128xf32>,
    %279 = vector.extract_strided_slice %274 {offsets = [8, 0], sizes = [8, 128], strides = [1, 1]} : vector<64x256xf32> to vector<8x128xf32>
    %c16_103 = arith.constant 16 : index
    %c0_104 = arith.constant 0 : index
    %280 = vector.load %arg10[%c16_103, %c0_104] : memref<128x128xf32, #tpu.memory_space<vmem>>, vector<8x128xf32>
    tpu.vector_store %arg10[%c16_103, %c0_104], %279 {strides = array<i32>} : memref<128x128xf32, #tpu.memory_space<vmem>>, vector<8x128xf32>,
    %281 = vector.extract_strided_slice %274 {offsets = [48, 128], sizes = [8, 128], strides = [1, 1]} : vector<64x256xf32> to vector<8x128xf32>
    %c24_105 = arith.constant 24 : index
    %c0_106 = arith.constant 0 : index
    %282 = vector.load %arg10[%c24_105, %c0_106] : memref<128x128xf32, #tpu.memory_space<vmem>>, vector<8x128xf32>
    tpu.vector_store %arg10[%c24_105, %c0_106], %281 {strides = array<i32>} : memref<128x128xf32, #tpu.memory_space<vmem>>, vector<8x128xf32>,
    %283 = vector.extract_strided_slice %274 {offsets = [16, 0], sizes = [8, 128], strides = [1, 1]} : vector<64x256xf32> to vector<8x128xf32>
    %c32_107 = arith.constant 32 : index
    %c0_108 = arith.constant 0 : index
    %284 = vector.load %arg10[%c32_107, %c0_108] : memref<128x128xf32, #tpu.memory_space<vmem>>, vector<8x128xf32>
    tpu.vector_store %arg10[%c32_107, %c0_108], %283 {strides = array<i32>} : memref<128x128xf32, #tpu.memory_space<vmem>>, vector<8x128xf32>,
    %285 = vector.extract_strided_slice %274 {offsets = [40, 128], sizes = [8, 128], strides = [1, 1]} : vector<64x256xf32> to vector<8x128xf32>
    %c40_109 = arith.constant 40 : index
    %c0_110 = arith.constant 0 : index
    %286 = vector.load %arg10[%c40_109, %c0_110] : memref<128x128xf32, #tpu.memory_space<vmem>>, vector<8x128xf32>
    tpu.vector_store %arg10[%c40_109, %c0_110], %285 {strides = array<i32>} : memref<128x128xf32, #tpu.memory_space<vmem>>, vector<8x128xf32>,
    %287 = vector.extract_strided_slice %274 {offsets = [24, 0], sizes = [8, 128], strides = [1, 1]} : vector<64x256xf32> to vector<8x128xf32>
    %c48_111 = arith.constant 48 : index
    %c0_112 = arith.constant 0 : index
    %288 = vector.load %arg10[%c48_111, %c0_112] : memref<128x128xf32, #tpu.memory_space<vmem>>, vector<8x128xf32>
    tpu.vector_store %arg10[%c48_111, %c0_112], %287 {strides = array<i32>} : memref<128x128xf32, #tpu.memory_space<vmem>>, vector<8x128xf32>,
    %289 = vector.extract_strided_slice %274 {offsets = [32, 128], sizes = [8, 128], strides = [1, 1]} : vector<64x256xf32> to vector<8x128xf32>
    %c56_113 = arith.constant 56 : index
    %c0_114 = arith.constant 0 : index
    %290 = vector.load %arg10[%c56_113, %c0_114] : memref<128x128xf32, #tpu.memory_space<vmem>>, vector<8x128xf32>
    tpu.vector_store %arg10[%c56_113, %c0_114], %289 {strides = array<i32>} : memref<128x128xf32, #tpu.memory_space<vmem>>, vector<8x128xf32>,
    %291 = vector.extract_strided_slice %274 {offsets = [32, 0], sizes = [8, 128], strides = [1, 1]} : vector<64x256xf32> to vector<8x128xf32>
    %c64_115 = arith.constant 64 : index
    %c0_116 = arith.constant 0 : index
    %292 = vector.load %arg10[%c64_115, %c0_116] : memref<128x128xf32, #tpu.memory_space<vmem>>, vector<8x128xf32>
    tpu.vector_store %arg10[%c64_115, %c0_116], %291 {strides = array<i32>} : memref<128x128xf32, #tpu.memory_space<vmem>>, vector<8x128xf32>,
    %293 = vector.extract_strided_slice %274 {offsets = [24, 128], sizes = [8, 128], strides = [1, 1]} : vector<64x256xf32> to vector<8x128xf32>
    %c72_117 = arith.constant 72 : index
    %c0_118 = arith.constant 0 : index
    %294 = vector.load %arg10[%c72_117, %c0_118] : memref<128x128xf32, #tpu.memory_space<vmem>>, vector<8x128xf32>
    tpu.vector_store %arg10[%c72_117, %c0_118], %293 {strides = array<i32>} : memref<128x128xf32, #tpu.memory_space<vmem>>, vector<8x128xf32>,
    %295 = vector.extract_strided_slice %274 {offsets = [40, 0], sizes = [8, 128], strides = [1, 1]} : vector<64x256xf32> to vector<8x128xf32>
    %c80_119 = arith.constant 80 : index
    %c0_120 = arith.constant 0 : index
    %296 = vector.load %arg10[%c80_119, %c0_120] : memref<128x128xf32, #tpu.memory_space<vmem>>, vector<8x128xf32>
    tpu.vector_store %arg10[%c80_119, %c0_120], %295 {strides = array<i32>} : memref<128x128xf32, #tpu.memory_space<vmem>>, vector<8x128xf32>,
    %297 = vector.extract_strided_slice %274 {offsets = [16, 128], sizes = [8, 128], strides = [1, 1]} : vector<64x256xf32> to vector<8x128xf32>
    %c88_121 = arith.constant 88 : index
    %c0_122 = arith.constant 0 : index
    %298 = vector.load %arg10[%c88_121, %c0_122] : memref<128x128xf32, #tpu.memory_space<vmem>>, vector<8x128xf32>
    tpu.vector_store %arg10[%c88_121, %c0_122], %297 {strides = array<i32>} : memref<128x128xf32, #tpu.memory_space<vmem>>, vector<8x128xf32>,
    %299 = vector.extract_strided_slice %274 {offsets = [48, 0], sizes = [8, 128], strides = [1, 1]} : vector<64x256xf32> to vector<8x128xf32>
    %c96_123 = arith.constant 96 : index
    %c0_124 = arith.constant 0 : index
    %300 = vector.load %arg10[%c96_123, %c0_124] : memref<128x128xf32, #tpu.memory_space<vmem>>, vector<8x128xf32>
    tpu.vector_store %arg10[%c96_123, %c0_124], %299 {strides = array<i32>} : memref<128x128xf32, #tpu.memory_space<vmem>>, vector<8x128xf32>,
    %301 = vector.extract_strided_slice %274 {offsets = [8, 128], sizes = [8, 128], strides = [1, 1]} : vector<64x256xf32> to vector<8x128xf32>
    %c104_125 = arith.constant 104 : index
    %c0_126 = arith.constant 0 : index
    %302 = vector.load %arg10[%c104_125, %c0_126] : memref<128x128xf32, #tpu.memory_space<vmem>>, vector<8x128xf32>
    tpu.vector_store %arg10[%c104_125, %c0_126], %301 {strides = array<i32>} : memref<128x128xf32, #tpu.memory_space<vmem>>, vector<8x128xf32>,
    %303 = vector.extract_strided_slice %274 {offsets = [56, 0], sizes = [8, 128], strides = [1, 1]} : vector<64x256xf32> to vector<8x128xf32>
    %c112_127 = arith.constant 112 : index
    %c0_128 = arith.constant 0 : index
    %304 = vector.load %arg10[%c112_127, %c0_128] : memref<128x128xf32, #tpu.memory_space<vmem>>, vector<8x128xf32>
    tpu.vector_store %arg10[%c112_127, %c0_128], %303 {strides = array<i32>} : memref<128x128xf32, #tpu.memory_space<vmem>>, vector<8x128xf32>,
    %305 = vector.extract_strided_slice %274 {offsets = [0, 128], sizes = [8, 128], strides = [1, 1]} : vector<64x256xf32> to vector<8x128xf32>
    %c120_129 = arith.constant 120 : index
    %c0_130 = arith.constant 0 : index
    %306 = vector.load %arg10[%c120_129, %c0_130] : memref<128x128xf32, #tpu.memory_space<vmem>>, vector<8x128xf32>
    tpu.vector_store %arg10[%c120_129, %c0_130], %305 {strides = array<i32>} : memref<128x128xf32, #tpu.memory_space<vmem>>, vector<8x128xf32>,
    %cst_131 = arith.constant 0.000000e+00 : bf16
    %307 = vector.broadcast %cst_131 : bf16 to vector<16x32xbf16>
    %cst_132 = arith.constant 0.000000e+00 : f32
    %308 = vector.broadcast %cst_132 : f32 to vector<16x32xf32>
    %c0_133 = arith.constant 0 : index
    %c0_134 = arith.constant 0 : index
    %309 = vector.load %arg10[%c0_133, %c0_134] : memref<128x128xf32, #tpu.memory_space<vmem>>, vector<16x128xf32>
    %cst_135 = arith.constant dense<0.000000e+00> : vector<16x256xf32>
    %310 = tpu.matmul %307, %270, %cst_135 {dimension_numbers = #tpu.dot_dimension_numbers<[1], [0], [0], [1], [0, 0, 1, 1], [], []>} : vector<16x32xbf16>, vector<32x256xbf16>, vector<16x256xf32> -> vector<16x256xf32>
    %311 = vector.extract_strided_slice %310 {offsets = [0, 0], sizes = [16, 128], strides = [1, 1]} : vector<16x256xf32> to vector<16x128xf32>
    %312 = vector.extract_strided_slice %310 {offsets = [0, 128], sizes = [16, 128], strides = [1, 1]} : vector<16x256xf32> to vector<16x128xf32>
    %313 = vector.shape_cast %2 : vector<16x1xi1> to vector<16x1xi1>
    %314 = vector.broadcast %313 : vector<16x1xi1> to vector<16x128xi1>
    %315 = arith.select %314, %311, %312 : vector<16x128xi1>, vector<16x128xf32>
    %316 = arith.addf %309, %315 : vector<16x128xf32>
    %317 = arith.negf %316 : vector<16x128xf32>
    %318 = math.exp %317 : vector<16x128xf32>
    %cst_136 = arith.constant 1.000000e+00 : f32
    %319 = vector.broadcast %cst_136 : f32 to vector<16x128xf32>
    %320 = arith.addf %319, %318 : vector<16x128xf32>
    %321 = arith.divf %319, %320 : vector<16x128xf32>
    %322 = vector.extract_strided_slice %321 {offsets = [0, 0], sizes = [16, 32], strides = [1, 1]} : vector<16x128xf32> to vector<16x32xf32>
    %323 = vector.extract_strided_slice %321 {offsets = [0, 32], sizes = [16, 32], strides = [1, 1]} : vector<16x128xf32> to vector<16x32xf32>
    %324 = vector.extract_strided_slice %321 {offsets = [0, 96], sizes = [16, 32], strides = [1, 1]} : vector<16x128xf32> to vector<16x32xf32>
    %325 = vector.extract_strided_slice %316 {offsets = [0, 64], sizes = [16, 32], strides = [1, 1]} : vector<16x128xf32> to vector<16x32xf32>
    %326 = math.tanh %325 : vector<16x32xf32>
    %327 = arith.mulf %323, %308 : vector<16x32xf32>
    %328 = arith.mulf %322, %326 : vector<16x32xf32>
    %329 = arith.addf %327, %328 : vector<16x32xf32>
    %330 = math.tanh %329 : vector<16x32xf32>
    %331 = arith.mulf %324, %330 : vector<16x32xf32>
    %332 = arith.truncf %331 : vector<16x32xf32> to vector<16x32xbf16>
    %333 = vector.extract_strided_slice %331 {offsets = [8, 0], sizes = [8, 32], strides = [1, 1]} : vector<16x32xf32> to vector<8x32xf32>
    %c16_137 = arith.constant 16 : index
    %c0_138 = arith.constant 0 : index
    %334 = vector.load %arg10[%c16_137, %c0_138] : memref<128x128xf32, #tpu.memory_space<vmem>>, vector<16x128xf32>
    %cst_139 = arith.constant dense<0.000000e+00> : vector<16x256xf32>
    %335 = tpu.matmul %332, %270, %cst_139 {dimension_numbers = #tpu.dot_dimension_numbers<[1], [0], [0], [1], [0, 0, 1, 1], [], []>} : vector<16x32xbf16>, vector<32x256xbf16>, vector<16x256xf32> -> vector<16x256xf32>
    %336 = vector.extract_strided_slice %335 {offsets = [0, 0], sizes = [16, 128], strides = [1, 1]} : vector<16x256xf32> to vector<16x128xf32>
    %337 = vector.extract_strided_slice %335 {offsets = [0, 128], sizes = [16, 128], strides = [1, 1]} : vector<16x256xf32> to vector<16x128xf32>
    %338 = vector.shape_cast %2 : vector<16x1xi1> to vector<16x1xi1>
    %339 = vector.broadcast %338 : vector<16x1xi1> to vector<16x128xi1>
    %340 = arith.select %339, %336, %337 : vector<16x128xi1>, vector<16x128xf32>
    %341 = arith.addf %334, %340 : vector<16x128xf32>
    %342 = arith.negf %341 : vector<16x128xf32>
    %343 = math.exp %342 : vector<16x128xf32>
    %cst_140 = arith.constant 1.000000e+00 : f32
    %344 = vector.broadcast %cst_140 : f32 to vector<16x128xf32>
    %345 = arith.addf %344, %343 : vector<16x128xf32>
    %346 = arith.divf %344, %345 : vector<16x128xf32>
    %347 = vector.extract_strided_slice %346 {offsets = [0, 0], sizes = [16, 32], strides = [1, 1]} : vector<16x128xf32> to vector<16x32xf32>
    %348 = vector.extract_strided_slice %346 {offsets = [0, 32], sizes = [16, 32], strides = [1, 1]} : vector<16x128xf32> to vector<16x32xf32>
    %349 = vector.extract_strided_slice %346 {offsets = [0, 96], sizes = [16, 32], strides = [1, 1]} : vector<16x128xf32> to vector<16x32xf32>
    %350 = vector.extract_strided_slice %341 {offsets = [0, 64], sizes = [16, 32], strides = [1, 1]} : vector<16x128xf32> to vector<16x32xf32>
    %351 = math.tanh %350 : vector<16x32xf32>
    %352 = arith.mulf %348, %329 : vector<16x32xf32>
    %353 = arith.mulf %347, %351 : vector<16x32xf32>
    %354 = arith.addf %352, %353 : vector<16x32xf32>
    %355 = math.tanh %354 : vector<16x32xf32>
    %356 = arith.mulf %349, %355 : vector<16x32xf32>
    %357 = arith.truncf %356 : vector<16x32xf32> to vector<16x32xbf16>
    %c32_141 = arith.constant 32 : index
    %c0_142 = arith.constant 0 : index
    %358 = vector.load %arg10[%c32_141, %c0_142] : memref<128x128xf32, #tpu.memory_space<vmem>>, vector<16x128xf32>
    %cst_143 = arith.constant dense<0.000000e+00> : vector<16x256xf32>
    %359 = tpu.matmul %357, %270, %cst_143 {dimension_numbers = #tpu.dot_dimension_numbers<[1], [0], [0], [1], [0, 0, 1, 1], [], []>} : vector<16x32xbf16>, vector<32x256xbf16>, vector<16x256xf32> -> vector<16x256xf32>
    %360 = vector.extract_strided_slice %359 {offsets = [0, 0], sizes = [16, 128], strides = [1, 1]} : vector<16x256xf32> to vector<16x128xf32>
    %361 = vector.extract_strided_slice %359 {offsets = [0, 128], sizes = [16, 128], strides = [1, 1]} : vector<16x256xf32> to vector<16x128xf32>
    %362 = vector.shape_cast %2 : vector<16x1xi1> to vector<16x1xi1>
    %363 = vector.broadcast %362 : vector<16x1xi1> to vector<16x128xi1>
    %364 = arith.select %363, %360, %361 : vector<16x128xi1>, vector<16x128xf32>
    %365 = arith.addf %358, %364 : vector<16x128xf32>
    %366 = arith.negf %365 : vector<16x128xf32>
    %367 = math.exp %366 : vector<16x128xf32>
    %cst_144 = arith.constant 1.000000e+00 : f32
    %368 = vector.broadcast %cst_144 : f32 to vector<16x128xf32>
    %369 = arith.addf %368, %367 : vector<16x128xf32>
    %370 = arith.divf %368, %369 : vector<16x128xf32>
    %371 = vector.extract_strided_slice %370 {offsets = [0, 0], sizes = [16, 32], strides = [1, 1]} : vector<16x128xf32> to vector<16x32xf32>
    %372 = vector.extract_strided_slice %370 {offsets = [0, 32], sizes = [16, 32], strides = [1, 1]} : vector<16x128xf32> to vector<16x32xf32>
    %373 = vector.extract_strided_slice %370 {offsets = [0, 96], sizes = [16, 32], strides = [1, 1]} : vector<16x128xf32> to vector<16x32xf32>
    %374 = vector.extract_strided_slice %365 {offsets = [0, 64], sizes = [16, 32], strides = [1, 1]} : vector<16x128xf32> to vector<16x32xf32>
    %375 = math.tanh %374 : vector<16x32xf32>
    %376 = arith.mulf %372, %354 : vector<16x32xf32>
    %377 = arith.mulf %371, %375 : vector<16x32xf32>
    %378 = arith.addf %376, %377 : vector<16x32xf32>
    %379 = math.tanh %378 : vector<16x32xf32>
    %380 = arith.mulf %373, %379 : vector<16x32xf32>
    %381 = arith.truncf %380 : vector<16x32xf32> to vector<16x32xbf16>
    %c48_145 = arith.constant 48 : index
    %c0_146 = arith.constant 0 : index
    %382 = vector.load %arg10[%c48_145, %c0_146] : memref<128x128xf32, #tpu.memory_space<vmem>>, vector<16x128xf32>
    %cst_147 = arith.constant dense<0.000000e+00> : vector<16x256xf32>
    %383 = tpu.matmul %381, %270, %cst_147 {dimension_numbers = #tpu.dot_dimension_numbers<[1], [0], [0], [1], [0, 0, 1, 1], [], []>} : vector<16x32xbf16>, vector<32x256xbf16>, vector<16x256xf32> -> vector<16x256xf32>
    %384 = vector.extract_strided_slice %383 {offsets = [0, 0], sizes = [16, 128], strides = [1, 1]} : vector<16x256xf32> to vector<16x128xf32>
    %385 = vector.extract_strided_slice %383 {offsets = [0, 128], sizes = [16, 128], strides = [1, 1]} : vector<16x256xf32> to vector<16x128xf32>
    %386 = vector.shape_cast %2 : vector<16x1xi1> to vector<16x1xi1>
    %387 = vector.broadcast %386 : vector<16x1xi1> to vector<16x128xi1>
    %388 = arith.select %387, %384, %385 : vector<16x128xi1>, vector<16x128xf32>
    %389 = arith.addf %382, %388 : vector<16x128xf32>
    %390 = arith.negf %389 : vector<16x128xf32>
    %391 = math.exp %390 : vector<16x128xf32>
    %cst_148 = arith.constant 1.000000e+00 : f32
    %392 = vector.broadcast %cst_148 : f32 to vector<16x128xf32>
    %393 = arith.addf %392, %391 : vector<16x128xf32>
    %394 = arith.divf %392, %393 : vector<16x128xf32>
    %395 = vector.extract_strided_slice %394 {offsets = [0, 0], sizes = [16, 32], strides = [1, 1]} : vector<16x128xf32> to vector<16x32xf32>
    %396 = vector.extract_strided_slice %394 {offsets = [0, 32], sizes = [16, 32], strides = [1, 1]} : vector<16x128xf32> to vector<16x32xf32>
    %397 = vector.extract_strided_slice %394 {offsets = [0, 96], sizes = [16, 32], strides = [1, 1]} : vector<16x128xf32> to vector<16x32xf32>
    %398 = vector.extract_strided_slice %389 {offsets = [0, 64], sizes = [16, 32], strides = [1, 1]} : vector<16x128xf32> to vector<16x32xf32>
    %399 = math.tanh %398 : vector<16x32xf32>
    %400 = arith.mulf %396, %378 : vector<16x32xf32>
    %401 = arith.mulf %395, %399 : vector<16x32xf32>
    %402 = arith.addf %400, %401 : vector<16x32xf32>
    %403 = math.tanh %402 : vector<16x32xf32>
    %404 = arith.mulf %397, %403 : vector<16x32xf32>
    %405 = arith.truncf %404 : vector<16x32xf32> to vector<16x32xbf16>
    %c64_149 = arith.constant 64 : index
    %c0_150 = arith.constant 0 : index
    %406 = vector.load %arg10[%c64_149, %c0_150] : memref<128x128xf32, #tpu.memory_space<vmem>>, vector<16x128xf32>
    %cst_151 = arith.constant dense<0.000000e+00> : vector<16x256xf32>
    %407 = tpu.matmul %405, %270, %cst_151 {dimension_numbers = #tpu.dot_dimension_numbers<[1], [0], [0], [1], [0, 0, 1, 1], [], []>} : vector<16x32xbf16>, vector<32x256xbf16>, vector<16x256xf32> -> vector<16x256xf32>
    %408 = vector.extract_strided_slice %407 {offsets = [0, 0], sizes = [16, 128], strides = [1, 1]} : vector<16x256xf32> to vector<16x128xf32>
    %409 = vector.extract_strided_slice %407 {offsets = [0, 128], sizes = [16, 128], strides = [1, 1]} : vector<16x256xf32> to vector<16x128xf32>
    %410 = vector.shape_cast %2 : vector<16x1xi1> to vector<16x1xi1>
    %411 = vector.broadcast %410 : vector<16x1xi1> to vector<16x128xi1>
    %412 = arith.select %411, %408, %409 : vector<16x128xi1>, vector<16x128xf32>
    %413 = arith.addf %406, %412 : vector<16x128xf32>
    %414 = arith.negf %413 : vector<16x128xf32>
    %415 = math.exp %414 : vector<16x128xf32>
    %cst_152 = arith.constant 1.000000e+00 : f32
    %416 = vector.broadcast %cst_152 : f32 to vector<16x128xf32>
    %417 = arith.addf %416, %415 : vector<16x128xf32>
    %418 = arith.divf %416, %417 : vector<16x128xf32>
    %419 = vector.extract_strided_slice %418 {offsets = [0, 0], sizes = [16, 32], strides = [1, 1]} : vector<16x128xf32> to vector<16x32xf32>
    %420 = vector.extract_strided_slice %418 {offsets = [0, 32], sizes = [16, 32], strides = [1, 1]} : vector<16x128xf32> to vector<16x32xf32>
    %421 = vector.extract_strided_slice %418 {offsets = [0, 96], sizes = [16, 32], strides = [1, 1]} : vector<16x128xf32> to vector<16x32xf32>
    %422 = vector.extract_strided_slice %413 {offsets = [0, 64], sizes = [16, 32], strides = [1, 1]} : vector<16x128xf32> to vector<16x32xf32>
    %423 = math.tanh %422 : vector<16x32xf32>
    %424 = arith.mulf %420, %402 : vector<16x32xf32>
    %425 = arith.mulf %419, %423 : vector<16x32xf32>
    %426 = arith.addf %424, %425 : vector<16x32xf32>
    %427 = math.tanh %426 : vector<16x32xf32>
    %428 = arith.mulf %421, %427 : vector<16x32xf32>
    %429 = arith.truncf %428 : vector<16x32xf32> to vector<16x32xbf16>
    %c80_153 = arith.constant 80 : index
    %c0_154 = arith.constant 0 : index
    %430 = vector.load %arg10[%c80_153, %c0_154] : memref<128x128xf32, #tpu.memory_space<vmem>>, vector<16x128xf32>
    %cst_155 = arith.constant dense<0.000000e+00> : vector<16x256xf32>
    %431 = tpu.matmul %429, %270, %cst_155 {dimension_numbers = #tpu.dot_dimension_numbers<[1], [0], [0], [1], [0, 0, 1, 1], [], []>} : vector<16x32xbf16>, vector<32x256xbf16>, vector<16x256xf32> -> vector<16x256xf32>
    %432 = vector.extract_strided_slice %431 {offsets = [0, 0], sizes = [16, 128], strides = [1, 1]} : vector<16x256xf32> to vector<16x128xf32>
    %433 = vector.extract_strided_slice %431 {offsets = [0, 128], sizes = [16, 128], strides = [1, 1]} : vector<16x256xf32> to vector<16x128xf32>
    %434 = vector.shape_cast %2 : vector<16x1xi1> to vector<16x1xi1>
    %435 = vector.broadcast %434 : vector<16x1xi1> to vector<16x128xi1>
    %436 = arith.select %435, %432, %433 : vector<16x128xi1>, vector<16x128xf32>
    %437 = arith.addf %430, %436 : vector<16x128xf32>
    %438 = arith.negf %437 : vector<16x128xf32>
    %439 = math.exp %438 : vector<16x128xf32>
    %cst_156 = arith.constant 1.000000e+00 : f32
    %440 = vector.broadcast %cst_156 : f32 to vector<16x128xf32>
    %441 = arith.addf %440, %439 : vector<16x128xf32>
    %442 = arith.divf %440, %441 : vector<16x128xf32>
    %443 = vector.extract_strided_slice %442 {offsets = [0, 0], sizes = [16, 32], strides = [1, 1]} : vector<16x128xf32> to vector<16x32xf32>
    %444 = vector.extract_strided_slice %442 {offsets = [0, 32], sizes = [16, 32], strides = [1, 1]} : vector<16x128xf32> to vector<16x32xf32>
    %445 = vector.extract_strided_slice %442 {offsets = [0, 96], sizes = [16, 32], strides = [1, 1]} : vector<16x128xf32> to vector<16x32xf32>
    %446 = vector.extract_strided_slice %437 {offsets = [0, 64], sizes = [16, 32], strides = [1, 1]} : vector<16x128xf32> to vector<16x32xf32>
    %447 = math.tanh %446 : vector<16x32xf32>
    %448 = arith.mulf %444, %426 : vector<16x32xf32>
    %449 = arith.mulf %443, %447 : vector<16x32xf32>
    %450 = arith.addf %448, %449 : vector<16x32xf32>
    %451 = math.tanh %450 : vector<16x32xf32>
    %452 = arith.mulf %445, %451 : vector<16x32xf32>
    %453 = arith.truncf %452 : vector<16x32xf32> to vector<16x32xbf16>
    %c96_157 = arith.constant 96 : index
    %c0_158 = arith.constant 0 : index
    %454 = vector.load %arg10[%c96_157, %c0_158] : memref<128x128xf32, #tpu.memory_space<vmem>>, vector<16x128xf32>
    %cst_159 = arith.constant dense<0.000000e+00> : vector<16x256xf32>
    %455 = tpu.matmul %453, %270, %cst_159 {dimension_numbers = #tpu.dot_dimension_numbers<[1], [0], [0], [1], [0, 0, 1, 1], [], []>} : vector<16x32xbf16>, vector<32x256xbf16>, vector<16x256xf32> -> vector<16x256xf32>
    %456 = vector.extract_strided_slice %455 {offsets = [0, 0], sizes = [16, 128], strides = [1, 1]} : vector<16x256xf32> to vector<16x128xf32>
    %457 = vector.extract_strided_slice %455 {offsets = [0, 128], sizes = [16, 128], strides = [1, 1]} : vector<16x256xf32> to vector<16x128xf32>
    %458 = vector.shape_cast %2 : vector<16x1xi1> to vector<16x1xi1>
    %459 = vector.broadcast %458 : vector<16x1xi1> to vector<16x128xi1>
    %460 = arith.select %459, %456, %457 : vector<16x128xi1>, vector<16x128xf32>
    %461 = arith.addf %454, %460 : vector<16x128xf32>
    %462 = arith.negf %461 : vector<16x128xf32>
    %463 = math.exp %462 : vector<16x128xf32>
    %cst_160 = arith.constant 1.000000e+00 : f32
    %464 = vector.broadcast %cst_160 : f32 to vector<16x128xf32>
    %465 = arith.addf %464, %463 : vector<16x128xf32>
    %466 = arith.divf %464, %465 : vector<16x128xf32>
    %467 = vector.extract_strided_slice %466 {offsets = [0, 0], sizes = [16, 32], strides = [1, 1]} : vector<16x128xf32> to vector<16x32xf32>
    %468 = vector.extract_strided_slice %466 {offsets = [0, 32], sizes = [16, 32], strides = [1, 1]} : vector<16x128xf32> to vector<16x32xf32>
    %469 = vector.extract_strided_slice %466 {offsets = [0, 96], sizes = [16, 32], strides = [1, 1]} : vector<16x128xf32> to vector<16x32xf32>
    %470 = vector.extract_strided_slice %461 {offsets = [0, 64], sizes = [16, 32], strides = [1, 1]} : vector<16x128xf32> to vector<16x32xf32>
    %471 = math.tanh %470 : vector<16x32xf32>
    %472 = arith.mulf %468, %450 : vector<16x32xf32>
    %473 = arith.mulf %467, %471 : vector<16x32xf32>
    %474 = arith.addf %472, %473 : vector<16x32xf32>
    %475 = math.tanh %474 : vector<16x32xf32>
    %476 = arith.mulf %469, %475 : vector<16x32xf32>
    %477 = arith.truncf %476 : vector<16x32xf32> to vector<16x32xbf16>
    %c112_161 = arith.constant 112 : index
    %c0_162 = arith.constant 0 : index
    %478 = vector.load %arg10[%c112_161, %c0_162] : memref<128x128xf32, #tpu.memory_space<vmem>>, vector<16x128xf32>
    %cst_163 = arith.constant dense<0.000000e+00> : vector<16x256xf32>
    %479 = tpu.matmul %477, %270, %cst_163 {dimension_numbers = #tpu.dot_dimension_numbers<[1], [0], [0], [1], [0, 0, 1, 1], [], []>} : vector<16x32xbf16>, vector<32x256xbf16>, vector<16x256xf32> -> vector<16x256xf32>
    %480 = vector.extract_strided_slice %479 {offsets = [0, 0], sizes = [16, 128], strides = [1, 1]} : vector<16x256xf32> to vector<16x128xf32>
    %481 = vector.extract_strided_slice %479 {offsets = [0, 128], sizes = [16, 128], strides = [1, 1]} : vector<16x256xf32> to vector<16x128xf32>
    %482 = vector.shape_cast %2 : vector<16x1xi1> to vector<16x1xi1>
    %483 = vector.broadcast %482 : vector<16x1xi1> to vector<16x128xi1>
    %484 = arith.select %483, %480, %481 : vector<16x128xi1>, vector<16x128xf32>
    %485 = arith.addf %478, %484 : vector<16x128xf32>
    %486 = arith.negf %485 : vector<16x128xf32>
    %487 = math.exp %486 : vector<16x128xf32>
    %cst_164 = arith.constant 1.000000e+00 : f32
    %488 = vector.broadcast %cst_164 : f32 to vector<16x128xf32>
    %489 = arith.addf %488, %487 : vector<16x128xf32>
    %490 = arith.divf %488, %489 : vector<16x128xf32>
    %491 = vector.extract_strided_slice %490 {offsets = [0, 0], sizes = [16, 32], strides = [1, 1]} : vector<16x128xf32> to vector<16x32xf32>
    %492 = vector.extract_strided_slice %490 {offsets = [0, 32], sizes = [16, 32], strides = [1, 1]} : vector<16x128xf32> to vector<16x32xf32>
    %493 = vector.extract_strided_slice %490 {offsets = [0, 96], sizes = [16, 32], strides = [1, 1]} : vector<16x128xf32> to vector<16x32xf32>
    %494 = vector.extract_strided_slice %485 {offsets = [0, 64], sizes = [16, 32], strides = [1, 1]} : vector<16x128xf32> to vector<16x32xf32>
    %495 = math.tanh %494 : vector<16x32xf32>
    %496 = arith.mulf %492, %474 : vector<16x32xf32>
    %497 = arith.mulf %491, %495 : vector<16x32xf32>
    %498 = arith.addf %496, %497 : vector<16x32xf32>
    %499 = math.tanh %498 : vector<16x32xf32>
    %500 = arith.mulf %493, %499 : vector<16x32xf32>
    %501 = vector.extract_strided_slice %500 {offsets = [0, 0], sizes = [8, 32], strides = [1, 1]} : vector<16x32xf32> to vector<8x32xf32>
    %502 = tpu.concatenate %501, %333 in 1 : vector<8x32xf32>, vector<8x32xf32> -> vector<8x64xf32>
    %c0_165 = arith.constant 0 : index
    %c0_166 = arith.constant 0 : index
    %503 = vector.load %arg7[%c0_165, %c0_166] : memref<64x128xf32, #tpu.memory_space<vmem>>, vector<64x128xf32>
    %cst_167 = arith.constant dense<0.000000e+00> : vector<8x128xf32>
    %504 = tpu.matmul %502, %503, %cst_167 {dimension_numbers = #tpu.dot_dimension_numbers<[1], [0], [0], [1], [0, 0, 1, 1], [], []>} : vector<8x64xf32>, vector<64x128xf32>, vector<8x128xf32> -> vector<8x128xf32>
    %c0_168 = arith.constant 0 : index
    %c0_169 = arith.constant 0 : index
    %505 = vector.load %arg8[%c0_168, %c0_169] : memref<1x128xf32, #tpu.memory_space<vmem>>, vector<1x128xf32>
    %506 = vector.broadcast %505 : vector<1x128xf32> to vector<8x128xf32>
    %507 = arith.addf %504, %506 : vector<8x128xf32>
    %c0_170 = arith.constant 0 : index
    %c0_171 = arith.constant 0 : index
    %508 = vector.load %arg9[%c0_170, %c0_171] : memref<8x128xf32, #tpu.memory_space<vmem>>, vector<8x128xf32>
    tpu.vector_store %arg9[%c0_170, %c0_171], %507 {strides = array<i32>} : memref<8x128xf32, #tpu.memory_space<vmem>>, vector<8x128xf32>,
    return
  }
}

</mosaic_0001>

<bundles_post_ra>
// kernel: tpu_custom_call.1
= control target key start
LH: loop header
LB: loop body
LE: loop exit
PB: predicated region body
PF: predicated region fallthrough
CT: control target
= control target key end

     0   :  { %14 = vsyncpa [#allocation5], 0  ;;  %s3655_s0 = inlined_call_operand.vmem [shape: bf16[64,16], index: 0, kind: input, shape index: {}]   ;;  %s3656_s1 = inlined_call_operand.hbm [shape: bf16[16,256], index: 1, kind: input, shape index: {}]   ;;  %s3657_s2 = inlined_call_operand.vmem [shape: bf16[32,256], index: 2, kind: input, shape index: {}]   ;;  %s3658_s3 = inlined_call_operand.vmem [shape: f32[1,256], index: 3, kind: input, shape index: {}]   ;;  %s3659_s4 = inlined_call_operand.hbm [shape: bf16[64,256], index: 4, kind: input, shape index: {}]   ;;  %s3660_s5 = inlined_call_operand.hbm [shape: bf16[32,256], index: 5, kind: input, shape index: {}]   ;;  %s3661_s6 = inlined_call_operand.vmem [shape: f32[1,256], index: 6, kind: input, shape index: {}]   ;;  %s3662_s7 = inlined_call_operand.hbm [shape: f32[64,128], index: 7, kind: input, shape index: {}]   ;;  %s3663_s8 = inlined_call_operand.vmem [shape: f32[1,128], index: 8, kind: input, shape index: {}]   ;;  %s3664_s9 = inlined_call_operand.hbm [shape: f32[8,128], index: 9, kind: output, shape index: {}]  }
   0x1   :  { %15 = vsyncpa [#allocation8], 0 }
   0x2   :  { %16 = vsyncpa [#allocation11], 0 }
   0x3   :  { %17 = vsyncpa [#allocation6], 0  ;;  %s41_s11 = sshll.u32 %s3659_s4, 4  ;;  %s3006_s12 = smov [#allocation7]   ;;  %s42_s11 = int_to_ptr.hbm [resolvable:$true] %s41_s11 }
   0x4   :  { %s43_s13 = sshll.u32 %s3006_s12, 4  ;;  %s24_s16 = sshll.u32 %s3656_s1, 4  ;;  %s44_s13 = int_to_ptr.vmem [resolvable:$true] %s43_s13  ;;  %s25_s16 = int_to_ptr.hbm [resolvable:$true] %s24_s16 }
   0x5   :  { %s3007_s17 = smov 128   ;;  %s3008_s18 = smov 8  }
   0x6   :  { %49 = dma.hbm_to_vmem [thread:$0]  %s42_s11, 1024, %s44_s13, [#allocation8], %s3007_s17, %s3007_s17, %s3008_s18  }
   0x7   :  { %s3009_s19 = smov [#allocation4]   ;;  %s54_s23 = sshll.u32 %s3660_s5, 4  ;;  %s55_s23 = int_to_ptr.hbm [resolvable:$true] %s54_s23 }
   0x8   :  { %s26_s20 = sshll.u32 %s3009_s19, 4  ;;  %s69_s25 = sshll.u32 %s3662_s7, 4  ;;  %s27_s20 = int_to_ptr.vmem [resolvable:$true] %s26_s20  ;;  %s70_s25 = int_to_ptr.hbm [resolvable:$true] %s69_s25 }
   0x9   :  { %32 = dma.hbm_to_vmem [thread:$0]  %s25_s16, 256, %s27_s20, [#allocation5], %s3007_s17, %s3007_s17, %s3008_s18  }
   0xa   :  { %s3010_s26 = smov [#allocation9]   ;;  %s3011_s1 = smov [#allocation10]  }
   0xb   :  { %s56_s27 = sshll.u32 %s3010_s26, 4  ;;  %s71_s28 = sshll.u32 %s3011_s1, 4  ;;  %s57_s27 = int_to_ptr.vmem [resolvable:$true] %s56_s27  ;;  %s72_s28 = int_to_ptr.vmem [resolvable:$true] %s71_s28 }
   0xc   :  { %62 = dma.hbm_to_vmem [thread:$0]  %s55_s23, 512, %s57_s27, [#allocation8], %s3007_s17, %s3007_s17, %s3008_s18  }
   0xd   :  { %77 = dma.hbm_to_vmem [thread:$0]  %s70_s25, 1024, %s72_s28, [#allocation11], %s3007_s17, %s3007_s17, %s3008_s18  }
   0xe   :  { %2998 = dma.done.wait [#allocation5], 256  }
   0xf   :  { %2999 = vsyncadd [#allocation5], 4294967040 }
  0x10   :  { %3000 = dma.done.wait [#allocation8], 1536  }
  0x11   :  { %3001 = vsyncadd [#allocation8], 4294965760 }
  0x12   :  { %3002 = dma.done.wait [#allocation11], 1024  }
  0x13   :  { %3003 = vsyncadd [#allocation11], 4294966272  ;;  %v2597_v0 = vld [vmem:[#allocation4 + $0x4] sm:$0xf]  ;;  %v2433_v1 = vld [vmem:[#allocation4 + $0x8] sm:$0xf0] }
  0x14   :  { %v2455_v2 = vld [vmem:[%s3657_s2 + $0x10] sm:$0xf]  ;;  %v2436_v3 = vor.u32 %v2597_v0, %v2433_v1  ;;  %v2602_v4 = vld [vmem:[%s3657_s2 + $0x14] sm:$0xf0]  ;;  %v2593_v5 = vld [vmem:[%s3655_s0] sm:$0xff]  ;;  %vm152_vm0 = vcmask 130048  }
  0x15   :  { %v2447_v6 = vld [vmem:[%s3657_s2] sm:$0xf]  ;;  %v3090_v7 = vor.u32 %v2602_v4, %v2455_v2  ;;  %v2600_v8 = vld [vmem:[%s3657_s2 + $0x4] sm:$0xf0]  ;;  %v2601_v12 = vld [vmem:[%s3657_s2 + $0x14] sm:$0xf] }
  0x16   :  { %v2431_v9 = vld [vmem:[#allocation4] sm:$0xf]  ;;  %v2598_v10 = vld [vmem:[#allocation4 + $0x4] sm:$0xf0]  ;;  %201 = vmatpush.bf16.msra.mxu1 %v2436_v3  ;;  %v2457_v13 = vld [vmem:[%s3657_s2 + $0x18] sm:$0xf0]  ;;  %v3102_v14 = vor.u32 %v2600_v8, %v2447_v6 }
  0x17   :  { %v2432_v11 = vor.u32 %v2598_v10, %v2431_v9  ;;  %271 = vmatpush.bf16.msra.mxu2 %v3090_v7  ;;  %v3104_v15 = vor.u32 %v2601_v12, %v2457_v13  ;;  %v2599_v16 = vld [vmem:[%s3657_s2 + $0x4] sm:$0xf]  ;;  %v2449_v17 = vld [vmem:[%s3657_s2 + $0x8] sm:$0xf0]  ;;  %v3012_v19 = vmov 0   ;;  %v2595_v21 = vld [vmem:[%s3655_s0 + $0x10] sm:$0xff] }
  0x18   :  { %v3114_v18 = vor.u32 %v2599_v16, %v2449_v17  ;;  %v2594_v20 = vld [vmem:[%s3655_s0 + $0x8] sm:$0xff]  ;;  %v2596_v22 = vld [vmem:[%s3655_s0 + $0x18] sm:$0xff]  ;;  %v116_v23 = vld [vmem:[%s3658_s3] sm:$0x3]  ;;  %s3013_s0 = smov 64   ;;  %s3014_s3 = smov 32  }
  0x19   :  { %172 = vmatpush.bf16.msra.mxu0 %v2432_v11  ;;  %2441 = vmatmul.msk.bf16.vlgmr.msra.gmra.mxu1 %vm152_vm0, %v2593_v5  ;;  %v119_v24 = vperm.slane %v116_v23, 1  ;;  %v3157_v27 = vperm.slane %v116_v23, 0  ;;  %vm261_vm9 = vcmask 261120   ;;  %s3015_s30 = smov [#allocation12]   ;;  %s2401_s13 = sshll.u32 %s3664_s9, 4  ;;  %s2402_s13 = int_to_ptr.hbm [resolvable:$true] %s2401_s13 }
  0x1a   :  { %285 = vmatpush.bf16.msra.mxu3 %v3104_v15  ;;  %803 = vmatpush.bf16.msrb.mxu1 %v3104_v15  ;;  %s2399_s10 = sshll.u32 %s3015_s30, 4  ;;  %s2400_s10 = int_to_ptr.vmem [resolvable:$true] %s2399_s10 }
  0x1b   :  { %272 = vmatpush.bf16.msra.mxu2 %v3102_v14 }
  0x1c   :  { %2437 = vmatmul.msk.bf16.vlgmr.msra.gmra.mxu0 %vm152_vm0, %v2593_v5 }
  0x1d   :  { %789 = vmatpush.bf16.msrb.mxu0 %v3090_v7 }
  0x1e   :  { %286 = vmatpush.bf16.msra.mxu3 %v3114_v18  ;;  %273 = vmatmul.bf16.vlgmr.msra.gmra.mxu2 %v3012_v19 }
  0x1f   :  { %405 = vmatpush.bf16.msrb.mxu2 %v3090_v7  ;;  %804 = vmatpush.bf16.msrb.mxu1 %v3114_v18 }
  0x21   :  { %790 = vmatpush.bf16.msrb.mxu0 %v3102_v14  ;;  %287 = vmatmul.bf16.vlgmr.msra.gmra.mxu3 %v3012_v19 }
  0x22   :  { %419 = vmatpush.bf16.msrb.mxu3 %v3104_v15 }
  0x23   :  { %406 = vmatpush.bf16.msrb.mxu2 %v3102_v14  ;;  %1059 = vmatpush.bf16.msra.mxu1 %v3104_v15 }
  0x25   :  { %1045 = vmatpush.bf16.msra.mxu0 %v3090_v7 }
  0x26   :  { %420 = vmatpush.bf16.msrb.mxu3 %v3114_v18 }
  0x27   :  { %533 = vmatpush.bf16.msra.mxu2 %v3090_v7  ;;  %1060 = vmatpush.bf16.msra.mxu1 %v3114_v18 }
  0x29   :  { %1046 = vmatpush.bf16.msra.mxu0 %v3102_v14  ;;  %2442 = vmatmul.msk.bf16.gmra.mxu1 %vm152_vm0, %v2594_v20 }
  0x2a   :  { %547 = vmatpush.bf16.msra.mxu3 %v3104_v15 }
  0x2b   :  { %534 = vmatpush.bf16.msra.mxu2 %v3102_v14 }
  0x2c   :  { %2438 = vmatmul.msk.bf16.gmra.mxu0 %vm152_vm0, %v2594_v20 }
  0x2e   :  { %548 = vmatpush.bf16.msra.mxu3 %v3114_v18 }
  0x39   :  { %2443 = vmatmul.msk.bf16.gmra.mxu1 %vm152_vm0, %v2595_v21 }
  0x3c   :  { %2439 = vmatmul.msk.bf16.gmra.mxu0 %vm152_vm0, %v2595_v21 }
  0x49   :  { %2444 = vmatmul.msk.bf16.gmra.mxu1 %vm152_vm0, %v2596_v22 }
  0x4c   :  { %2440 = vmatmul.msk.bf16.gmra.mxu0 %vm152_vm0, %v2596_v22 }
  0x96   :  { %v203_v25 = vpop.f32.mrf.mxu1 }
  0x97   :  { %v3155_v26 = vadd.f32 %v203_v25, %v119_v24 }
  0x99   :  { %v174_v28 = vpop.f32.mrf.mxu0 }
  0x9a   :  { %v175_v29 = vadd.f32 %v174_v28, %v3157_v27 }
  0x9e   :  { %v205_v30 = vpop.f32.mrf.mxu1 }
  0x9f   :  { %v3160_v31 = vadd.f32 %v205_v30, %v119_v24 }
  0xa1   :  { %v274_v32 = vpop.f32.mrf.mxu2 }
  0xa2   :  { %v299_v33 = vadd.f32 %v274_v32, %v175_v29 }
  0xa4   :  { %v288_v34 = vpop.f32.mrf.mxu3  ;;  %2630 = vtanh.f32 %v299_v33  ;;  %v2461_v52 = vmul.f32 -1.442695, %v299_v33 }
  0xa6   :  { %v208_v35 = vpop.f32.mrf.mxu1 }
  0xa7   :  { %v3162_v36 = vadd.f32 %v208_v35, %v119_v24 }
  0xa9   :  { %v276_v37 = vpop.f32.mrf.mxu2 }
  0xaa   :  { %v2631_v38 = vpop.eup %2630 }
  0xab   :  { %345 = vrot.lane.b32.xlu0 %v2631_v38, %s3013_s0 }
  0xac   :  { %v290_v49 = vpop.f32.mrf.mxu3 }
  0xae   :  { %v210_v39 = vpop.f32.mrf.mxu1 }
  0xaf   :  { %v3165_v40 = vadd.f32 %v210_v39, %v119_v24 }
  0xb6   :  { %v213_v41 = vpop.f32.mrf.mxu1 }
  0xb7   :  { %v3167_v42 = vadd.f32 %v213_v41, %v119_v24 }
  0xbe   :  { %v215_v43 = vpop.f32.mrf.mxu1 }
  0xbf   :  { %v3169_v44 = vadd.f32 %v215_v43, %v119_v24 }
  0xc6   :  { %v218_v45 = vpop.f32.mrf.mxu1 }
  0xc7   :  { %v3171_v46 = vadd.f32 %v218_v45, %v119_v24 }
  0xce   :  { %v220_v47 = vpop.f32.mrf.mxu1 }
  0xcf   :  { %v221_v48 = vadd.f32 %v220_v47, %v119_v24 }
  0xd1   :  { %v300_v50 = vadd.f32 %v290_v49, %v221_v48  ;;  %v176_v49 = vpop.f32.mrf.mxu0 }
  0xd3   :  { %2632 = vtanh.f32 %v300_v50  ;;  %v2462_v3 = vmul.f32 -1.442695, %v300_v50  ;;  %v177_v50 = vadd.f32 %v176_v49, %v3157_v27 }
  0xd4   :  { %2634 = vpow2.f32 %v2461_v52 }
  0xd9   :  { %v2633_v51 = vpop.eup %2632 }
  0xda   :  { %347 = vrot.lane.b32.xlu0 %v2633_v51, %s3013_s0  ;;  %v2635_v53 = vpop.eup %2634 }
  0xdb   :  { %v307_v54 = vadd.f32 1.0, %v2635_v53 }
  0xdd   :  { %2636 = vrcp.f32 %v307_v54  ;;  %vm314_vm1 = vweird.f32 %v307_v54  ;;  %v320_v59 = vand.u32 2147483648, %v307_v54  ;;  %v318_v61 = vand.u32 2147483647, %v307_v54 }
  0xde   :  { %2638 = vpow2.f32 %v2462_v3 }
  0xdf   :  { %v321_v62 = vor.u32 1.1754944e-38, %v320_v59  ;;  %vm319_vm4 = vcmp.eq.f32.partialorder %v318_v61, 8.507059e+37 }
  0xe3   :  { %v2637_v55 = vpop.eup %2636 }
  0xe4   :  { %v310_v56 = vmul.f32 %v2637_v55, %v307_v54  ;;  %vm315_vm2 = vweird.f32 %v2637_v55  ;;  %v2639_v4 = vpop.eup %2638 }
  0xe5   :  { %vm316_vm3 = vmor %vm314_vm1, %vm315_vm2  ;;  %v308_v5 = vadd.f32 1.0, %v2639_v4 }
  0xe6   :  { %v311_v57 = vsub.f32 1.0, %v310_v56 }
  0xe7   :  { %2640 = vrcp.f32 %v308_v5  ;;  %v335_v12 = vand.u32 2147483648, %v308_v5  ;;  %vm329_vm6 = vweird.f32 %v308_v5  ;;  %v333_v13 = vand.u32 2147483647, %v308_v5 }
  0xe8   :  { %v312_v58 = vmul.f32 %v2637_v55, %v311_v57 }
  0xe9   :  { %v336_v17 = vor.u32 1.1754944e-38, %v335_v12  ;;  %vm334_vm8 = vcmp.eq.f32.partialorder %v333_v13, 8.507059e+37 }
  0xea   :  { %v313_v60 = vadd.f32 %v2637_v55, %v312_v58 }
  0xec   :  { %v317_v63 = vsel %vm316_vm3, %v2637_v55, %v313_v60 }
  0xed   :  { %v322_v1 = vsel %vm319_vm4, %v321_v62, %v317_v63  ;;  %v2641_v6 = vpop.eup %2640 }
  0xee   :  { %v325_v8 = vmul.f32 %v2641_v6, %v308_v5  ;;  %vm330_vm5 = vweird.f32 %v2641_v6  ;;  %v341_v23 = vmul.f32 0.0, %v322_v1 }
  0xef   :  { %vm331_vm7 = vmor %vm329_vm6, %vm330_vm5 }
  0xf0   :  { %v326_v9 = vsub.f32 1.0, %v325_v8 }
  0xf2   :  { %v327_v10 = vmul.f32 %v2641_v6, %v326_v9 }
  0xf4   :  { %v328_v11 = vadd.f32 %v2641_v6, %v327_v10 }
  0xf6   :  { %v332_v16 = vsel %vm331_vm7, %v2641_v6, %v328_v11 }
  0xf7   :  { %v337_v20 = vsel %vm334_vm8, %v336_v17, %v332_v16 }
  0xf8   :  { %v342_v29 = vmul.f32 0.0, %v337_v20 }
 0x11d   :  { %v346_v0 = vpop.permute.xlu0 %345 }
 0x11e   :  { %v351_v2 = vmul.f32 %v346_v0, %v322_v1 }
 0x120   :  { %355 = vrot.lane.b32.xlu1 %v351_v2, %s3014_s3 }
 0x14c   :  { %v348_v21 = vpop.permute.xlu0 %347 }
 0x14d   :  { %v352_v22 = vmul.f32 %v348_v21, %v337_v20 }
 0x14f   :  { %357 = vrot.lane.b32.xlu1 %v352_v22, %s3014_s3 }
 0x192   :  { %v356_v24 = vpop.permute.xlu1 %355 }
 0x193   :  { %v3176_v25 = vadd.f32 %v356_v24, %v341_v23 }
 0x195   :  { %2642 = vtanh.f32 %v3176_v25 }
 0x19b   :  { %v2643_v28 = vpop.eup %2642 }
 0x19c   :  { %367 = vrot.lane.b32.xlu2 %v2643_v28, %s3013_s0 }
 0x1c1   :  { %v358_v30 = vpop.permute.xlu1 %357 }
 0x1c2   :  { %v3180_v32 = vadd.f32 %v358_v30, %v342_v29 }
 0x1c4   :  { %2644 = vtanh.f32 %v3180_v32 }
 0x1ca   :  { %v2645_v33 = vpop.eup %2644 }
 0x1cb   :  { %369 = vrot.lane.b32.xlu2 %v2645_v33, %s3013_s0 }
 0x1f6   :  { %v368_v34 = vpop.permute.xlu2 %367 }
 0x1f7   :  { %v373_v35 = vmul.f32 %v368_v34, %v322_v1 }
 0x1f9   :  { %v3184_v38 = vpack.c.bf16 %v373_v35, %v373_v35 }
 0x1fb   :  { %v391_v43 = vunpack.c.l.b16 %v3184_v38 }
 0x225   :  { %v370_v37 = vpop.permute.xlu2 %369 }
 0x226   :  { %v374_v39 = vmul.f32 %v370_v37, %v337_v20 }
 0x228   :  { %v3186_v41 = vpack.c.bf16 %v374_v39, %v374_v39 }
 0x22a   :  { %v392_v45 = vunpack.c.l.b16 %v3186_v41 }
 0x22c   :  { %v393_v47 = vpack.c.b16 %v392_v45, %v391_v43 }
 0x22e   :  { %394 = vrot.lane.b32.xlu0 %v393_v47, %s3014_s3 }
 0x2a0   :  { %v395_v48 = vpop.permute.xlu0 %394 }
 0x2a1   :  { %2463 = vmatmul.msk.bf16.vlgmr.msrb.gmra.mxu2 %vm261_vm9, %v395_v48  ;;  %2464 = vmatmul.msk.bf16.vlgmr.msrb.gmra.mxu3 %vm261_vm9, %v395_v48 }
 0x2a2   :  { %675 = vmatpush.bf16.msrb.mxu3 %v3104_v15  ;;  %661 = vmatpush.bf16.msrb.mxu2 %v3090_v7 }
 0x2a6   :  { %676 = vmatpush.bf16.msrb.mxu3 %v3114_v18  ;;  %662 = vmatpush.bf16.msrb.mxu2 %v3102_v14 }
 0x324   :  { %v408_v51 = vpop.f32.mrf.mxu2  ;;  %v422_v52 = vpop.f32.mrf.mxu3 }
 0x325   :  { %v429_v53 = vadd.f32 %v408_v51, %v177_v50 }
 0x327   :  { %2646 = vtanh.f32 %v429_v53  ;;  %v2465_v62 = vmul.f32 -1.442695, %v429_v53 }
 0x32c   :  { %v410_v54 = vpop.f32.mrf.mxu2  ;;  %v424_v55 = vpop.f32.mrf.mxu3 }
 0x32d   :  { %v2647_v56 = vpop.eup %2646  ;;  %v430_v57 = vadd.f32 %v424_v55, %v3171_v46 }
 0x32e   :  { %475 = vrot.lane.b32.xlu1 %v2647_v56, %s3013_s0 }
 0x32f   :  { %2648 = vtanh.f32 %v430_v57  ;;  %v2466_v59 = vmul.f32 -1.442695, %v430_v57  ;;  %v179_v57 = vpop.f32.mrf.mxu0 }
 0x331   :  { %2650 = vpow2.f32 %v2466_v59 }
 0x335   :  { %v2649_v58 = vpop.eup %2648 }
 0x336   :  { %477 = vrot.lane.b32.xlu2 %v2649_v58, %s3013_s0  ;;  %v180_v58 = vadd.f32 %v179_v57, %v3157_v27 }
 0x337   :  { %v2651_v60 = vpop.eup %2650 }
 0x338   :  { %v438_v61 = vadd.f32 1.0, %v2651_v60 }
 0x33a   :  { %2652 = vrcp.f32 %v438_v61  ;;  %v465_v6 = vand.u32 2147483648, %v438_v61  ;;  %vm459_vm11 = vweird.f32 %v438_v61  ;;  %v463_v8 = vand.u32 2147483647, %v438_v61 }
 0x33b   :  { %2654 = vpow2.f32 %v2465_v62 }
 0x33c   :  { %v466_v11 = vor.u32 1.1754944e-38, %v465_v6  ;;  %vm464_vm13 = vcmp.eq.f32.partialorder %v463_v8, 8.507059e+37 }
 0x340   :  { %v2653_v63 = vpop.eup %2652 }
 0x341   :  { %v2655_v0 = vpop.eup %2654  ;;  %v455_v1 = vmul.f32 %v2653_v63, %v438_v61  ;;  %vm460_vm10 = vweird.f32 %v2653_v63 }
 0x342   :  { %v437_v2 = vadd.f32 1.0, %v2655_v0  ;;  %vm461_vm12 = vmor %vm459_vm11, %vm460_vm10 }
 0x343   :  { %v456_v3 = vsub.f32 1.0, %v455_v1 }
 0x344   :  { %2656 = vrcp.f32 %v437_v2  ;;  %v450_v22 = vand.u32 2147483648, %v437_v2  ;;  %vm444_vm15 = vweird.f32 %v437_v2  ;;  %v448_v23 = vand.u32 2147483647, %v437_v2 }
 0x345   :  { %v457_v46 = vmul.f32 %v2653_v63, %v456_v3 }
 0x346   :  { %v451_v28 = vor.u32 1.1754944e-38, %v450_v22  ;;  %vm449_vm1 = vcmp.eq.f32.partialorder %v448_v23, 8.507059e+37 }
 0x347   :  { %v458_v4 = vadd.f32 %v2653_v63, %v457_v46 }
 0x349   :  { %v462_v9 = vsel %vm461_vm12, %v2653_v63, %v458_v4 }
 0x34a   :  { %v2657_v5 = vpop.eup %2656  ;;  %v467_v13 = vsel %vm464_vm13, %v466_v11, %v462_v9 }
 0x34b   :  { %v440_v10 = vmul.f32 %v2657_v5, %v437_v2  ;;  %vm445_vm14 = vweird.f32 %v2657_v5  ;;  %v472_v34 = vmul.f32 %v467_v13, %v3180_v32 }
 0x34c   :  { %vm446_vm0 = vmor %vm444_vm15, %vm445_vm14 }
 0x34d   :  { %v441_v17 = vsub.f32 1.0, %v440_v10 }
 0x34f   :  { %v442_v20 = vmul.f32 %v2657_v5, %v441_v17 }
 0x351   :  { %v443_v21 = vadd.f32 %v2657_v5, %v442_v20 }
 0x353   :  { %v447_v24 = vsel %vm446_vm0, %v2657_v5, %v443_v21 }
 0x354   :  { %v452_v30 = vsel %vm449_vm1, %v451_v28, %v447_v24 }
 0x355   :  { %v471_v43 = vmul.f32 %v452_v30, %v3176_v25 }
 0x390   :  { %v478_v12 = vpop.permute.xlu2 %477 }
 0x391   :  { %v482_v16 = vmul.f32 %v478_v12, %v467_v13 }
 0x393   :  { %487 = vrot.lane.b32.xlu1 %v482_v16, %s3014_s3 }
 0x3a0   :  { %v476_v29 = vpop.permute.xlu1 %475 }
 0x3a1   :  { %v481_v33 = vmul.f32 %v476_v29, %v452_v30 }
 0x3a3   :  { %485 = vrot.lane.b32.xlu0 %v481_v33, %s3014_s3 }
 0x405   :  { %v488_v35 = vpop.permute.xlu1 %487 }
 0x406   :  { %v3204_v37 = vadd.f32 %v488_v35, %v472_v34 }
 0x408   :  { %2658 = vtanh.f32 %v3204_v37 }
 0x40e   :  { %v2659_v39 = vpop.eup %2658 }
 0x40f   :  { %499 = vrot.lane.b32.xlu0 %v2659_v39, %s3013_s0 }
 0x415   :  { %v486_v45 = vpop.permute.xlu0 %485 }
 0x416   :  { %v3209_v47 = vadd.f32 %v486_v45, %v471_v43 }
 0x418   :  { %2660 = vtanh.f32 %v3209_v47 }
 0x41e   :  { %v2661_v48 = vpop.eup %2660 }
 0x41f   :  { %497 = vrot.lane.b32.xlu2 %v2661_v48, %s3013_s0 }
 0x479   :  { %v498_v49 = vpop.permute.xlu2 %497 }
 0x47a   :  { %v503_v32 = vmul.f32 %v498_v49, %v452_v30 }
 0x47c   :  { %v3213_v51 = vpack.c.bf16 %v503_v32, %v503_v32 }
 0x47e   :  { %v519_v54 = vunpack.c.l.b16 %v3213_v51 }
 0x481   :  { %v500_v50 = vpop.permute.xlu0 %499 }
 0x482   :  { %v504_v52 = vmul.f32 %v500_v50, %v467_v13 }
 0x484   :  { %v3215_v53 = vpack.c.bf16 %v504_v52, %v504_v52 }
 0x486   :  { %v520_v25 = vunpack.c.l.b16 %v3215_v53 }
 0x488   :  { %v521_v55 = vpack.c.b16 %v520_v25, %v519_v54 }
 0x48a   :  { %522 = vrot.lane.b32.xlu1 %v521_v55, %s3014_s3 }
 0x4fc   :  { %v523_v56 = vpop.permute.xlu1 %522 }
 0x4fd   :  { %2467 = vmatmul.msk.bf16.vlgmr.msra.gmra.mxu2 %vm261_vm9, %v523_v56  ;;  %2468 = vmatmul.msk.bf16.vlgmr.msra.gmra.mxu3 %vm261_vm9, %v523_v56 }
 0x4fe   :  { %931 = vmatpush.bf16.msra.mxu3 %v3104_v15  ;;  %917 = vmatpush.bf16.msra.mxu2 %v3090_v7 }
 0x502   :  { %932 = vmatpush.bf16.msra.mxu3 %v3114_v18  ;;  %918 = vmatpush.bf16.msra.mxu2 %v3102_v14 }
 0x580   :  { %v536_v59 = vpop.f32.mrf.mxu2  ;;  %v550_v60 = vpop.f32.mrf.mxu3 }
 0x581   :  { %v557_v61 = vadd.f32 %v536_v59, %v180_v58 }
 0x583   :  { %2662 = vtanh.f32 %v557_v61  ;;  %v2469_v3 = vmul.f32 -1.442695, %v557_v61 }
 0x588   :  { %v538_v62 = vpop.f32.mrf.mxu2  ;;  %v552_v63 = vpop.f32.mrf.mxu3 }
 0x589   :  { %v2663_v0 = vpop.eup %2662  ;;  %v558_v1 = vadd.f32 %v552_v63, %v3169_v44 }
 0x58a   :  { %603 = vrot.lane.b32.xlu2 %v2663_v0, %s3013_s0 }
 0x58b   :  { %2664 = vtanh.f32 %v558_v1  ;;  %v2470_v9 = vmul.f32 -1.442695, %v558_v1 }
 0x58c   :  { %2666 = vpow2.f32 %v2469_v3 }
 0x591   :  { %v2665_v2 = vpop.eup %2664 }
 0x592   :  { %605 = vrot.lane.b32.xlu0 %v2665_v2, %s3013_s0  ;;  %v2667_v46 = vpop.eup %2666  ;;  %v181_v2 = vpop.f32.mrf.mxu0 }
 0x593   :  { %v565_v4 = vadd.f32 1.0, %v2667_v46  ;;  %v182_v3 = vadd.f32 %v181_v2, %v3157_v27 }
 0x595   :  { %2668 = vrcp.f32 %v565_v4  ;;  %v578_v44 = vand.u32 2147483648, %v565_v4  ;;  %vm572_vm3 = vweird.f32 %v565_v4  ;;  %v576_v12 = vand.u32 2147483647, %v565_v4 }
 0x596   :  { %2670 = vpow2.f32 %v2470_v9 }
 0x597   :  { %v579_v17 = vor.u32 1.1754944e-38, %v578_v44  ;;  %vm577_vm5 = vcmp.eq.f32.partialorder %v576_v12, 8.507059e+37 }
 0x59b   :  { %v2669_v5 = vpop.eup %2668 }
 0x59c   :  { %v568_v6 = vmul.f32 %v2669_v5, %v565_v4  ;;  %vm573_vm2 = vweird.f32 %v2669_v5  ;;  %v2671_v13 = vpop.eup %2670 }
 0x59d   :  { %vm574_vm4 = vmor %vm572_vm3, %vm573_vm2  ;;  %v566_v20 = vadd.f32 1.0, %v2671_v13 }
 0x59e   :  { %v569_v8 = vsub.f32 1.0, %v568_v6 }
 0x59f   :  { %2672 = vrcp.f32 %v566_v20  ;;  %v593_v34 = vand.u32 2147483648, %v566_v20  ;;  %vm587_vm7 = vweird.f32 %v566_v20  ;;  %v591_v35 = vand.u32 2147483647, %v566_v20 }
 0x5a0   :  { %v570_v10 = vmul.f32 %v2669_v5, %v569_v8 }
 0x5a1   :  { %v594_v43 = vor.u32 1.1754944e-38, %v593_v34  ;;  %vm592_vm10 = vcmp.eq.f32.partialorder %v591_v35, 8.507059e+37 }
 0x5a2   :  { %v571_v11 = vadd.f32 %v2669_v5, %v570_v10 }
 0x5a4   :  { %v575_v16 = vsel %vm574_vm4, %v2669_v5, %v571_v11 }
 0x5a5   :  { %v580_v22 = vsel %vm577_vm5, %v579_v17, %v575_v16  ;;  %v2673_v24 = vpop.eup %2672 }
 0x5a6   :  { %v583_v28 = vmul.f32 %v2673_v24, %v566_v20  ;;  %vm588_vm6 = vweird.f32 %v2673_v24  ;;  %v599_v32 = vmul.f32 %v580_v22, %v3209_v47 }
 0x5a7   :  { %vm589_vm8 = vmor %vm587_vm7, %vm588_vm6 }
 0x5a8   :  { %v584_v29 = vsub.f32 1.0, %v583_v28 }
 0x5aa   :  { %v585_v30 = vmul.f32 %v2673_v24, %v584_v29 }
 0x5ac   :  { %v586_v33 = vadd.f32 %v2673_v24, %v585_v30 }
 0x5ae   :  { %v590_v39 = vsel %vm589_vm8, %v2673_v24, %v586_v33 }
 0x5af   :  { %v595_v48 = vsel %vm592_vm10, %v594_v43, %v590_v39 }
 0x5b0   :  { %v600_v54 = vmul.f32 %v595_v48, %v3204_v37 }
 0x5e4   :  { %v604_v21 = vpop.permute.xlu2 %603 }
 0x5e5   :  { %v609_v23 = vmul.f32 %v604_v21, %v580_v22 }
 0x5e7   :  { %613 = vrot.lane.b32.xlu1 %v609_v23, %s3014_s3 }
 0x604   :  { %v606_v45 = vpop.permute.xlu0 %605 }
 0x605   :  { %v610_v49 = vmul.f32 %v606_v45, %v595_v48 }
 0x607   :  { %615 = vrot.lane.b32.xlu2 %v610_v49, %s3014_s3 }
 0x659   :  { %v614_v50 = vpop.permute.xlu1 %613 }
 0x65a   :  { %v3233_v52 = vadd.f32 %v614_v50, %v599_v32 }
 0x65c   :  { %2674 = vtanh.f32 %v3233_v52 }
 0x661   :  { %v616_v25 = vpop.permute.xlu2 %615 }
 0x662   :  { %v2675_v55 = vpop.eup %2674  ;;  %v3237_v56 = vadd.f32 %v616_v25, %v600_v54 }
 0x663   :  { %625 = vrot.lane.b32.xlu0 %v2675_v55, %s3013_s0 }
 0x664   :  { %2676 = vtanh.f32 %v3237_v56 }
 0x66a   :  { %v2677_v57 = vpop.eup %2676 }
 0x66b   :  { %627 = vrot.lane.b32.xlu1 %v2677_v57, %s3013_s0 }
 0x6d5   :  { %v626_v58 = vpop.permute.xlu0 %625 }
 0x6d6   :  { %v631_v47 = vmul.f32 %v626_v58, %v580_v22 }
 0x6d8   :  { %v3242_v60 = vpack.c.bf16 %v631_v47, %v631_v47 }
 0x6da   :  { %v647_v37 = vunpack.c.l.b16 %v3242_v60 }
 0x6dd   :  { %v628_v59 = vpop.permute.xlu1 %627 }
 0x6de   :  { %v632_v61 = vmul.f32 %v628_v59, %v595_v48 }
 0x6e0   :  { %v3244_v62 = vpack.c.bf16 %v632_v61, %v632_v61 }
 0x6e2   :  { %v648_v63 = vunpack.c.l.b16 %v3244_v62 }
 0x6e4   :  { %v649_v0 = vpack.c.b16 %v648_v63, %v647_v37 }
 0x6e6   :  { %650 = vrot.lane.b32.xlu2 %v649_v0, %s3014_s3 }
 0x740   :  { %v651_v1 = vpop.permute.xlu2 %650 }
 0x741   :  { %2471 = vmatmul.msk.bf16.vlgmr.msrb.gmra.mxu2 %vm261_vm9, %v651_v1  ;;  %2472 = vmatmul.msk.bf16.vlgmr.msrb.gmra.mxu3 %vm261_vm9, %v651_v1 }
 0x742   :  { %1187 = vmatpush.bf16.msrb.mxu3 %v3104_v15  ;;  %1173 = vmatpush.bf16.msrb.mxu2 %v3090_v7 }
 0x746   :  { %1188 = vmatpush.bf16.msrb.mxu3 %v3114_v18  ;;  %1174 = vmatpush.bf16.msrb.mxu2 %v3102_v14 }
 0x7c4   :  { %v664_v46 = vpop.f32.mrf.mxu2  ;;  %v678_v4 = vpop.f32.mrf.mxu3 }
 0x7c5   :  { %v685_v5 = vadd.f32 %v664_v46, %v182_v3 }
 0x7c7   :  { %2678 = vtanh.f32 %v685_v5  ;;  %v2473_v15 = vmul.f32 -1.442695, %v685_v5 }
 0x7cc   :  { %v666_v6 = vpop.f32.mrf.mxu2  ;;  %v680_v8 = vpop.f32.mrf.mxu3 }
 0x7cd   :  { %v2679_v9 = vpop.eup %2678  ;;  %v686_v10 = vadd.f32 %v680_v8, %v3167_v42  ;;  %v184_v8 = vpop.f32.mrf.mxu0 }
 0x7ce   :  { %731 = vrot.lane.b32.xlu0 %v2679_v9, %s3013_s0 }
 0x7cf   :  { %2680 = vtanh.f32 %v686_v10  ;;  %v2474_v14 = vmul.f32 -1.442695, %v686_v10 }
 0x7d0   :  { %2682 = vpow2.f32 %v2473_v15  ;;  %v185_v15 = vadd.f32 %v184_v8, %v3157_v27 }
 0x7d1   :  { %2684 = vpow2.f32 %v2474_v14 }
 0x7d5   :  { %v2681_v7 = vpop.eup %2680  ;;  %v3280_v9 = vpop.f32.mrf.mxu0 }
 0x7d6   :  { %733 = vrot.lane.b32.xlu1 %v2681_v7, %s3013_s0  ;;  %v2683_v18 = vpop.eup %2682 }
 0x7d7   :  { %v693_v11 = vadd.f32 1.0, %v2683_v18  ;;  %v2685_v44 = vpop.eup %2684 }
 0x7d8   :  { %v694_v12 = vadd.f32 1.0, %v2685_v44 }
 0x7d9   :  { %2686 = vrcp.f32 %v693_v11  ;;  %v706_v24 = vand.u32 2147483648, %v693_v11  ;;  %vm700_vm12 = vweird.f32 %v693_v11  ;;  %v704_v28 = vand.u32 2147483647, %v693_v11 }
 0x7da   :  { %2688 = vrcp.f32 %v694_v12  ;;  %v721_v45 = vand.u32 2147483648, %v694_v12  ;;  %vm715_vm0 = vweird.f32 %v694_v12  ;;  %v719_v48 = vand.u32 2147483647, %v694_v12 }
 0x7db   :  { %v707_v33 = vor.u32 1.1754944e-38, %v706_v24  ;;  %vm705_vm14 = vcmp.eq.f32.partialorder %v704_v28, 8.507059e+37 }
 0x7dc   :  { %v722_v32 = vor.u32 1.1754944e-38, %v721_v45  ;;  %vm720_vm2 = vcmp.eq.f32.partialorder %v719_v48, 8.507059e+37 }
 0x7dd   :  { %v3282_v10 = vpop.f32.mrf.mxu0 }
 0x7df   :  { %v2687_v13 = vpop.eup %2686 }
 0x7e0   :  { %v696_v16 = vmul.f32 %v2687_v13, %v693_v11  ;;  %v2689_v42 = vpop.eup %2688  ;;  %vm701_vm11 = vweird.f32 %v2687_v13 }
 0x7e1   :  { %v711_v21 = vmul.f32 %v2689_v42, %v694_v12  ;;  %vm702_vm13 = vmor %vm700_vm12, %vm701_vm11  ;;  %vm716_vm15 = vweird.f32 %v2689_v42 }
 0x7e2   :  { %v697_v17 = vsub.f32 1.0, %v696_v16  ;;  %vm717_vm1 = vmor %vm715_vm0, %vm716_vm15 }
 0x7e3   :  { %v712_v23 = vsub.f32 1.0, %v711_v21 }
 0x7e4   :  { %v698_v20 = vmul.f32 %v2687_v13, %v697_v17 }
 0x7e5   :  { %v713_v30 = vmul.f32 %v2689_v42, %v712_v23  ;;  %v3284_v7 = vpop.f32.mrf.mxu0 }
 0x7e6   :  { %v699_v22 = vadd.f32 %v2687_v13, %v698_v20 }
 0x7e7   :  { %v714_v43 = vadd.f32 %v2689_v42, %v713_v30 }
 0x7e8   :  { %v703_v29 = vsel %vm702_vm13, %v2687_v13, %v699_v22 }
 0x7e9   :  { %v708_v35 = vsel %vm705_vm14, %v707_v33, %v703_v29  ;;  %v718_v49 = vsel %vm717_vm1, %v2689_v42, %v714_v43 }
 0x7ea   :  { %v723_v54 = vsel %vm720_vm2, %v722_v32, %v718_v49  ;;  %v727_v55 = vmul.f32 %v708_v35, %v3233_v52 }
 0x7eb   :  { %v728_v59 = vmul.f32 %v723_v54, %v3237_v56 }
 0x840   :  { %v732_v34 = vpop.permute.xlu0 %731 }
 0x841   :  { %v737_v39 = vmul.f32 %v732_v34, %v708_v35 }
 0x843   :  { %741 = vrot.lane.b32.xlu2 %v737_v39, %s3014_s3 }
 0x848   :  { %v734_v50 = vpop.permute.xlu1 %733 }
 0x849   :  { %v738_v25 = vmul.f32 %v734_v50, %v723_v54 }
 0x84b   :  { %743 = vrot.lane.b32.xlu0 %v738_v25, %s3014_s3 }
 0x89d   :  { %v742_v57 = vpop.permute.xlu2 %741 }
 0x89e   :  { %v3262_v58 = vadd.f32 %v742_v57, %v727_v55 }
 0x8a0   :  { %2690 = vtanh.f32 %v3262_v58 }
 0x8a6   :  { %v2691_v47 = vpop.eup %2690 }
 0x8a7   :  { %753 = vrot.lane.b32.xlu1 %v2691_v47, %s3013_s0 }
 0x8bd   :  { %v744_v61 = vpop.permute.xlu0 %743 }
 0x8be   :  { %v3267_v37 = vadd.f32 %v744_v61, %v728_v59 }
 0x8c0   :  { %2692 = vtanh.f32 %v3267_v37 }
 0x8c6   :  { %v2693_v63 = vpop.eup %2692 }
 0x8c7   :  { %755 = vrot.lane.b32.xlu2 %v2693_v63, %s3013_s0 }
 0x919   :  { %v754_v0 = vpop.permute.xlu1 %753 }
 0x91a   :  { %v759_v52 = vmul.f32 %v754_v0, %v708_v35 }
 0x91c   :  { %v3271_v2 = vpack.c.bf16 %v759_v52, %v759_v52 }
 0x91e   :  { %v775_v4 = vunpack.c.l.b16 %v3271_v2 }
 0x921   :  { %v756_v1 = vpop.permute.xlu2 %755 }
 0x922   :  { %v760_v3 = vmul.f32 %v756_v1, %v723_v54 }
 0x924   :  { %v3273_v46 = vpack.c.bf16 %v760_v3, %v760_v3 }
 0x926   :  { %v776_v56 = vunpack.c.l.b16 %v3273_v46 }
 0x928   :  { %v777_v5 = vpack.c.b16 %v776_v56, %v775_v4 }
 0x92a   :  { %778 = vrot.lane.b32.xlu0 %v777_v5, %s3014_s3 }
 0x99c   :  { %v779_v6 = vpop.permute.xlu0 %778 }
 0x99d   :  { %2475 = vmatmul.msk.bf16.vlgmr.msrb.gmra.mxu0 %vm261_vm9, %v779_v6  ;;  %2476 = vmatmul.msk.bf16.vlgmr.msrb.gmra.mxu1 %vm261_vm9, %v779_v6 }
 0xa1a   :  { %v792_v14 = vpop.f32.mrf.mxu0  ;;  %v806_v18 = vpop.f32.mrf.mxu1 }
 0xa1b   :  { %v813_v11 = vadd.f32 %v792_v14, %v185_v15 }
 0xa1d   :  { %2694 = vtanh.f32 %v813_v11  ;;  %v2477_v22 = vmul.f32 -1.442695, %v813_v11 }
 0xa22   :  { %v794_v44 = vpop.f32.mrf.mxu0  ;;  %v808_v12 = vpop.f32.mrf.mxu1 }
 0xa23   :  { %v2695_v13 = vpop.eup %2694  ;;  %v814_v16 = vadd.f32 %v808_v12, %v3165_v40 }
 0xa24   :  { %859 = vrot.lane.b32.xlu1 %v2695_v13, %s3013_s0 }
 0xa25   :  { %2696 = vtanh.f32 %v814_v16  ;;  %v2478_v42 = vmul.f32 -1.442695, %v814_v16 }
 0xa27   :  { %2698 = vpow2.f32 %v2478_v42  ;;  %v187_v42 = vadd.f32 %v3280_v9, %v3157_v27 }
 0xa2b   :  { %v2697_v17 = vpop.eup %2696 }
 0xa2c   :  { %861 = vrot.lane.b32.xlu2 %v2697_v17, %s3013_s0 }
 0xa2d   :  { %v2699_v20 = vpop.eup %2698 }
 0xa2e   :  { %v822_v21 = vadd.f32 1.0, %v2699_v20 }
 0xa30   :  { %2700 = vrcp.f32 %v822_v21  ;;  %v849_v35 = vand.u32 2147483648, %v822_v21  ;;  %vm843_vm4 = vweird.f32 %v822_v21  ;;  %v847_v39 = vand.u32 2147483647, %v822_v21 }
 0xa31   :  { %2702 = vpow2.f32 %v2477_v22 }
 0xa32   :  { %v850_v48 = vor.u32 1.1754944e-38, %v849_v35  ;;  %vm848_vm6 = vcmp.eq.f32.partialorder %v847_v39, 8.507059e+37 }
 0xa36   :  { %v2701_v23 = vpop.eup %2700 }
 0xa37   :  { %v2703_v24 = vpop.eup %2702  ;;  %v839_v28 = vmul.f32 %v2701_v23, %v822_v21  ;;  %vm844_vm3 = vweird.f32 %v2701_v23 }
 0xa38   :  { %v821_v29 = vadd.f32 1.0, %v2703_v24  ;;  %vm845_vm5 = vmor %vm843_vm4, %vm844_vm3 }
 0xa39   :  { %v840_v30 = vsub.f32 1.0, %v839_v28 }
 0xa3a   :  { %2704 = vrcp.f32 %v821_v29  ;;  %v834_v57 = vand.u32 2147483648, %v821_v29  ;;  %vm828_vm8 = vweird.f32 %v821_v29  ;;  %v832_v47 = vand.u32 2147483647, %v821_v29 }
 0xa3b   :  { %v841_v40 = vmul.f32 %v2701_v23, %v840_v30 }
 0xa3c   :  { %v835_v61 = vor.u32 1.1754944e-38, %v834_v57  ;;  %vm833_vm11 = vcmp.eq.f32.partialorder %v832_v47, 8.507059e+37 }
 0xa3d   :  { %v842_v33 = vadd.f32 %v2701_v23, %v841_v40 }
 0xa3f   :  { %v846_v43 = vsel %vm845_vm5, %v2701_v23, %v842_v33 }
 0xa40   :  { %v2705_v34 = vpop.eup %2704  ;;  %v851_v32 = vsel %vm848_vm6, %v850_v48, %v846_v43 }
 0xa41   :  { %v824_v45 = vmul.f32 %v2705_v34, %v821_v29  ;;  %vm829_vm7 = vweird.f32 %v2705_v34  ;;  %v856_v1 = vmul.f32 %v851_v32, %v3267_v37 }
 0xa42   :  { %vm830_vm10 = vmor %vm828_vm8, %vm829_vm7 }
 0xa43   :  { %v825_v54 = vsub.f32 1.0, %v824_v45 }
 0xa45   :  { %v826_v25 = vmul.f32 %v2705_v34, %v825_v54 }
 0xa47   :  { %v827_v55 = vadd.f32 %v2705_v34, %v826_v25 }
 0xa49   :  { %v831_v59 = vsel %vm830_vm10, %v2705_v34, %v827_v55 }
 0xa4a   :  { %v836_v0 = vsel %vm833_vm11, %v835_v61, %v831_v59 }
 0xa4b   :  { %v855_v5 = vmul.f32 %v836_v0, %v3262_v58 }
 0xa86   :  { %v862_v49 = vpop.permute.xlu2 %861 }
 0xa87   :  { %v866_v50 = vmul.f32 %v862_v49, %v851_v32 }
 0xa89   :  { %871 = vrot.lane.b32.xlu1 %v866_v50, %s3014_s3 }
 0xa96   :  { %v860_v63 = vpop.permute.xlu1 %859 }
 0xa97   :  { %v865_v52 = vmul.f32 %v860_v63, %v836_v0 }
 0xa99   :  { %869 = vrot.lane.b32.xlu0 %v865_v52, %s3014_s3 }
 0xafb   :  { %v872_v3 = vpop.permute.xlu1 %871 }
 0xafc   :  { %v3293_v4 = vadd.f32 %v872_v3, %v856_v1 }
 0xafe   :  { %2706 = vtanh.f32 %v3293_v4 }
 0xb04   :  { %v2707_v56 = vpop.eup %2706 }
 0xb05   :  { %883 = vrot.lane.b32.xlu0 %v2707_v56, %s3013_s0 }
 0xb0b   :  { %v870_v6 = vpop.permute.xlu0 %869 }
 0xb0c   :  { %v3298_v8 = vadd.f32 %v870_v6, %v855_v5 }
 0xb0e   :  { %2708 = vtanh.f32 %v3298_v8 }
 0xb14   :  { %v2709_v15 = vpop.eup %2708 }
 0xb15   :  { %881 = vrot.lane.b32.xlu2 %v2709_v15, %s3013_s0 }
 0xb6f   :  { %v882_v14 = vpop.permute.xlu2 %881 }
 0xb70   :  { %v887_v37 = vmul.f32 %v882_v14, %v836_v0 }
 0xb72   :  { %v3302_v11 = vpack.c.bf16 %v887_v37, %v887_v37 }
 0xb74   :  { %v903_v13 = vunpack.c.l.b16 %v3302_v11 }
 0xb77   :  { %v884_v18 = vpop.permute.xlu0 %883 }
 0xb78   :  { %v888_v44 = vmul.f32 %v884_v18, %v851_v32 }
 0xb7a   :  { %v3304_v12 = vpack.c.bf16 %v888_v44, %v888_v44 }
 0xb7c   :  { %v904_v58 = vunpack.c.l.b16 %v3304_v12 }
 0xb7e   :  { %v905_v16 = vpack.c.b16 %v904_v58, %v903_v13 }
 0xb80   :  { %906 = vrot.lane.b32.xlu1 %v905_v16, %s3014_s3 }
 0xbf2   :  { %v907_v17 = vpop.permute.xlu1 %906 }
 0xbf3   :  { %2479 = vmatmul.msk.bf16.vlgmr.msra.gmra.mxu2 %vm261_vm9, %v907_v17  ;;  %2480 = vmatmul.msk.bf16.vlgmr.msra.gmra.mxu3 %vm261_vm9, %v907_v17 }
 0xc76   :  { %v920_v20 = vpop.f32.mrf.mxu2  ;;  %v934_v21 = vpop.f32.mrf.mxu3 }
 0xc77   :  { %v941_v22 = vadd.f32 %v920_v20, %v187_v42 }
 0xc79   :  { %2710 = vtanh.f32 %v941_v22  ;;  %v2481_v40 = vmul.f32 -1.442695, %v941_v22 }
 0xc7e   :  { %v922_v23 = vpop.f32.mrf.mxu2  ;;  %v936_v24 = vpop.f32.mrf.mxu3 }
 0xc7f   :  { %v2711_v28 = vpop.eup %2710  ;;  %v942_v29 = vadd.f32 %v936_v24, %v3162_v36 }
 0xc80   :  { %987 = vrot.lane.b32.xlu2 %v2711_v28, %s3013_s0 }
 0xc81   :  { %2712 = vtanh.f32 %v942_v29  ;;  %v2482_v43 = vmul.f32 -1.442695, %v942_v29 }
 0xc82   :  { %2714 = vpow2.f32 %v2481_v40  ;;  %v190_v40 = vadd.f32 %v3282_v10, %v3157_v27 }
 0xc87   :  { %v2713_v30 = vpop.eup %2712 }
 0xc88   :  { %989 = vrot.lane.b32.xlu0 %v2713_v30, %s3013_s0  ;;  %v2715_v33 = vpop.eup %2714 }
 0xc89   :  { %v949_v34 = vadd.f32 1.0, %v2715_v33 }
 0xc8b   :  { %2716 = vrcp.f32 %v949_v34  ;;  %v962_v36 = vand.u32 2147483648, %v949_v34  ;;  %vm956_vm13 = vweird.f32 %v949_v34  ;;  %v960_v49 = vand.u32 2147483647, %v949_v34 }
 0xc8c   :  { %2718 = vpow2.f32 %v2482_v43 }
 0xc8d   :  { %v963_v54 = vor.u32 1.1754944e-38, %v962_v36  ;;  %vm961_vm15 = vcmp.eq.f32.partialorder %v960_v49, 8.507059e+37 }
 0xc91   :  { %v2717_v9 = vpop.eup %2716 }
 0xc92   :  { %v952_v35 = vmul.f32 %v2717_v9, %v949_v34  ;;  %vm957_vm12 = vweird.f32 %v2717_v9  ;;  %v2719_v32 = vpop.eup %2718 }
 0xc93   :  { %vm958_vm14 = vmor %vm956_vm13, %vm957_vm12  ;;  %v950_v25 = vadd.f32 1.0, %v2719_v32 }
 0xc94   :  { %v953_v39 = vsub.f32 1.0, %v952_v35 }
 0xc95   :  { %2720 = vrcp.f32 %v950_v25  ;;  %v977_v1 = vand.u32 2147483648, %v950_v25  ;;  %vm971_vm1 = vweird.f32 %v950_v25  ;;  %v975_v3 = vand.u32 2147483647, %v950_v25 }
 0xc96   :  { %v954_v45 = vmul.f32 %v2717_v9, %v953_v39 }
 0xc97   :  { %v978_v5 = vor.u32 1.1754944e-38, %v977_v1  ;;  %vm976_vm3 = vcmp.eq.f32.partialorder %v975_v3, 8.507059e+37 }
 0xc98   :  { %v955_v48 = vadd.f32 %v2717_v9, %v954_v45 }
 0xc9a   :  { %v959_v50 = vsel %vm958_vm14, %v2717_v9, %v955_v48 }
 0xc9b   :  { %v964_v57 = vsel %vm961_vm15, %v963_v54, %v959_v50  ;;  %v2721_v59 = vpop.eup %2720 }
 0xc9c   :  { %v967_v61 = vmul.f32 %v2721_v59, %v950_v25  ;;  %vm972_vm0 = vweird.f32 %v2721_v59  ;;  %v983_v37 = vmul.f32 %v964_v57, %v3298_v8 }
 0xc9d   :  { %vm973_vm2 = vmor %vm971_vm1, %vm972_vm0 }
 0xc9e   :  { %v968_v63 = vsub.f32 1.0, %v967_v61 }
 0xca0   :  { %v969_v0 = vmul.f32 %v2721_v59, %v968_v63 }
 0xca2   :  { %v970_v52 = vadd.f32 %v2721_v59, %v969_v0 }
 0xca4   :  { %v974_v56 = vsel %vm973_vm2, %v2721_v59, %v970_v52 }
 0xca5   :  { %v979_v15 = vsel %vm976_vm3, %v978_v5, %v974_v56 }
 0xca6   :  { %v984_v13 = vmul.f32 %v979_v15, %v3293_v4 }
 0xcda   :  { %v988_v55 = vpop.permute.xlu2 %987 }
 0xcdb   :  { %v993_v47 = vmul.f32 %v988_v55, %v964_v57 }
 0xcdd   :  { %997 = vrot.lane.b32.xlu1 %v993_v47, %s3014_s3 }
 0xcfa   :  { %v990_v6 = vpop.permute.xlu0 %989 }
 0xcfb   :  { %v994_v14 = vmul.f32 %v990_v6, %v979_v15 }
 0xcfd   :  { %999 = vrot.lane.b32.xlu2 %v994_v14, %s3014_s3 }
 0xd4f   :  { %v998_v18 = vpop.permute.xlu1 %997 }
 0xd50   :  { %v3319_v44 = vadd.f32 %v998_v18, %v983_v37 }
 0xd52   :  { %2722 = vtanh.f32 %v3319_v44 }
 0xd57   :  { %v1000_v58 = vpop.permute.xlu2 %999 }
 0xd58   :  { %v2723_v16 = vpop.eup %2722  ;;  %v3323_v17 = vadd.f32 %v1000_v58, %v984_v13 }
 0xd59   :  { %1009 = vrot.lane.b32.xlu0 %v2723_v16, %s3013_s0 }
 0xd5a   :  { %2724 = vtanh.f32 %v3323_v17 }
 0xd60   :  { %v2725_v42 = vpop.eup %2724 }
 0xd61   :  { %1011 = vrot.lane.b32.xlu1 %v2725_v42, %s3013_s0 }
 0xdcb   :  { %v1010_v20 = vpop.permute.xlu0 %1009 }
 0xdcc   :  { %v1015_v8 = vmul.f32 %v1010_v20, %v964_v57 }
 0xdce   :  { %v3328_v22 = vpack.c.bf16 %v1015_v8, %v1015_v8 }
 0xdd0   :  { %v1031_v4 = vunpack.c.l.b16 %v3328_v22 }
 0xdd3   :  { %v1012_v21 = vpop.permute.xlu1 %1011 }
 0xdd4   :  { %v1016_v23 = vmul.f32 %v1012_v21, %v979_v15 }
 0xdd6   :  { %v3330_v24 = vpack.c.bf16 %v1016_v23, %v1016_v23 }
 0xdd8   :  { %v1032_v28 = vunpack.c.l.b16 %v3330_v24 }
 0xdda   :  { %v1033_v29 = vpack.c.b16 %v1032_v28, %v1031_v4 }
 0xddc   :  { %1034 = vrot.lane.b32.xlu2 %v1033_v29, %s3014_s3 }
 0xe36   :  { %v1035_v30 = vpop.permute.xlu2 %1034 }
 0xe37   :  { %2483 = vmatmul.msk.bf16.vlgmr.msra.gmra.mxu0 %vm261_vm9, %v1035_v30  ;;  %2484 = vmatmul.msk.bf16.vlgmr.msra.gmra.mxu1 %vm261_vm9, %v1035_v30 }
 0xeb4   :  { %v1048_v33 = vpop.f32.mrf.mxu0  ;;  %v1062_v34 = vpop.f32.mrf.mxu1 }
 0xeb5   :  { %v1069_v9 = vadd.f32 %v1048_v33, %v190_v40 }
 0xeb7   :  { %2726 = vtanh.f32 %v1069_v9  ;;  %v2485_v36 = vmul.f32 -1.442695, %v1069_v9 }
 0xebc   :  { %v1050_v35 = vpop.f32.mrf.mxu0  ;;  %v1064_v39 = vpop.f32.mrf.mxu1 }
 0xebd   :  { %v2727_v43 = vpop.eup %2726  ;;  %v1070_v45 = vadd.f32 %v1064_v39, %v3160_v31 }
 0xebe   :  { %1115 = vrot.lane.b32.xlu0 %v2727_v43, %s3013_s0 }
 0xebf   :  { %2728 = vtanh.f32 %v1070_v45  ;;  %v2486_v49 = vmul.f32 -1.442695, %v1070_v45 }
 0xec0   :  { %2730 = vpow2.f32 %v2485_v36  ;;  %v192_v36 = vadd.f32 %v3284_v7, %v3157_v27 }
 0xec1   :  { %2732 = vpow2.f32 %v2486_v49 }
 0xec5   :  { %v2729_v48 = vpop.eup %2728 }
 0xec6   :  { %1117 = vrot.lane.b32.xlu1 %v2729_v48, %s3013_s0  ;;  %v2731_v32 = vpop.eup %2730 }
 0xec7   :  { %v1077_v10 = vadd.f32 1.0, %v2731_v32  ;;  %v2733_v50 = vpop.eup %2732 }
 0xec8   :  { %v1078_v54 = vadd.f32 1.0, %v2733_v50 }
 0xec9   :  { %2734 = vrcp.f32 %v1077_v10  ;;  %v1090_v0 = vand.u32 2147483648, %v1077_v10  ;;  %vm1084_vm5 = vweird.f32 %v1077_v10  ;;  %v1088_v52 = vand.u32 2147483647, %v1077_v10 }
 0xeca   :  { %2736 = vrcp.f32 %v1078_v54  ;;  %v1105_v37 = vand.u32 2147483648, %v1078_v54  ;;  %vm1099_vm10 = vweird.f32 %v1078_v54  ;;  %v1103_v18 = vand.u32 2147483647, %v1078_v54 }
 0xecb   :  { %v1091_v56 = vor.u32 1.1754944e-38, %v1090_v0  ;;  %vm1089_vm7 = vcmp.eq.f32.partialorder %v1088_v52, 8.507059e+37 }
 0xecc   :  { %v1106_v58 = vor.u32 1.1754944e-38, %v1105_v37  ;;  %vm1104_vm12 = vcmp.eq.f32.partialorder %v1103_v18, 8.507059e+37 }
 0xecf   :  { %v2735_v25 = vpop.eup %2734 }
 0xed0   :  { %v1080_v55 = vmul.f32 %v2735_v25, %v1077_v10  ;;  %v2737_v31 = vpop.eup %2736  ;;  %vm1085_vm4 = vweird.f32 %v2735_v25 }
 0xed1   :  { %v1095_v59 = vmul.f32 %v2737_v31, %v1078_v54  ;;  %vm1086_vm6 = vmor %vm1084_vm5, %vm1085_vm4  ;;  %vm1100_vm8 = vweird.f32 %v2737_v31  ;;  %vm381_vm4 = vcmask 257024  }
 0xed2   :  { %v1081_v57 = vsub.f32 1.0, %v1080_v55  ;;  %vm1101_vm11 = vmor %vm1099_vm10, %vm1100_vm8 }
 0xed3   :  { %v1096_v63 = vsub.f32 1.0, %v1095_v59 }
 0xed4   :  { %v1082_v47 = vmul.f32 %v2735_v25, %v1081_v57 }
 0xed5   :  { %v1097_v3 = vmul.f32 %v2737_v31, %v1096_v63 }
 0xed6   :  { %v1083_v61 = vadd.f32 %v2735_v25, %v1082_v47 }
 0xed7   :  { %v1098_v14 = vadd.f32 %v2737_v31, %v1097_v3 }
 0xed8   :  { %v1087_v1 = vsel %vm1086_vm6, %v2735_v25, %v1083_v61  ;;  %vm387_vm6 = vcmask 519424  }
 0xed9   :  { %v1092_v6 = vsel %vm1089_vm7, %v1091_v56, %v1087_v1  ;;  %v1102_v13 = vsel %vm1101_vm11, %v2737_v31, %v1098_v14  ;;  %vm1371_vm7 = vcmask 523264  }
 0xeda   :  { %v1107_v42 = vsel %vm1104_vm12, %v1106_v58, %v1102_v13  ;;  %v1111_v8 = vmul.f32 %v1092_v6, %v3319_v44 }
 0xedb   :  { %v1112_v28 = vmul.f32 %v1107_v42, %v3323_v17 }
 0xf30   :  { %v1116_v5 = vpop.permute.xlu0 %1115 }
 0xf31   :  { %v1121_v15 = vmul.f32 %v1116_v5, %v1092_v6 }
 0xf33   :  { %1125 = vrot.lane.b32.xlu2 %v1121_v15, %s3014_s3 }
 0xf38   :  { %v1118_v16 = vpop.permute.xlu1 %1117 }
 0xf39   :  { %v1122_v20 = vmul.f32 %v1118_v16, %v1107_v42 }
 0xf3b   :  { %1127 = vrot.lane.b32.xlu0 %v1122_v20, %s3014_s3 }
 0xf8d   :  { %v1126_v21 = vpop.permute.xlu2 %1125 }
 0xf8e   :  { %v3345_v23 = vadd.f32 %v1126_v21, %v1111_v8 }
 0xf90   :  { %2738 = vtanh.f32 %v3345_v23 }
 0xf96   :  { %v2739_v4 = vpop.eup %2738 }
 0xf97   :  { %1137 = vrot.lane.b32.xlu1 %v2739_v4, %s3013_s0 }
 0xfad   :  { %v1128_v29 = vpop.permute.xlu0 %1127 }
 0xfae   :  { %v3350_v30 = vadd.f32 %v1128_v29, %v1112_v28 }
 0xfb0   :  { %2740 = vtanh.f32 %v3350_v30 }
 0xfb6   :  { %v2741_v40 = vpop.eup %2740 }
 0xfb7   :  { %1139 = vrot.lane.b32.xlu2 %v2741_v40, %s3013_s0 }
0x1009   :  { %v1138_v33 = vpop.permute.xlu1 %1137 }
0x100a   :  { %v1143_v44 = vmul.f32 %v1138_v33, %v1092_v6 }
0x100c   :  { %v3354_v9 = vpack.c.bf16 %v1143_v44, %v1143_v44 }
0x100e   :  { %v1159_v43 = vunpack.c.l.b16 %v3354_v9 }
0x1011   :  { %v1140_v34 = vpop.permute.xlu2 %1139 }
0x1012   :  { %v1144_v35 = vmul.f32 %v1140_v34, %v1107_v42 }
0x1014   :  { %v3356_v39 = vpack.c.bf16 %v1144_v35, %v1144_v35 }
0x1016   :  { %v1160_v17 = vunpack.c.l.b16 %v3356_v39 }
0x1018   :  { %v1161_v45 = vpack.c.b16 %v1160_v17, %v1159_v43 }
0x101a   :  { %1162 = vrot.lane.b32.xlu0 %v1161_v45, %s3014_s3 }
0x108c   :  { %v1163_v48 = vpop.permute.xlu0 %1162 }
0x108d   :  { %2487 = vmatmul.msk.bf16.vlgmr.msrb.gmra.mxu2 %vm261_vm9, %v1163_v48  ;;  %2488 = vmatmul.msk.bf16.vlgmr.msrb.gmra.mxu3 %vm261_vm9, %v1163_v48 }
0x1110   :  { %v1176_v49 = vpop.f32.mrf.mxu2  ;;  %v1190_v32 = vpop.f32.mrf.mxu3 }
0x1111   :  { %v1197_v10 = vadd.f32 %v1176_v49, %v192_v36  ;;  %v2614_v49 = vld [vmem:[#allocation7 + $0x34] sm:$0xf0]  ;;  %v2611_v32 = vld [vmem:[#allocation7 + $0x24] sm:$0xf] }
0x1113   :  { %2742 = vtanh.f32 %v1197_v10  ;;  %v2489_v31 = vmul.f32 -1.442695, %v1197_v10 }
0x1118   :  { %v1178_v50 = vpop.f32.mrf.mxu2  ;;  %v1192_v54 = vpop.f32.mrf.mxu3 }
0x1119   :  { %v2743_v25 = vpop.eup %2742  ;;  %v1198_v55 = vadd.f32 %v1192_v54, %v3155_v26  ;;  %v2525_v50 = vld [vmem:[#allocation7 + $0x20] sm:$0xf]  ;;  %v2612_v54 = vld [vmem:[#allocation7 + $0x24] sm:$0xf0] }
0x111a   :  { %1243 = vrot.lane.b32.xlu0 %v2743_v25, %s3013_s0  ;;  %v2557_v25 = vld [vmem:[#allocation9 + $0x10] sm:$0xf] }
0x111b   :  { %2744 = vtanh.f32 %v1198_v55  ;;  %v2490_v27 = vmul.f32 -1.442695, %v1198_v55  ;;  %v2618_v55 = vld [vmem:[#allocation9 + $0x14] sm:$0xf0] }
0x111c   :  { %2746 = vpow2.f32 %v2489_v31 }
0x111d   :  { %2748 = vpow2.f32 %v2490_v27 }
0x1121   :  { %v2745_v57 = vpop.eup %2744 }
0x1122   :  { %1245 = vrot.lane.b32.xlu1 %v2745_v57, %s3013_s0  ;;  %378 = vrot.lane.b32.xlu0 %v3184_v38, %s3014_s3  ;;  %v2747_v7 = vpop.eup %2746  ;;  %v3412_v57 = vor.u32 %v2618_v55, %v2557_v25 }
0x1123   :  { %v1205_v47 = vadd.f32 1.0, %v2747_v7  ;;  %v2749_v59 = vpop.eup %2748 }
0x1124   :  { %v1206_v61 = vadd.f32 1.0, %v2749_v59  ;;  %1486 = vmatpush.bf16.msra.mxu2 %v3412_v57 }
0x1125   :  { %2750 = vrcp.f32 %v1205_v47  ;;  %v1218_v38 = vand.u32 2147483648, %v1205_v47  ;;  %vm1212_vm14 = vweird.f32 %v1205_v47  ;;  %v1216_v6 = vand.u32 2147483647, %v1205_v47 }
0x1126   :  { %2752 = vrcp.f32 %v1206_v61  ;;  %v1233_v42 = vand.u32 2147483648, %v1206_v61  ;;  %vm1227_vm2 = vweird.f32 %v1206_v61  ;;  %v1231_v20 = vand.u32 2147483647, %v1206_v61 }
0x1127   :  { %v1219_v37 = vor.u32 1.1754944e-38, %v1218_v38  ;;  %vm1217_vm0 = vcmp.eq.f32.partialorder %v1216_v6, 8.507059e+37  ;;  %v2607_v6 = vld [vmem:[#allocation7 + $0x4] sm:$0xf] }
0x1128   :  { %v1234_v21 = vor.u32 1.1754944e-38, %v1233_v42  ;;  %vm1232_vm5 = vcmp.eq.f32.partialorder %v1231_v20, 8.507059e+37  ;;  %v2559_v42 = vld [vmem:[#allocation9 + $0x18] sm:$0xf0] }
0x112b   :  { %v2751_v63 = vpop.eup %2750 }
0x112c   :  { %v1208_v26 = vmul.f32 %v2751_v63, %v1205_v47  ;;  %v2753_v52 = vpop.eup %2752  ;;  %vm1213_vm13 = vweird.f32 %v2751_v63 }
0x112d   :  { %v1223_v3 = vmul.f32 %v2753_v52, %v1206_v61  ;;  %vm1214_vm15 = vmor %vm1212_vm14, %vm1213_vm13  ;;  %vm1228_vm1 = vweird.f32 %v2753_v52 }
0x112e   :  { %v1209_v0 = vsub.f32 1.0, %v1208_v26  ;;  %vm1229_vm3 = vmor %vm1227_vm2, %vm1228_vm1  ;;  %v2519_v26 = vld [vmem:[#allocation7 + $0x18] sm:$0xf0] }
0x112f   :  { %v1224_v5 = vsub.f32 1.0, %v1223_v3  ;;  %v2549_v3 = vld [vmem:[#allocation9] sm:$0xf] }
0x1130   :  { %v1210_v1 = vmul.f32 %v2751_v63, %v1209_v0  ;;  %v2517_v0 = vld [vmem:[#allocation7 + $0x10] sm:$0xf] }
0x1131   :  { %v1225_v14 = vmul.f32 %v2753_v52, %v1224_v5 }
0x1132   :  { %v1211_v56 = vadd.f32 %v2751_v63, %v1210_v1  ;;  %v2610_v1 = vld [vmem:[#allocation7 + $0x14] sm:$0xf0] }
0x1133   :  { %v1226_v16 = vadd.f32 %v2753_v52, %v1225_v14  ;;  %v2518_v5 = vor.u32 %v2610_v1, %v2517_v0  ;;  %v2509_v14 = vld [vmem:[#allocation7] sm:$0xf] }
0x1134   :  { %v1215_v15 = vsel %vm1214_vm15, %v2751_v63, %v1211_v56  ;;  %v2609_v63 = vld [vmem:[#allocation7 + $0x14] sm:$0xf]  ;;  %v2616_v56 = vld [vmem:[#allocation9 + $0x4] sm:$0xf0] }
0x1135   :  { %v3370_v13 = vsel %vm1217_vm0, %v1219_v37, %v1215_v15  ;;  %v1230_v8 = vsel %vm1229_vm3, %v2753_v52, %v1226_v16  ;;  %v2522_v52 = vor.u32 %v2609_v63, %v2519_v26  ;;  %v3421_v38 = vor.u32 %v2616_v56, %v2549_v3  ;;  %v2511_v15 = vld [vmem:[#allocation7 + $0x8] sm:$0xf0]  ;;  %v2617_v16 = vld [vmem:[#allocation9 + $0x14] sm:$0xf] }
0x1136   :  { %v1235_v28 = vsel %vm1232_vm5, %v1234_v21, %v1230_v8  ;;  %v1239_v43 = vmul.f32 %v3370_v13, %v3345_v23  ;;  %v2514_v37 = vor.u32 %v2607_v6, %v2511_v15  ;;  %v3432_v20 = vor.u32 %v2617_v16, %v2559_v42 }
0x1137   :  { %v1240_v33 = vmul.f32 %v1235_v28, %v3350_v30  ;;  %v2533_v30 = vld [vmem:[#allocation7 + $0x30] sm:$0xf]  ;;  %1487 = vmatpush.bf16.msra.mxu2 %v3421_v38 }
0x1138   :  { %v2534_v10 = vor.u32 %v2614_v49, %v2533_v30  ;;  %1500 = vmatpush.bf16.msra.mxu3 %v3432_v20 }
0x113a   :  { %1388 = vmatpush.bf16.msrb.mxu0 %v2534_v10  ;;  %1488 = vmatmul.bf16.vlgmr.msra.gmra.mxu2 %v3012_v19 }
0x113b   :  { %1601 = vmatpush.bf16.msrb.mxu2 %v3412_v57 }
0x113f   :  { %1602 = vmatpush.bf16.msrb.mxu2 %v3421_v38 }
0x1143   :  { %1716 = vmatpush.bf16.msra.mxu2 %v3412_v57 }
0x1147   :  { %1717 = vmatpush.bf16.msra.mxu2 %v3421_v38 }
0x118c   :  { %v1244_v18 = vpop.permute.xlu0 %1243 }
0x118d   :  { %v1249_v58 = vmul.f32 %v1244_v18, %v3370_v13  ;;  %v2608_v18 = vld [vmem:[#allocation7 + $0x4] sm:$0xf0] }
0x118f   :  { %1253 = vrot.lane.b32.xlu1 %v1249_v58, %s3014_s3 }
0x1194   :  { %v1246_v4 = vpop.permute.xlu1 %1245  ;;  %v379_v29 = vpop.permute.xlu0 %378 }
0x1195   :  { %v1250_v40 = vmul.f32 %v1246_v4, %v1235_v28  ;;  %382 = vst.msk [vmem:[#allocation3] sm:$0xf] %vm381_vm4, %v379_v29  ;;  %v2615_v4 = vld [vmem:[#allocation9 + $0x4] sm:$0xf] }
0x1197   :  { %1255 = vrot.lane.b32.xlu2 %v1250_v40, %s3014_s3  ;;  %508 = vrot.lane.b32.xlu1 %v3213_v51, %s3014_s3 }
0x11f1   :  { %v1256_v44 = vpop.permute.xlu2 %1255 }
0x11f2   :  { %v1260_v34 = vadd.f32 %v1256_v44, %v1240_v33 }
0x11f4   :  { %2754 = vtanh.f32 %v1260_v34 }
0x11fa   :  { %v2755_v35 = vpop.eup %2754 }
0x11fb   :  { %1267 = vrot.lane.b32.xlu2 %v2755_v35, %s3013_s0 }
0x1201   :  { %v1254_v17 = vpop.permute.xlu1 %1253 }
0x1202   :  { %v1259_v45 = vadd.f32 %v1254_v17, %v1239_v43  ;;  %v1489_v17 = vpop.f32.mrf.mxu2 }
0x1203   :  { %1153 = vrot.lane.b32.xlu2 %v3356_v39, %s3013_s0 }
0x1204   :  { %2756 = vtanh.f32 %v1259_v45 }
0x1209   :  { %v509_v48 = vpop.permute.xlu1 %508 }
0x120a   :  { %v2757_v36 = vpop.eup %2756  ;;  %511 = vst.msk [vmem:[#allocation3 + $0x4] sm:$0xf] %vm381_vm4, %v509_v48  ;;  %v1491_v45 = vpop.f32.mrf.mxu2  ;;  %v1305_v48 = vld [vmem:[%s3661_s6] sm:$0x3] }
0x120b   :  { %636 = vrot.lane.b32.xlu2 %v3242_v60, %s3014_s3  ;;  %1265 = vrot.lane.b32.xlu1 %v2757_v36, %s3013_s0  ;;  %v3466_v36 = vperm.slane %v1305_v48, 0 }
0x1213   :  { %1025 = vrot.lane.b32.xlu2 %v3330_v24, %s3013_s0  ;;  %897 = vrot.lane.b32.xlu1 %v3304_v12, %s3013_s0  ;;  %v2535_v12 = vld [vmem:[#allocation7 + $0x38] sm:$0xf0] }
0x121b   :  { %892 = vrot.lane.b32.xlu2 %v3302_v11, %s3014_s3  ;;  %769 = vrot.lane.b32.xlu1 %v3273_v46, %s3013_s0  ;;  %v2613_v46 = vld [vmem:[#allocation7 + $0x34] sm:$0xf] }
0x121c   :  { %v2538_v39 = vor.u32 %v2613_v46, %v2535_v12 }
0x121e   :  { %1417 = vmatpush.bf16.msrb.mxu1 %v2538_v39 }
0x1223   :  { %513 = vrot.lane.b32.xlu2 %v3215_v53, %s3013_s0  ;;  %384 = vrot.lane.b32.xlu1 %v3186_v41, %s3013_s0 }
0x1255   :  { %v1268_v51 = vpop.permute.xlu2 %1267 }
0x1256   :  { %v1272_v60 = vmul.f32 %v1268_v51, %v1235_v28  ;;  %v2551_v28 = vld [vmem:[#allocation9 + $0x8] sm:$0xf0] }
0x1257   :  { %v3440_v29 = vor.u32 %v2615_v4, %v2551_v28 }
0x1258   :  { %v1274_v23 = vpack.c.bf16 %v1272_v60, %v1272_v60 }
0x1259   :  { %1501 = vmatpush.bf16.msra.mxu3 %v3440_v29 }
0x125a   :  { %1281 = vrot.lane.b32.xlu0 %v1274_v23, %s3013_s0 }
0x125c   :  { %1502 = vmatmul.bf16.vlgmr.msra.gmra.mxu3 %v3012_v19 }
0x125d   :  { %v1154_v24 = vpop.permute.xlu2 %1153  ;;  %1615 = vmatpush.bf16.msrb.mxu3 %v3432_v20 }
0x125e   :  { %1156 = vst.msk [vmem:[#allocation3 + $0x4] sm:$0xf] %vm387_vm6, %v1154_v24 }
0x1261   :  { %1616 = vmatpush.bf16.msrb.mxu3 %v3440_v29 }
0x1262   :  { %764 = vrot.lane.b32.xlu0 %v3271_v2, %s3014_s3  ;;  %v2527_v2 = vld [vmem:[#allocation7 + $0x28] sm:$0xf0] }
0x1265   :  { %v637_v11 = vpop.permute.xlu2 %636  ;;  %1730 = vmatpush.bf16.msra.mxu3 %v3432_v20 }
0x1266   :  { %639 = vst.msk [vmem:[#allocation3 + $0x8] sm:$0xf] %vm381_vm4, %v637_v11  ;;  %v1308_v11 = vperm.slane %v1305_v48, 1 }
0x1269   :  { %1731 = vmatpush.bf16.msra.mxu3 %v3440_v29 }
0x126a   :  { %641 = vrot.lane.b32.xlu0 %v3244_v62, %s3013_s0  ;;  %v2530_v62 = vor.u32 %v2611_v32, %v2527_v2 }
0x126c   :  { %1418 = vmatpush.bf16.msrb.mxu1 %v2530_v62 }
0x126d   :  { %v1026_v53 = vpop.permute.xlu2 %1025 }
0x126e   :  { %1028 = vst.msk [vmem:[#allocation3 + $0x8] sm:$0xf] %vm387_vm6, %v1026_v53 }
0x1270   :  { %1419 = vmatpush.bf16.msrb.mxu1 %v2522_v52 }
0x1272   :  { %1020 = vrot.lane.b32.xlu0 %v3328_v22, %s3014_s3  ;;  %v2526_v22 = vor.u32 %v2612_v54, %v2525_v50 }
0x1274   :  { %1389 = vmatpush.bf16.msrb.mxu0 %v2526_v22  ;;  %1420 = vmatpush.bf16.msrb.mxu1 %v2514_v37 }
0x1275   :  { %v893_v41 = vpop.permute.xlu2 %892 }
0x1278   :  { %1390 = vmatpush.bf16.msrb.mxu0 %v2518_v5  ;;  %1960 = vmatpush.bf16.msra.mxu1 %v3432_v20 }
0x127a   :  { %1148 = vrot.lane.b32.xlu0 %v3354_v9, %s3014_s3 }
0x127c   :  { %1961 = vmatpush.bf16.msra.mxu1 %v3440_v29 }
0x127d   :  { %v514_v31 = vpop.permute.xlu2 %513  ;;  %v1266_v27 = vpop.permute.xlu1 %1265 }
0x127e   :  { %516 = vst.msk [vmem:[#allocation3 + $0x18] sm:$0xf] %vm387_vm6, %v514_v31  ;;  %v1271_v7 = vmul.f32 %v1266_v27, %v3370_v13  ;;  %v2510_v13 = vor.u32 %v2608_v18, %v2509_v14 }
0x1280   :  { %v1273_v47 = vpack.c.bf16 %v1271_v7, %v1271_v7  ;;  %1391 = vmatpush.bf16.msrb.mxu0 %v2510_v13 }
0x1282   :  { %1276 = vrot.lane.b32.xlu1 %v1273_v47, %s3014_s3 }
0x1284   :  { %1946 = vmatpush.bf16.msra.mxu0 %v3412_v57 }
0x1285   :  { %v898_v59 = vpop.permute.xlu1 %897 }
0x1288   :  { %1947 = vmatpush.bf16.msra.mxu0 %v3421_v38 }
0x128d   :  { %v770_v61 = vpop.permute.xlu1 %769 }
0x128e   :  { %772 = vst.msk [vmem:[#allocation3 + $0x10] sm:$0xf] %vm387_vm6, %v770_v61 }
0x128f   :  { %895 = vst.msk [vmem:[#allocation3 + $0x10] sm:$0xf] %vm381_vm4, %v893_v41 }
0x1295   :  { %v385_v9 = vpop.permute.xlu1 %384 }
0x1296   :  { %388 = vst.msk [vmem:[#allocation3 + $0x1c] sm:$0xf] %vm387_vm6, %v385_v9 }
0x12cc   :  { %v1282_v58 = vpop.permute.xlu0 %1281 }
0x12cd   :  { %1284 = vst.msk [vmem:[#allocation3] sm:$0xf] %vm387_vm6, %v1282_v58 }
0x12d4   :  { %v765_v8 = vpop.permute.xlu0 %764  ;;  %v2603_v21 = vld [vmem:[#allocation3] sm:$0xff] }
0x12d5   :  { %767 = vst.msk [vmem:[#allocation3 + $0xc] sm:$0xf] %vm381_vm4, %v765_v8  ;;  %2539 = vmatmul.msk.bf16.vlgmr.msrb.gmra.mxu0 %vm1371_vm7, %v2603_v21  ;;  %2543 = vmatmul.msk.bf16.vlgmr.msrb.gmra.mxu1 %vm1371_vm7, %v2603_v21 }
0x12d6   :  { %900 = vst.msk [vmem:[#allocation3 + $0xc] sm:$0xf] %vm387_vm6, %v898_v59  ;;  %2176 = vmatpush.bf16.msrb.mxu0 %v3412_v57  ;;  %2190 = vmatpush.bf16.msrb.mxu1 %v3432_v20 }
0x12da   :  { %2177 = vmatpush.bf16.msrb.mxu0 %v3421_v38  ;;  %2191 = vmatpush.bf16.msrb.mxu1 %v3440_v29 }
0x12dc   :  { %v642_v40 = vpop.permute.xlu0 %641 }
0x12dd   :  { %644 = vst.msk [vmem:[#allocation3 + $0x14] sm:$0xf] %vm387_vm6, %v642_v40  ;;  %v2604_v44 = vld [vmem:[#allocation3 + $0x8] sm:$0xff] }
0x12df   :  { %v1503_v30 = vpop.f32.mrf.mxu3 }
0x12e4   :  { %v1021_v33 = vpop.permute.xlu0 %1020 }
0x12e5   :  { %1023 = vst.msk [vmem:[#allocation3 + $0x14] sm:$0xf] %vm381_vm4, %v1021_v33  ;;  %2540 = vmatmul.msk.bf16.gmra.mxu0 %vm1371_vm7, %v2604_v44  ;;  %2544 = vmatmul.msk.bf16.gmra.mxu1 %vm1371_vm7, %v2604_v44 }
0x12e7   :  { %v1505_v0 = vpop.f32.mrf.mxu3 }
0x12ec   :  { %v1149_v19 = vpop.permute.xlu0 %1148  ;;  %v2605_v35 = vld [vmem:[#allocation3 + $0x10] sm:$0xff] }
0x12ed   :  { %1151 = vst.msk [vmem:[#allocation3 + $0x18] sm:$0xf] %vm381_vm4, %v1149_v19 }
0x12f4   :  { %v1277_v34 = vpop.permute.xlu1 %1276 }
0x12f5   :  { %1279 = vst.msk [vmem:[#allocation3 + $0x1c] sm:$0xf] %vm381_vm4, %v1277_v34  ;;  %2541 = vmatmul.msk.bf16.gmra.mxu0 %vm1371_vm7, %v2605_v35  ;;  %2545 = vmatmul.msk.bf16.gmra.mxu1 %vm1371_vm7, %v2605_v35 }
0x12fc   :  { %v2606_v43 = vld [vmem:[#allocation3 + $0x18] sm:$0xff] }
0x1305   :  { %2542 = vmatmul.msk.bf16.gmra.mxu0 %vm1371_vm7, %v2606_v43  ;;  %2546 = vmatmul.msk.bf16.gmra.mxu1 %vm1371_vm7, %v2606_v43 }
0x1352   :  { %v1393_v51 = vpop.f32.mrf.mxu0  ;;  %v1422_v60 = vpop.f32.mrf.mxu1 }
0x1353   :  { %v1394_v23 = vadd.f32 %v1393_v51, %v3466_v36 }
0x1355   :  { %v1510_v24 = vadd.f32 %v1489_v17, %v1394_v23 }
0x1357   :  { %2758 = vtanh.f32 %v1510_v24  ;;  %v2563_v9 = vmul.f32 -1.442695, %v1510_v24 }
0x1359   :  { %2760 = vpow2.f32 %v2563_v9 }
0x135a   :  { %v3469_v53 = vpop.f32.mrf.mxu0  ;;  %v1424_v41 = vpop.f32.mrf.mxu1 }
0x135b   :  { %v3471_v46 = vadd.f32 %v1424_v41, %v1308_v11 }
0x135d   :  { %v2759_v12 = vpop.eup %2758 }
0x135e   :  { %1556 = vrot.lane.b32.xlu2 %v2759_v12, %s3013_s0 }
0x135f   :  { %v2761_v1 = vpop.eup %2760 }
0x1360   :  { %v1518_v56 = vadd.f32 1.0, %v2761_v1 }
0x1362   :  { %v3474_v39 = vpop.f32.mrf.mxu0  ;;  %v1427_v49 = vpop.f32.mrf.mxu1  ;;  %v1531_v18 = vand.u32 2147483648, %v1518_v56  ;;  %vm1525_vm10 = vweird.f32 %v1518_v56  ;;  %v1529_v13 = vand.u32 2147483647, %v1518_v56 }
0x1363   :  { %v3476_v32 = vadd.f32 %v1427_v49, %v1308_v11 }
0x1364   :  { %v1532_v16 = vor.u32 1.1754944e-38, %v1531_v18  ;;  %vm1530_vm12 = vcmp.eq.f32.partialorder %v1529_v13, 8.507059e+37 }
0x136a   :  { %v3478_v2 = vpop.f32.mrf.mxu0  ;;  %v1429_v10 = vpop.f32.mrf.mxu1 }
0x136b   :  { %v3480_v50 = vadd.f32 %v1429_v10, %v1308_v11 }
0x1372   :  { %v3482_v54 = vpop.f32.mrf.mxu0  ;;  %v1432_v25 = vpop.f32.mrf.mxu1 }
0x1373   :  { %v3484_v62 = vadd.f32 %v1432_v25, %v1308_v11 }
0x137a   :  { %v1405_v55 = vpop.f32.mrf.mxu0  ;;  %v1434_v22 = vpop.f32.mrf.mxu1 }
0x137b   :  { %v3487_v31 = vadd.f32 %v1405_v55, %v3466_v36  ;;  %v3489_v27 = vadd.f32 %v1434_v22, %v1308_v11 }
0x1382   :  { %v1408_v7 = vpop.f32.mrf.mxu0  ;;  %v1437_v47 = vpop.f32.mrf.mxu1 }
0x1383   :  { %v3492_v59 = vadd.f32 %v1408_v7, %v3466_v36  ;;  %v3494_v61 = vadd.f32 %v1437_v47, %v1308_v11 }
0x138a   :  { %v1439_v63 = vpop.f32.mrf.mxu1 }
0x138b   :  { %v1440_v26 = vadd.f32 %v1439_v63, %v1308_v11 }
0x138d   :  { %v1511_v52 = vadd.f32 %v1505_v0, %v1440_v26  ;;  %v1396_v26 = vadd.f32 %v3469_v53, %v3466_v36 }
0x138f   :  { %2762 = vtanh.f32 %v1511_v52  ;;  %v2564_v4 = vmul.f32 -1.442695, %v1511_v52 }
0x1390   :  { %2764 = vrcp.f32 %v1518_v56 }
0x1391   :  { %2766 = vpow2.f32 %v2564_v4 }
0x1395   :  { %v2763_v3 = vpop.eup %2762 }
0x1396   :  { %1558 = vrot.lane.b32.xlu0 %v2763_v3, %s3013_s0  ;;  %v2765_v5 = vpop.eup %2764 }
0x1397   :  { %v1521_v6 = vmul.f32 %v2765_v5, %v1518_v56  ;;  %vm1526_vm8 = vweird.f32 %v2765_v5  ;;  %v2767_v28 = vpop.eup %2766 }
0x1398   :  { %vm1527_vm11 = vmor %vm1525_vm10, %vm1526_vm8  ;;  %v1519_v40 = vadd.f32 1.0, %v2767_v28 }
0x1399   :  { %v1522_v15 = vsub.f32 1.0, %v1521_v6 }
0x139a   :  { %2768 = vrcp.f32 %v1519_v40  ;;  %v1546_v43 = vand.u32 2147483648, %v1519_v40  ;;  %vm1540_vm14 = vweird.f32 %v1519_v40  ;;  %v1544_v17 = vand.u32 2147483647, %v1519_v40 }
0x139b   :  { %v1523_v14 = vmul.f32 %v2765_v5, %v1522_v15 }
0x139c   :  { %v1547_v48 = vor.u32 1.1754944e-38, %v1546_v43  ;;  %vm1545_vm0 = vcmp.eq.f32.partialorder %v1544_v17, 8.507059e+37 }
0x139d   :  { %v1524_v37 = vadd.f32 %v2765_v5, %v1523_v14 }
0x139f   :  { %v1528_v58 = vsel %vm1527_vm11, %v2765_v5, %v1524_v37 }
0x13a0   :  { %v1533_v8 = vsel %vm1530_vm12, %v1532_v16, %v1528_v58  ;;  %v2769_v33 = vpop.eup %2768 }
0x13a1   :  { %v1536_v44 = vmul.f32 %v2769_v33, %v1519_v40  ;;  %vm1541_vm13 = vweird.f32 %v2769_v33  ;;  %v1552_v24 = vmul.f32 0.0, %v1533_v8 }
0x13a2   :  { %vm1542_vm15 = vmor %vm1540_vm14, %vm1541_vm13 }
0x13a3   :  { %v1537_v19 = vsub.f32 1.0, %v1536_v44 }
0x13a5   :  { %v1538_v34 = vmul.f32 %v2769_v33, %v1537_v19 }
0x13a7   :  { %v1539_v35 = vadd.f32 %v2769_v33, %v1538_v34 }
0x13a9   :  { %v1543_v45 = vsel %vm1542_vm15, %v2769_v33, %v1539_v35 }
0x13aa   :  { %v1548_v60 = vsel %vm1545_vm0, %v1547_v48, %v1543_v45 }
0x13ab   :  { %v1553_v30 = vmul.f32 0.0, %v1548_v60 }
0x13b8   :  { %v1557_v42 = vpop.permute.xlu2 %1556 }
0x13b9   :  { %v1562_v21 = vmul.f32 %v1557_v42, %v1533_v8 }
0x13bb   :  { %1566 = vrot.lane.b32.xlu1 %v1562_v21, %s3014_s3 }
0x1408   :  { %v1559_v51 = vpop.permute.xlu0 %1558 }
0x1409   :  { %v1563_v23 = vmul.f32 %v1559_v51, %v1548_v60 }
0x140b   :  { %1568 = vrot.lane.b32.xlu2 %v1563_v23, %s3014_s3 }
0x142d   :  { %v1567_v11 = vpop.permute.xlu1 %1566 }
0x142e   :  { %v3499_v41 = vadd.f32 %v1567_v11, %v1552_v24 }
0x1430   :  { %2770 = vtanh.f32 %v3499_v41 }
0x1436   :  { %v2771_v12 = vpop.eup %2770 }
0x1437   :  { %1578 = vrot.lane.b32.xlu0 %v2771_v12, %s3013_s0 }
0x1465   :  { %v1569_v49 = vpop.permute.xlu2 %1568 }
0x1466   :  { %v3503_v10 = vadd.f32 %v1569_v49, %v1553_v30 }
0x1468   :  { %2772 = vtanh.f32 %v3503_v10 }
0x146e   :  { %v2773_v25 = vpop.eup %2772 }
0x146f   :  { %1580 = vrot.lane.b32.xlu1 %v2773_v25, %s3013_s0 }
0x14a9   :  { %v1579_v55 = vpop.permute.xlu0 %1578 }
0x14aa   :  { %v1584_v7 = vmul.f32 %v1579_v55, %v1533_v8 }
0x14e1   :  { %v1581_v22 = vpop.permute.xlu1 %1580 }
0x14e2   :  { %v3507_v47 = vmul.f32 %v1581_v22, %v1548_v60 }
0x14e4   :  { %v1586_v9 = vpack.c.bf16 %v3507_v47, %v1584_v7 }
0x14e6   :  { %1590 = vrot.lane.b32.xlu2 %v1586_v9, %s3014_s3 }
0x1540   :  { %v1591_v63 = vpop.permute.xlu2 %1590 }
0x1541   :  { %2565 = vmatmul.msk.bf16.vlgmr.msrb.gmra.mxu2 %vm261_vm9, %v1591_v63  ;;  %2566 = vmatmul.msk.bf16.vlgmr.msrb.gmra.mxu3 %vm261_vm9, %v1591_v63 }
0x1542   :  { %1845 = vmatpush.bf16.msrb.mxu3 %v3432_v20  ;;  %1831 = vmatpush.bf16.msrb.mxu2 %v3412_v57 }
0x1546   :  { %1846 = vmatpush.bf16.msrb.mxu3 %v3440_v29  ;;  %1832 = vmatpush.bf16.msrb.mxu2 %v3421_v38 }
0x15c4   :  { %v1604_v0 = vpop.f32.mrf.mxu2  ;;  %v1618_v52 = vpop.f32.mrf.mxu3 }
0x15c5   :  { %v1625_v1 = vadd.f32 %v1604_v0, %v1396_v26 }
0x15c7   :  { %2774 = vtanh.f32 %v1625_v1  ;;  %v2567_v14 = vmul.f32 -1.442695, %v1625_v1 }
0x15cc   :  { %v1606_v3 = vpop.f32.mrf.mxu2  ;;  %v1620_v56 = vpop.f32.mrf.mxu3 }
0x15cd   :  { %v2775_v5 = vpop.eup %2774  ;;  %v1626_v6 = vadd.f32 %v1620_v56, %v3494_v61 }
0x15ce   :  { %1671 = vrot.lane.b32.xlu0 %v2775_v5, %s3013_s0 }
0x15cf   :  { %2776 = vtanh.f32 %v1626_v6  ;;  %v2568_v37 = vmul.f32 -1.442695, %v1626_v6 }
0x15d0   :  { %2778 = vpow2.f32 %v2567_v14 }
0x15d1   :  { %2780 = vpow2.f32 %v2568_v37 }
0x15d5   :  { %v2777_v15 = vpop.eup %2776 }
0x15d6   :  { %1673 = vrot.lane.b32.xlu1 %v2777_v15, %s3013_s0  ;;  %v2779_v18 = vpop.eup %2778 }
0x15d7   :  { %v1633_v53 = vadd.f32 1.0, %v2779_v18  ;;  %v2781_v13 = vpop.eup %2780 }
0x15d8   :  { %v1634_v58 = vadd.f32 1.0, %v2781_v13 }
0x15d9   :  { %2782 = vrcp.f32 %v1633_v53  ;;  %v1646_v33 = vand.u32 2147483648, %v1633_v53  ;;  %vm1640_vm2 = vweird.f32 %v1633_v53  ;;  %v1644_v44 = vand.u32 2147483647, %v1633_v53 }
0x15da   :  { %2784 = vrcp.f32 %v1634_v58  ;;  %v1661_v51 = vand.u32 2147483648, %v1634_v58  ;;  %vm1655_vm6 = vweird.f32 %v1634_v58  ;;  %v1659_v60 = vand.u32 2147483647, %v1634_v58 }
0x15db   :  { %v1647_v35 = vor.u32 1.1754944e-38, %v1646_v33  ;;  %vm1645_vm4 = vcmp.eq.f32.partialorder %v1644_v44, 8.507059e+37 }
0x15dc   :  { %v1662_v24 = vor.u32 1.1754944e-38, %v1661_v51  ;;  %vm1660_vm10 = vcmp.eq.f32.partialorder %v1659_v60, 8.507059e+37 }
0x15df   :  { %v2783_v16 = vpop.eup %2782 }
0x15e0   :  { %v1636_v42 = vmul.f32 %v2783_v16, %v1633_v53  ;;  %v2785_v61 = vpop.eup %2784  ;;  %vm1641_vm1 = vweird.f32 %v2783_v16 }
0x15e1   :  { %v1651_v4 = vmul.f32 %v2785_v61, %v1634_v58  ;;  %vm1642_vm3 = vmor %vm1640_vm2, %vm1641_vm1  ;;  %vm1656_vm5 = vweird.f32 %v2785_v61 }
0x15e2   :  { %v1637_v8 = vsub.f32 1.0, %v1636_v42  ;;  %vm1657_vm8 = vmor %vm1655_vm6, %vm1656_vm5 }
0x15e3   :  { %v1652_v40 = vsub.f32 1.0, %v1651_v4 }
0x15e4   :  { %v1638_v21 = vmul.f32 %v2783_v16, %v1637_v8 }
0x15e5   :  { %v1653_v34 = vmul.f32 %v2785_v61, %v1652_v40 }
0x15e6   :  { %v1639_v28 = vadd.f32 %v2783_v16, %v1638_v21 }
0x15e7   :  { %v1654_v48 = vadd.f32 %v2785_v61, %v1653_v34 }
0x15e8   :  { %v1643_v19 = vsel %vm1642_vm3, %v2783_v16, %v1639_v28 }
0x15e9   :  { %v1648_v17 = vsel %vm1645_vm4, %v1647_v35, %v1643_v19  ;;  %v1658_v23 = vsel %vm1657_vm8, %v2785_v61, %v1654_v48 }
0x15ea   :  { %v1663_v12 = vsel %vm1660_vm10, %v1662_v24, %v1658_v23  ;;  %v1667_v49 = vmul.f32 %v1648_v17, %v3499_v41 }
0x15eb   :  { %v1668_v7 = vmul.f32 %v1663_v12, %v3503_v10  ;;  %v1399_v10 = vadd.f32 %v3474_v39, %v3466_v36 }
0x1640   :  { %v1672_v43 = vpop.permute.xlu0 %1671 }
0x1641   :  { %v1677_v45 = vmul.f32 %v1672_v43, %v1648_v17 }
0x1643   :  { %1681 = vrot.lane.b32.xlu2 %v1677_v45, %s3014_s3 }
0x1648   :  { %v1674_v11 = vpop.permute.xlu1 %1673 }
0x1649   :  { %v1678_v30 = vmul.f32 %v1674_v11, %v1663_v12 }
0x164b   :  { %1683 = vrot.lane.b32.xlu0 %v1678_v30, %s3014_s3 }
0x169d   :  { %v1682_v25 = vpop.permute.xlu2 %1681 }
0x169e   :  { %v3525_v55 = vadd.f32 %v1682_v25, %v1667_v49 }
0x16a0   :  { %2786 = vtanh.f32 %v3525_v55 }
0x16a6   :  { %v2787_v22 = vpop.eup %2786 }
0x16a7   :  { %1693 = vrot.lane.b32.xlu1 %v2787_v22, %s3013_s0 }
0x16bd   :  { %v1684_v9 = vpop.permute.xlu0 %1683 }
0x16be   :  { %v3530_v63 = vadd.f32 %v1684_v9, %v1668_v7 }
0x16c0   :  { %2788 = vtanh.f32 %v3530_v63 }
0x16c6   :  { %v2789_v26 = vpop.eup %2788 }
0x16c7   :  { %1695 = vrot.lane.b32.xlu2 %v2789_v26, %s3013_s0 }
0x1719   :  { %v1694_v0 = vpop.permute.xlu1 %1693 }
0x171a   :  { %v1699_v52 = vmul.f32 %v1694_v0, %v1648_v17 }
0x1721   :  { %v1696_v41 = vpop.permute.xlu2 %1695 }
0x1722   :  { %v1700_v1 = vmul.f32 %v1696_v41, %v1663_v12 }
0x1724   :  { %v1701_v3 = vpack.c.bf16 %v1700_v1, %v1699_v52 }
0x1726   :  { %1705 = vrot.lane.b32.xlu0 %v1701_v3, %s3014_s3 }
0x1798   :  { %v1706_v56 = vpop.permute.xlu0 %1705 }
0x1799   :  { %2569 = vmatmul.msk.bf16.vlgmr.msra.gmra.mxu2 %vm261_vm9, %v1706_v56  ;;  %2570 = vmatmul.msk.bf16.vlgmr.msra.gmra.mxu3 %vm261_vm9, %v1706_v56 }
0x179a   :  { %2075 = vmatpush.bf16.msra.mxu3 %v3432_v20  ;;  %2061 = vmatpush.bf16.msra.mxu2 %v3412_v57 }
0x179e   :  { %2076 = vmatpush.bf16.msra.mxu3 %v3440_v29  ;;  %2062 = vmatpush.bf16.msra.mxu2 %v3421_v38 }
0x181c   :  { %v1719_v5 = vpop.f32.mrf.mxu2  ;;  %v1733_v6 = vpop.f32.mrf.mxu3 }
0x181d   :  { %v1740_v15 = vadd.f32 %v1719_v5, %v1399_v10 }
0x181f   :  { %2790 = vtanh.f32 %v1740_v15  ;;  %v2571_v39 = vmul.f32 -1.442695, %v1740_v15 }
0x1824   :  { %v1721_v14 = vpop.f32.mrf.mxu2  ;;  %v1735_v37 = vpop.f32.mrf.mxu3 }
0x1825   :  { %v2791_v18 = vpop.eup %2790  ;;  %v1741_v53 = vadd.f32 %v1735_v37, %v3489_v27 }
0x1826   :  { %1786 = vrot.lane.b32.xlu1 %v2791_v18, %s3013_s0 }
0x1827   :  { %2792 = vtanh.f32 %v1741_v53  ;;  %v2572_v58 = vmul.f32 -1.442695, %v1741_v53 }
0x1829   :  { %2794 = vpow2.f32 %v2572_v58 }
0x182d   :  { %v2793_v13 = vpop.eup %2792 }
0x182e   :  { %1788 = vrot.lane.b32.xlu2 %v2793_v13, %s3013_s0 }
0x182f   :  { %v2795_v16 = vpop.eup %2794 }
0x1830   :  { %v1749_v42 = vadd.f32 1.0, %v2795_v16 }
0x1832   :  { %2796 = vrcp.f32 %v1749_v42  ;;  %v1776_v44 = vand.u32 2147483648, %v1749_v42  ;;  %vm1770_vm12 = vweird.f32 %v1749_v42  ;;  %v1774_v19 = vand.u32 2147483647, %v1749_v42 }
0x1833   :  { %2798 = vpow2.f32 %v2571_v39 }
0x1834   :  { %v1777_v43 = vor.u32 1.1754944e-38, %v1776_v44  ;;  %vm1775_vm14 = vcmp.eq.f32.partialorder %v1774_v19, 8.507059e+37 }
0x1838   :  { %v2797_v8 = vpop.eup %2796 }
0x1839   :  { %v2799_v61 = vpop.eup %2798  ;;  %v1766_v21 = vmul.f32 %v2797_v8, %v1749_v42  ;;  %vm1771_vm11 = vweird.f32 %v2797_v8 }
0x183a   :  { %v1748_v4 = vadd.f32 1.0, %v2799_v61  ;;  %vm1772_vm13 = vmor %vm1770_vm12, %vm1771_vm11 }
0x183b   :  { %v1767_v28 = vsub.f32 1.0, %v1766_v21 }
0x183c   :  { %2800 = vrcp.f32 %v1748_v4  ;;  %v1761_v24 = vand.u32 2147483648, %v1748_v4  ;;  %vm1755_vm0 = vweird.f32 %v1748_v4  ;;  %v1759_v11 = vand.u32 2147483647, %v1748_v4 }
0x183d   :  { %v1768_v27 = vmul.f32 %v2797_v8, %v1767_v28 }
0x183e   :  { %v1762_v30 = vor.u32 1.1754944e-38, %v1761_v24  ;;  %vm1760_vm2 = vcmp.eq.f32.partialorder %v1759_v11, 8.507059e+37 }
0x183f   :  { %v1769_v40 = vadd.f32 %v2797_v8, %v1768_v27 }
0x1841   :  { %v1773_v34 = vsel %vm1772_vm13, %v2797_v8, %v1769_v40 }
0x1842   :  { %v2801_v33 = vpop.eup %2800  ;;  %v1778_v45 = vsel %vm1775_vm14, %v1777_v43, %v1773_v34 }
0x1843   :  { %v1751_v35 = vmul.f32 %v2801_v33, %v1748_v4  ;;  %vm1756_vm15 = vweird.f32 %v2801_v33  ;;  %v1783_v7 = vmul.f32 %v1778_v45, %v3530_v63 }
0x1844   :  { %vm1757_vm1 = vmor %vm1755_vm0, %vm1756_vm15 }
0x1845   :  { %v1752_v51 = vsub.f32 1.0, %v1751_v35 }
0x1847   :  { %v1753_v60 = vmul.f32 %v2801_v33, %v1752_v51 }
0x1849   :  { %v1754_v23 = vadd.f32 %v2801_v33, %v1753_v60 }
0x184b   :  { %v1758_v12 = vsel %vm1757_vm1, %v2801_v33, %v1754_v23 }
0x184c   :  { %v1763_v25 = vsel %vm1760_vm2, %v1762_v30, %v1758_v12 }
0x184d   :  { %v1782_v41 = vmul.f32 %v1763_v25, %v3525_v55  ;;  %v1401_v55 = vadd.f32 %v3478_v2, %v3466_v36 }
0x1888   :  { %v1789_v17 = vpop.permute.xlu2 %1788 }
0x1889   :  { %v1793_v48 = vmul.f32 %v1789_v17, %v1778_v45 }
0x188b   :  { %1798 = vrot.lane.b32.xlu1 %v1793_v48, %s3014_s3 }
0x1898   :  { %v1787_v49 = vpop.permute.xlu1 %1786 }
0x1899   :  { %v1792_v22 = vmul.f32 %v1787_v49, %v1763_v25 }
0x189b   :  { %1796 = vrot.lane.b32.xlu0 %v1792_v22, %s3014_s3 }
0x18fd   :  { %v1799_v9 = vpop.permute.xlu1 %1798 }
0x18fe   :  { %v3549_v26 = vadd.f32 %v1799_v9, %v1783_v7 }
0x1900   :  { %2802 = vtanh.f32 %v3549_v26 }
0x1906   :  { %v2803_v0 = vpop.eup %2802 }
0x1907   :  { %1810 = vrot.lane.b32.xlu0 %v2803_v0, %s3013_s0 }
0x190d   :  { %v1797_v52 = vpop.permute.xlu0 %1796 }
0x190e   :  { %v3554_v1 = vadd.f32 %v1797_v52, %v1782_v41 }
0x1910   :  { %2804 = vtanh.f32 %v3554_v1 }
0x1916   :  { %v2805_v3 = vpop.eup %2804 }
0x1917   :  { %1808 = vrot.lane.b32.xlu2 %v2805_v3, %s3013_s0 }
0x1971   :  { %v1809_v56 = vpop.permute.xlu2 %1808 }
0x1972   :  { %v1814_v10 = vmul.f32 %v1809_v56, %v1763_v25 }
0x1979   :  { %v1811_v63 = vpop.permute.xlu0 %1810 }
0x197a   :  { %v1815_v5 = vmul.f32 %v1811_v63, %v1778_v45 }
0x197c   :  { %v1816_v6 = vpack.c.bf16 %v1815_v5, %v1814_v10 }
0x197e   :  { %1820 = vrot.lane.b32.xlu1 %v1816_v6, %s3014_s3  ;;  %v1404_v6 = vadd.f32 %v3482_v54, %v3466_v36 }
0x19f0   :  { %v1821_v15 = vpop.permute.xlu1 %1820 }
0x19f1   :  { %2573 = vmatmul.msk.bf16.vlgmr.msrb.gmra.mxu2 %vm261_vm9, %v1821_v15  ;;  %2574 = vmatmul.msk.bf16.vlgmr.msrb.gmra.mxu3 %vm261_vm9, %v1821_v15 }
0x19f2   :  { %2290 = vmatpush.bf16.msrb.mxu2 %v3412_v57  ;;  %2303 = vmatpush.bf16.msrb.mxu3 %v3432_v20 }
0x19f6   :  { %2291 = vmatpush.bf16.msrb.mxu2 %v3421_v38  ;;  %2304 = vmatpush.bf16.msrb.mxu3 %v3440_v29 }
0x1a74   :  { %v1834_v14 = vpop.f32.mrf.mxu2  ;;  %v1848_v37 = vpop.f32.mrf.mxu3 }
0x1a75   :  { %v1855_v18 = vadd.f32 %v1834_v14, %v1401_v55 }
0x1a77   :  { %2806 = vtanh.f32 %v1855_v18  ;;  %v2575_v38 = vmul.f32 -1.442695, %v1855_v18 }
0x1a7c   :  { %v1836_v53 = vpop.f32.mrf.mxu2  ;;  %v1850_v13 = vpop.f32.mrf.mxu3 }
0x1a7d   :  { %v2807_v58 = vpop.eup %2806  ;;  %v1856_v16 = vadd.f32 %v1850_v13, %v3484_v62 }
0x1a7e   :  { %1901 = vrot.lane.b32.xlu2 %v2807_v58, %s3013_s0 }
0x1a7f   :  { %2808 = vtanh.f32 %v1856_v16  ;;  %v2576_v8 = vmul.f32 -1.442695, %v1856_v16 }
0x1a80   :  { %2810 = vpow2.f32 %v2575_v38 }
0x1a85   :  { %v2809_v57 = vpop.eup %2808 }
0x1a86   :  { %1903 = vrot.lane.b32.xlu0 %v2809_v57, %s3013_s0  ;;  %v2811_v20 = vpop.eup %2810 }
0x1a87   :  { %v1863_v29 = vadd.f32 1.0, %v2811_v20 }
0x1a89   :  { %2812 = vrcp.f32 %v1863_v29  ;;  %v1876_v62 = vand.u32 2147483648, %v1863_v29  ;;  %vm1870_vm4 = vweird.f32 %v1863_v29  ;;  %v1874_v4 = vand.u32 2147483647, %v1863_v29 }
0x1a8a   :  { %2814 = vpow2.f32 %v2576_v8 }
0x1a8b   :  { %v1877_v40 = vor.u32 1.1754944e-38, %v1876_v62  ;;  %vm1875_vm6 = vcmp.eq.f32.partialorder %v1874_v4, 8.507059e+37 }
0x1a8f   :  { %v2813_v2 = vpop.eup %2812 }
0x1a90   :  { %v1866_v42 = vmul.f32 %v2813_v2, %v1863_v29  ;;  %vm1871_vm3 = vweird.f32 %v2813_v2  ;;  %v2815_v28 = vpop.eup %2814 }
0x1a91   :  { %vm1872_vm5 = vmor %vm1870_vm4, %vm1871_vm3  ;;  %v1864_v33 = vadd.f32 1.0, %v2815_v28 }
0x1a92   :  { %v1867_v39 = vsub.f32 1.0, %v1866_v42 }
0x1a93   :  { %2816 = vrcp.f32 %v1864_v33  ;;  %v1891_v51 = vand.u32 2147483648, %v1864_v33  ;;  %vm1885_vm10 = vweird.f32 %v1864_v33  ;;  %v1889_v60 = vand.u32 2147483647, %v1864_v33 }
0x1a94   :  { %v1868_v61 = vmul.f32 %v2813_v2, %v1867_v39 }
0x1a95   :  { %v1892_v24 = vor.u32 1.1754944e-38, %v1891_v51  ;;  %vm1890_vm12 = vcmp.eq.f32.partialorder %v1889_v60, 8.507059e+37 }
0x1a96   :  { %v1869_v21 = vadd.f32 %v2813_v2, %v1868_v61 }
0x1a98   :  { %v1873_v27 = vsel %vm1872_vm5, %v2813_v2, %v1869_v21 }
0x1a99   :  { %v1878_v19 = vsel %vm1875_vm6, %v1877_v40, %v1873_v27  ;;  %v2817_v35 = vpop.eup %2816 }
0x1a9a   :  { %v1881_v43 = vmul.f32 %v2817_v35, %v1864_v33  ;;  %vm1886_vm8 = vweird.f32 %v2817_v35  ;;  %v1897_v49 = vmul.f32 %v1878_v19, %v3554_v1 }
0x1a9b   :  { %vm1887_vm11 = vmor %vm1885_vm10, %vm1886_vm8 }
0x1a9c   :  { %v1882_v17 = vsub.f32 1.0, %v1881_v43 }
0x1a9e   :  { %v1883_v45 = vmul.f32 %v2817_v35, %v1882_v17 }
0x1aa0   :  { %v1884_v48 = vadd.f32 %v2817_v35, %v1883_v45 }
0x1aa2   :  { %v1888_v23 = vsel %vm1887_vm11, %v2817_v35, %v1884_v48 }
0x1aa3   :  { %v1893_v12 = vsel %vm1890_vm12, %v1892_v24, %v1888_v23 }
0x1aa4   :  { %v1898_v7 = vmul.f32 %v1893_v12, %v3549_v26  ;;  %v3585_v26 = vpop.f32.mrf.mxu0 }
0x1ad8   :  { %v1902_v44 = vpop.permute.xlu2 %1901 }
0x1ad9   :  { %v1907_v34 = vmul.f32 %v1902_v44, %v1878_v19 }
0x1adb   :  { %1911 = vrot.lane.b32.xlu1 %v1907_v34, %s3014_s3 }
0x1af8   :  { %v1904_v11 = vpop.permute.xlu0 %1903 }
0x1af9   :  { %v1908_v30 = vmul.f32 %v1904_v11, %v1893_v12 }
0x1afb   :  { %1913 = vrot.lane.b32.xlu2 %v1908_v30, %s3014_s3 }
0x1b4d   :  { %v1912_v25 = vpop.permute.xlu1 %1911 }
0x1b4e   :  { %v3573_v22 = vadd.f32 %v1912_v25, %v1897_v49 }
0x1b50   :  { %2818 = vtanh.f32 %v3573_v22 }
0x1b55   :  { %v1914_v9 = vpop.permute.xlu2 %1913 }
0x1b56   :  { %v2819_v0 = vpop.eup %2818  ;;  %v3577_v41 = vadd.f32 %v1914_v9, %v1898_v7 }
0x1b57   :  { %1923 = vrot.lane.b32.xlu0 %v2819_v0, %s3013_s0 }
0x1b58   :  { %2820 = vtanh.f32 %v3577_v41 }
0x1b5e   :  { %v2821_v52 = vpop.eup %2820 }
0x1b5f   :  { %1925 = vrot.lane.b32.xlu1 %v2821_v52, %s3013_s0 }
0x1bc9   :  { %v1924_v3 = vpop.permute.xlu0 %1923 }
0x1bca   :  { %v1929_v56 = vmul.f32 %v1924_v3, %v1878_v19 }
0x1bd1   :  { %v1926_v1 = vpop.permute.xlu1 %1925 }
0x1bd2   :  { %v1930_v63 = vmul.f32 %v1926_v1, %v1893_v12 }
0x1bd4   :  { %v1931_v10 = vpack.c.bf16 %v1930_v63, %v1929_v56 }
0x1bd6   :  { %1935 = vrot.lane.b32.xlu2 %v1931_v10, %s3014_s3 }
0x1c30   :  { %v1936_v5 = vpop.permute.xlu2 %1935 }
0x1c31   :  { %2577 = vmatmul.msk.bf16.vlgmr.msra.gmra.mxu0 %vm261_vm9, %v1936_v5  ;;  %2578 = vmatmul.msk.bf16.vlgmr.msra.gmra.mxu1 %vm261_vm9, %v1936_v5 }
0x1cae   :  { %v1949_v15 = vpop.f32.mrf.mxu0  ;;  %v1963_v55 = vpop.f32.mrf.mxu1 }
0x1caf   :  { %v1970_v14 = vadd.f32 %v1949_v15, %v1404_v6 }
0x1cb1   :  { %2822 = vtanh.f32 %v1970_v14  ;;  %v2579_v16 = vmul.f32 -1.442695, %v1970_v14 }
0x1cb6   :  { %v1951_v37 = vpop.f32.mrf.mxu0  ;;  %v1965_v18 = vpop.f32.mrf.mxu1 }
0x1cb7   :  { %v2823_v53 = vpop.eup %2822  ;;  %v1971_v13 = vadd.f32 %v1965_v18, %v3480_v50 }
0x1cb8   :  { %2016 = vrot.lane.b32.xlu0 %v2823_v53, %s3013_s0 }
0x1cb9   :  { %2824 = vtanh.f32 %v1971_v13  ;;  %v2580_v57 = vmul.f32 -1.442695, %v1971_v13 }
0x1cba   :  { %2826 = vpow2.f32 %v2579_v16 }
0x1cbb   :  { %2828 = vpow2.f32 %v2580_v57 }
0x1cbf   :  { %v2825_v58 = vpop.eup %2824 }
0x1cc0   :  { %2018 = vrot.lane.b32.xlu1 %v2825_v58, %s3013_s0  ;;  %v2827_v38 = vpop.eup %2826 }
0x1cc1   :  { %v1978_v54 = vadd.f32 1.0, %v2827_v38  ;;  %v2829_v20 = vpop.eup %2828 }
0x1cc2   :  { %v1979_v29 = vadd.f32 1.0, %v2829_v20 }
0x1cc3   :  { %2830 = vrcp.f32 %v1978_v54  ;;  %v1991_v4 = vand.u32 2147483648, %v1978_v54  ;;  %vm1985_vm14 = vweird.f32 %v1978_v54  ;;  %v1989_v28 = vand.u32 2147483647, %v1978_v54 }
0x1cc4   :  { %2832 = vrcp.f32 %v1979_v29  ;;  %v2006_v43 = vand.u32 2147483648, %v1979_v29  ;;  %vm2000_vm2 = vweird.f32 %v1979_v29  ;;  %v2004_v17 = vand.u32 2147483647, %v1979_v29 }
0x1cc5   :  { %v1992_v33 = vor.u32 1.1754944e-38, %v1991_v4  ;;  %vm1990_vm0 = vcmp.eq.f32.partialorder %v1989_v28, 8.507059e+37 }
0x1cc6   :  { %v2007_v48 = vor.u32 1.1754944e-38, %v2006_v43  ;;  %vm2005_vm4 = vcmp.eq.f32.partialorder %v2004_v17, 8.507059e+37 }
0x1cc9   :  { %v2831_v2 = vpop.eup %2830 }
0x1cca   :  { %v1981_v42 = vmul.f32 %v2831_v2, %v1978_v54  ;;  %v2833_v50 = vpop.eup %2832  ;;  %vm1986_vm13 = vweird.f32 %v2831_v2 }
0x1ccb   :  { %v1996_v61 = vmul.f32 %v2833_v50, %v1979_v29  ;;  %vm1987_vm15 = vmor %vm1985_vm14, %vm1986_vm13  ;;  %vm2001_vm1 = vweird.f32 %v2833_v50 }
0x1ccc   :  { %v1982_v39 = vsub.f32 1.0, %v1981_v42  ;;  %vm2002_vm3 = vmor %vm2000_vm2, %vm2001_vm1 }
0x1ccd   :  { %v1997_v62 = vsub.f32 1.0, %v1996_v61 }
0x1cce   :  { %v1983_v8 = vmul.f32 %v2831_v2, %v1982_v39 }
0x1ccf   :  { %v1998_v40 = vmul.f32 %v2833_v50, %v1997_v62 }
0x1cd0   :  { %v1984_v21 = vadd.f32 %v2831_v2, %v1983_v8 }
0x1cd1   :  { %v1999_v35 = vadd.f32 %v2833_v50, %v1998_v40 }
0x1cd2   :  { %v1988_v27 = vsel %vm1987_vm15, %v2831_v2, %v1984_v21 }
0x1cd3   :  { %v1993_v19 = vsel %vm1990_vm0, %v1992_v33, %v1988_v27  ;;  %v2003_v45 = vsel %vm2002_vm3, %v2833_v50, %v1999_v35 }
0x1cd4   :  { %v2008_v60 = vsel %vm2005_vm4, %v2007_v48, %v2003_v45  ;;  %v2012_v24 = vmul.f32 %v1993_v19, %v3573_v22 }
0x1cd5   :  { %v2013_v49 = vmul.f32 %v2008_v60, %v3577_v41 }
0x1d2a   :  { %v2017_v44 = vpop.permute.xlu0 %2016 }
0x1d2b   :  { %v2022_v34 = vmul.f32 %v2017_v44, %v1993_v19 }
0x1d2d   :  { %2026 = vrot.lane.b32.xlu2 %v2022_v34, %s3014_s3 }
0x1d32   :  { %v2019_v51 = vpop.permute.xlu1 %2018 }
0x1d33   :  { %v2023_v23 = vmul.f32 %v2019_v51, %v2008_v60 }
0x1d35   :  { %2028 = vrot.lane.b32.xlu0 %v2023_v23, %s3014_s3 }
0x1d87   :  { %v2027_v11 = vpop.permute.xlu2 %2026 }
0x1d88   :  { %v3595_v12 = vadd.f32 %v2027_v11, %v2012_v24 }
0x1d8a   :  { %2834 = vtanh.f32 %v3595_v12 }
0x1d90   :  { %v2835_v30 = vpop.eup %2834 }
0x1d91   :  { %2038 = vrot.lane.b32.xlu1 %v2835_v30, %s3013_s0 }
0x1da7   :  { %v2029_v25 = vpop.permute.xlu0 %2028 }
0x1da8   :  { %v3600_v7 = vadd.f32 %v2029_v25, %v2013_v49 }
0x1daa   :  { %2836 = vtanh.f32 %v3600_v7 }
0x1db0   :  { %v2837_v9 = vpop.eup %2836 }
0x1db1   :  { %2040 = vrot.lane.b32.xlu2 %v2837_v9, %s3013_s0 }
0x1e03   :  { %v2039_v0 = vpop.permute.xlu1 %2038 }
0x1e04   :  { %v2044_v52 = vmul.f32 %v2039_v0, %v1993_v19 }
0x1e0b   :  { %v2041_v22 = vpop.permute.xlu2 %2040 }
0x1e0c   :  { %v2045_v3 = vmul.f32 %v2041_v22, %v2008_v60 }
0x1e0e   :  { %v2046_v1 = vpack.c.bf16 %v2045_v3, %v2044_v52 }
0x1e10   :  { %2050 = vrot.lane.b32.xlu0 %v2046_v1, %s3014_s3 }
0x1e82   :  { %v2051_v56 = vpop.permute.xlu0 %2050 }
0x1e83   :  { %2581 = vmatmul.msk.bf16.vlgmr.msra.gmra.mxu2 %vm261_vm9, %v2051_v56  ;;  %2582 = vmatmul.msk.bf16.vlgmr.msra.gmra.mxu3 %vm261_vm9, %v2051_v56 }
0x1f06   :  { %v2064_v41 = vpop.f32.mrf.mxu2  ;;  %v2078_v63 = vpop.f32.mrf.mxu3 }
0x1f07   :  { %v2085_v10 = vadd.f32 %v2064_v41, %v3487_v31 }
0x1f09   :  { %2838 = vtanh.f32 %v2085_v10  ;;  %v2583_v13 = vmul.f32 -1.442695, %v2085_v10 }
0x1f0e   :  { %v2066_v5 = vpop.f32.mrf.mxu2  ;;  %v2080_v6 = vpop.f32.mrf.mxu3 }
0x1f0f   :  { %v2839_v15 = vpop.eup %2838  ;;  %v2086_v55 = vadd.f32 %v2080_v6, %v3476_v32 }
0x1f10   :  { %2131 = vrot.lane.b32.xlu1 %v2839_v15, %s3013_s0 }
0x1f11   :  { %2840 = vtanh.f32 %v2086_v55  ;;  %v2584_v37 = vmul.f32 -1.442695, %v2086_v55 }
0x1f13   :  { %2842 = vpow2.f32 %v2584_v37 }
0x1f17   :  { %v2841_v14 = vpop.eup %2840 }
0x1f18   :  { %2133 = vrot.lane.b32.xlu2 %v2841_v14, %s3013_s0 }
0x1f19   :  { %v2843_v18 = vpop.eup %2842 }
0x1f1a   :  { %v2094_v53 = vadd.f32 1.0, %v2843_v18 }
0x1f1c   :  { %2844 = vrcp.f32 %v2094_v53  ;;  %v2121_v29 = vand.u32 2147483648, %v2094_v53  ;;  %vm2115_vm6 = vweird.f32 %v2094_v53  ;;  %v2119_v2 = vand.u32 2147483647, %v2094_v53 }
0x1f1d   :  { %2846 = vpow2.f32 %v2583_v13 }
0x1f1e   :  { %v2122_v50 = vor.u32 1.1754944e-38, %v2121_v29  ;;  %vm2120_vm10 = vcmp.eq.f32.partialorder %v2119_v2, 8.507059e+37 }
0x1f22   :  { %v2845_v31 = vpop.eup %2844 }
0x1f23   :  { %v2847_v58 = vpop.eup %2846  ;;  %v2111_v16 = vmul.f32 %v2845_v31, %v2094_v53  ;;  %vm2116_vm5 = vweird.f32 %v2845_v31 }
0x1f24   :  { %v2093_v57 = vadd.f32 1.0, %v2847_v58  ;;  %vm2117_vm8 = vmor %vm2115_vm6, %vm2116_vm5 }
0x1f25   :  { %v2112_v38 = vsub.f32 1.0, %v2111_v16 }
0x1f26   :  { %2848 = vrcp.f32 %v2093_v57  ;;  %v2106_v27 = vand.u32 2147483648, %v2093_v57  ;;  %vm2100_vm12 = vweird.f32 %v2093_v57  ;;  %v2104_v40 = vand.u32 2147483647, %v2093_v57 }
0x1f27   :  { %v2113_v32 = vmul.f32 %v2845_v31, %v2112_v38 }
0x1f28   :  { %v2107_v44 = vor.u32 1.1754944e-38, %v2106_v27  ;;  %vm2105_vm14 = vcmp.eq.f32.partialorder %v2104_v40, 8.507059e+37 }
0x1f29   :  { %v2114_v54 = vadd.f32 %v2845_v31, %v2113_v32 }
0x1f2b   :  { %v2118_v42 = vsel %vm2117_vm8, %v2845_v31, %v2114_v54 }
0x1f2c   :  { %v2849_v20 = vpop.eup %2848  ;;  %v2123_v61 = vsel %vm2120_vm10, %v2122_v50, %v2118_v42 }
0x1f2d   :  { %v2096_v39 = vmul.f32 %v2849_v20, %v2093_v57  ;;  %vm2101_vm11 = vweird.f32 %v2849_v20  ;;  %v2128_v43 = vmul.f32 %v2123_v61, %v3600_v7 }
0x1f2e   :  { %vm2102_vm13 = vmor %vm2100_vm12, %vm2101_vm11 }
0x1f2f   :  { %v2097_v62 = vsub.f32 1.0, %v2096_v39 }
0x1f31   :  { %v2098_v4 = vmul.f32 %v2849_v20, %v2097_v62 }
0x1f33   :  { %v2099_v28 = vadd.f32 %v2849_v20, %v2098_v4 }
0x1f35   :  { %v2103_v33 = vsel %vm2102_vm13, %v2849_v20, %v2099_v28 }
0x1f36   :  { %v2108_v34 = vsel %vm2105_vm14, %v2107_v44, %v2103_v33 }
0x1f37   :  { %v2127_v51 = vmul.f32 %v2108_v34, %v3595_v12 }
0x1f72   :  { %v2134_v8 = vpop.permute.xlu2 %2133 }
0x1f73   :  { %v2138_v21 = vmul.f32 %v2134_v8, %v2123_v61 }
0x1f75   :  { %2143 = vrot.lane.b32.xlu1 %v2138_v21, %s3014_s3 }
0x1f82   :  { %v2132_v19 = vpop.permute.xlu1 %2131 }
0x1f83   :  { %v2137_v35 = vmul.f32 %v2132_v19, %v2108_v34 }
0x1f85   :  { %2141 = vrot.lane.b32.xlu0 %v2137_v35, %s3014_s3 }
0x1fe7   :  { %v2144_v17 = vpop.permute.xlu1 %2143 }
0x1fe8   :  { %v3614_v45 = vadd.f32 %v2144_v17, %v2128_v43 }
0x1fea   :  { %2850 = vtanh.f32 %v3614_v45 }
0x1ff0   :  { %v2851_v48 = vpop.eup %2850 }
0x1ff1   :  { %2155 = vrot.lane.b32.xlu0 %v2851_v48, %s3013_s0 }
0x1ff7   :  { %v2142_v60 = vpop.permute.xlu0 %2141 }
0x1ff8   :  { %v3619_v23 = vadd.f32 %v2142_v60, %v2127_v51 }
0x1ffa   :  { %2852 = vtanh.f32 %v3619_v23 }
0x2000   :  { %v2853_v24 = vpop.eup %2852 }
0x2001   :  { %2153 = vrot.lane.b32.xlu2 %v2853_v24, %s3013_s0 }
0x205b   :  { %v2154_v11 = vpop.permute.xlu2 %2153 }
0x205c   :  { %v2159_v49 = vmul.f32 %v2154_v11, %v2108_v34 }
0x2063   :  { %v2156_v30 = vpop.permute.xlu0 %2155 }
0x2064   :  { %v2160_v25 = vmul.f32 %v2156_v30, %v2123_v61 }
0x2066   :  { %v2161_v7 = vpack.c.bf16 %v2160_v25, %v2159_v49 }
0x2068   :  { %2165 = vrot.lane.b32.xlu1 %v2161_v7, %s3014_s3 }
0x20da   :  { %v2166_v9 = vpop.permute.xlu1 %2165 }
0x20db   :  { %2585 = vmatmul.msk.bf16.vlgmr.msrb.gmra.mxu0 %vm261_vm9, %v2166_v9  ;;  %2586 = vmatmul.msk.bf16.vlgmr.msrb.gmra.mxu1 %vm261_vm9, %v2166_v9 }
0x2158   :  { %v2179_v12 = vpop.f32.mrf.mxu0  ;;  %v2193_v0 = vpop.f32.mrf.mxu1 }
0x2159   :  { %v2200_v22 = vadd.f32 %v2179_v12, %v3492_v59 }
0x215b   :  { %2854 = vtanh.f32 %v2200_v22  ;;  %v2587_v63 = vmul.f32 -1.442695, %v2200_v22 }
0x2160   :  { %v2181_v52 = vpop.f32.mrf.mxu0  ;;  %v2195_v3 = vpop.f32.mrf.mxu1 }
0x2161   :  { %v2855_v1 = vpop.eup %2854  ;;  %v2201_v56 = vadd.f32 %v2195_v3, %v3471_v46 }
0x2162   :  { %2246 = vrot.lane.b32.xlu2 %v2855_v1, %s3013_s0 }
0x2163   :  { %2856 = vtanh.f32 %v2201_v56  ;;  %v2588_v55 = vmul.f32 -1.442695, %v2201_v56 }
0x2164   :  { %2858 = vpow2.f32 %v2587_v63 }
0x2169   :  { %v2857_v41 = vpop.eup %2856 }
0x216a   :  { %2248 = vrot.lane.b32.xlu0 %v2857_v41, %s3013_s0  ;;  %v2859_v10 = vpop.eup %2858 }
0x216b   :  { %v2208_v5 = vadd.f32 1.0, %v2859_v10 }
0x216d   :  { %2860 = vrcp.f32 %v2208_v5  ;;  %v2221_v46 = vand.u32 2147483648, %v2208_v5  ;;  %vm2215_vm0 = vweird.f32 %v2208_v5  ;;  %v2219_v18 = vand.u32 2147483647, %v2208_v5 }
0x216e   :  { %2862 = vpow2.f32 %v2588_v55 }
0x216f   :  { %v2222_v31 = vor.u32 1.1754944e-38, %v2221_v46  ;;  %vm2220_vm2 = vcmp.eq.f32.partialorder %v2219_v18, 8.507059e+37  ;;  %v2363_v46 = vld [vmem:[#allocation10 + $0x28] sm:$0xff]  ;;  %v2362_v18 = vld [vmem:[#allocation10 + $0x20] sm:$0xff] }
0x2173   :  { %v2861_v6 = vpop.eup %2860 }
0x2174   :  { %v2211_v15 = vmul.f32 %v2861_v6, %v2208_v5  ;;  %vm2216_vm15 = vweird.f32 %v2861_v6  ;;  %v2863_v53 = vpop.eup %2862 }
0x2175   :  { %vm2217_vm1 = vmor %vm2215_vm0, %vm2216_vm15  ;;  %v2209_v58 = vadd.f32 1.0, %v2863_v53  ;;  %v2361_v53 = vld [vmem:[#allocation10 + $0x18] sm:$0xff] }
0x2176   :  { %v2212_v59 = vsub.f32 1.0, %v2211_v15 }
0x2177   :  { %2864 = vrcp.f32 %v2209_v58  ;;  %v2236_v42 = vand.u32 2147483648, %v2209_v58  ;;  %vm2230_vm4 = vweird.f32 %v2209_v58  ;;  %v2234_v39 = vand.u32 2147483647, %v2209_v58 }
0x2178   :  { %v2213_v14 = vmul.f32 %v2861_v6, %v2212_v59 }
0x2179   :  { %v2237_v8 = vor.u32 1.1754944e-38, %v2236_v42  ;;  %vm2235_vm6 = vcmp.eq.f32.partialorder %v2234_v39, 8.507059e+37 }
0x217a   :  { %v2214_v37 = vadd.f32 %v2861_v6, %v2213_v14  ;;  %v2365_v14 = vld [vmem:[#allocation10 + $0x38] sm:$0xff] }
0x217b   :  { %2381 = vmatpush.msra.mxu0 %v2365_v14 }
0x217c   :  { %v2218_v13 = vsel %vm2217_vm1, %v2861_v6, %v2214_v37  ;;  %v2364_v37 = vld [vmem:[#allocation10 + $0x30] sm:$0xff] }
0x217d   :  { %v2223_v57 = vsel %vm2220_vm2, %v2222_v31, %v2218_v13  ;;  %v2865_v32 = vpop.eup %2864  ;;  %2382 = vmatpush.msra.mxu0 %v2364_v37  ;;  %v2360_v13 = vld [vmem:[#allocation10 + $0x10] sm:$0xff]  ;;  %v2359_v31 = vld [vmem:[#allocation10 + $0x8] sm:$0xff] }
0x217e   :  { %v2226_v54 = vmul.f32 %v2865_v32, %v2209_v58  ;;  %vm2231_vm3 = vweird.f32 %v2865_v32  ;;  %v2242_v4 = vmul.f32 %v2223_v57, %v3619_v23 }
0x217f   :  { %vm2232_vm5 = vmor %vm2230_vm4, %vm2231_vm3  ;;  %2383 = vmatpush.msra.mxu0 %v2363_v46 }
0x2180   :  { %v2227_v20 = vsub.f32 1.0, %v2226_v54  ;;  %v2629_v54 = vld [vmem:[%s3663_s8] ss:$0 sm:$0xff] }
0x2181   :  { %2384 = vmatpush.msra.mxu0 %v2362_v18 }
0x2182   :  { %v2228_v29 = vmul.f32 %v2865_v32, %v2227_v20 }
0x2183   :  { %2385 = vmatpush.msra.mxu0 %v2361_v53 }
0x2184   :  { %v2229_v2 = vadd.f32 %v2865_v32, %v2228_v29 }
0x2185   :  { %2386 = vmatpush.msra.mxu0 %v2360_v13 }
0x2186   :  { %v2233_v50 = vsel %vm2232_vm5, %v2865_v32, %v2229_v2 }
0x2187   :  { %v2238_v21 = vsel %vm2235_vm6, %v2237_v8, %v2233_v50  ;;  %2387 = vmatpush.msra.mxu0 %v2359_v31 }
0x2188   :  { %v2243_v40 = vmul.f32 %v2238_v21, %v3614_v45  ;;  %v1411_v45 = vadd.f32 %v3585_v26, %v3466_v36 }
0x21bc   :  { %v2247_v16 = vpop.permute.xlu2 %2246 }
0x21bd   :  { %v2252_v38 = vmul.f32 %v2247_v16, %v2223_v57 }
0x21bf   :  { %2256 = vrot.lane.b32.xlu1 %v2252_v38, %s3014_s3 }
0x21dc   :  { %v2249_v61 = vpop.permute.xlu0 %2248 }
0x21dd   :  { %v2253_v62 = vmul.f32 %v2249_v61, %v2238_v21 }
0x21df   :  { %2258 = vrot.lane.b32.xlu2 %v2253_v62, %s3014_s3 }
0x2231   :  { %v2257_v28 = vpop.permute.xlu1 %2256 }
0x2232   :  { %v2262_v27 = vadd.f32 %v2257_v28, %v2242_v4 }
0x2234   :  { %2866 = vtanh.f32 %v2262_v27 }
0x2239   :  { %v2259_v33 = vpop.permute.xlu2 %2258 }
0x223a   :  { %v2867_v44 = vpop.eup %2866  ;;  %v2263_v19 = vadd.f32 %v2259_v33, %v2243_v40 }
0x223b   :  { %2268 = vrot.lane.b32.xlu0 %v2867_v44, %s3013_s0 }
0x223c   :  { %2868 = vtanh.f32 %v2263_v19 }
0x2242   :  { %v2869_v34 = vpop.eup %2868 }
0x2243   :  { %2270 = vrot.lane.b32.xlu1 %v2869_v34, %s3013_s0 }
0x22ad   :  { %v2269_v35 = vpop.permute.xlu0 %2268 }
0x22ae   :  { %v2274_v17 = vmul.f32 %v2269_v35, %v2223_v57 }
0x22b5   :  { %v2271_v43 = vpop.permute.xlu1 %2270 }
0x22b6   :  { %v2275_v48 = vmul.f32 %v2271_v43, %v2238_v21 }
0x22b8   :  { %v2276_v51 = vpack.c.bf16 %v2275_v48, %v2274_v17 }
0x22ba   :  { %2279 = vrot.lane.b32.xlu2 %v2276_v51, %s3014_s3 }
0x2314   :  { %v2280_v60 = vpop.permute.xlu2 %2279 }
0x2315   :  { %2589 = vmatmul.msk.bf16.vlgmr.msrb.gmra.mxu2 %vm261_vm9, %v2280_v60  ;;  %2590 = vmatmul.msk.bf16.vlgmr.msrb.gmra.mxu3 %vm261_vm9, %v2280_v60 }
0x2398   :  { %v2293_v23 = vpop.f32.mrf.mxu2  ;;  %v2306_v24 = vpop.f32.mrf.mxu3 }
0x2399   :  { %v2311_v11 = vadd.f32 %v2293_v23, %v1411_v45 }
0x239b   :  { %2870 = vtanh.f32 %v2311_v11  ;;  %v2591_v7 = vmul.f32 -1.442695, %v2311_v11 }
0x239d   :  { %2872 = vpow2.f32 %v2591_v7 }
0x23a0   :  { %v2295_v30 = vpop.f32.mrf.mxu2  ;;  %v2308_v49 = vpop.f32.mrf.mxu3 }
0x23a1   :  { %v2871_v25 = vpop.eup %2870 }
0x23a2   :  { %2334 = vrot.lane.b32.xlu0 %v2871_v25, %s3013_s0 }
0x23a3   :  { %v2873_v9 = vpop.eup %2872 }
0x23a4   :  { %v2315_v12 = vadd.f32 1.0, %v2873_v9 }
0x23a6   :  { %2874 = vrcp.f32 %v2315_v12  ;;  %v2327_v36 = vand.u32 2147483648, %v2315_v12  ;;  %vm2321_vm10 = vweird.f32 %v2315_v12  ;;  %v2325_v26 = vand.u32 2147483647, %v2315_v12 }
0x23a8   :  { %v2328_v41 = vor.u32 1.1754944e-38, %v2327_v36  ;;  %vm2326_vm12 = vcmp.eq.f32.partialorder %v2325_v26, 8.507059e+37 }
0x23ac   :  { %v2875_v0 = vpop.eup %2874 }
0x23ad   :  { %v2317_v22 = vmul.f32 %v2875_v0, %v2315_v12  ;;  %vm2322_vm8 = vweird.f32 %v2875_v0 }
0x23ae   :  { %vm2323_vm11 = vmor %vm2321_vm10, %vm2322_vm8 }
0x23af   :  { %v2318_v52 = vsub.f32 1.0, %v2317_v22 }
0x23b1   :  { %v2319_v3 = vmul.f32 %v2875_v0, %v2318_v52 }
0x23b3   :  { %v2320_v1 = vadd.f32 %v2875_v0, %v2319_v3 }
0x23b5   :  { %v2324_v56 = vsel %vm2323_vm11, %v2875_v0, %v2320_v1 }
0x23b6   :  { %v2329_v10 = vsel %vm2326_vm12, %v2328_v41, %v2324_v56 }
0x23b7   :  { %v2332_v6 = vmul.f32 %v2329_v10, %v2262_v27 }
0x2414   :  { %v2335_v63 = vpop.permute.xlu0 %2334 }
0x2415   :  { %v2337_v5 = vmul.f32 %v2335_v63, %v2329_v10 }
0x2417   :  { %2339 = vrot.lane.b32.xlu1 %v2337_v5, %s3014_s3 }
0x241f   :  { %2354 = vrot.lane.b32.xlu1 %v3507_v47, %s3013_s0  ;;  %v2358_v47 = vld [vmem:[#allocation10] sm:$0xff] }
0x2420   :  { %2388 = vmatpush.msra.mxu0 %v2358_v47 }
0x2489   :  { %v2340_v15 = vpop.permute.xlu1 %2339 }
0x248a   :  { %v2342_v59 = vadd.f32 %v2340_v15, %v2332_v6 }
0x248c   :  { %2876 = vtanh.f32 %v2342_v59 }
0x2491   :  { %v2355_v57 = vpop.permute.xlu1 %2354 }
0x2492   :  { %v2877_v55 = vpop.eup %2876 }
0x2493   :  { %2345 = vrot.lane.b32.xlu2 %v2877_v55, %s3013_s0 }
0x24ed   :  { %v2346_v58 = vpop.permute.xlu2 %2345 }
0x24ee   :  { %v2348_v16 = vmul.f32 %v2346_v58, %v2329_v10 }
0x24f0   :  { %2350 = vrot.lane.b32.xlu0 %v2348_v16, %s3014_s3 }
0x2562   :  { %v2351_v38 = vpop.permute.xlu0 %2350 }
0x2563   :  { %v2357_v32 = vsel %vm261_vm9, %v2351_v38, %v2355_v57 }
0x2564   :  { %2592 = vmatmul.msk.f32.vlgmr.msra.gmra.mxu0 %vm1371_vm7, %v2357_v32 }
0x25e1   :  { %v2390_v20 = vpop.f32.mrf.mxu0 }
0x25e2   :  { %v2391_v29 = vadd.f32 %v2629_v54, %v2390_v20 }
0x25e4   :  { %2393 = vst [vmem:[#allocation12] sm:$0xff] %v2391_v29 }
0x25e5   :  { %2404 = dma.vmem_to_hbm [thread:$0]  %s2400_s10, 128, %s2402_s13, [#allocation6]  }
0x25e6   :  { %3004 = dma.done.wait [#allocation6], 128  }
0x25e7   :  { %3005 = vsyncadd [#allocation6], 4294967168 }
0x25e8   :  { %2409 = vsyncpa [#allocation5], 1 }
0x25e9   :  { %2410 = vsyncpa [#allocation8], 1 }
0x25ea   :  { %2411 = vsyncpa [#allocation11], 1 }
0x25eb   :  { %2412 = vsyncpa [#allocation6], 1 }

</bundles_post_ra>
